<compile_context>
chip_gen: v5e
topology: v5e:2x2
jax: 0.10.0
libtpu: 0.0.40
codegen_flags: <defaults>
</compile_context>

<pallas_src>
import numpy as np
import jax
import jax.numpy as jnp
from jax.experimental import pallas as pl
from jax.experimental.pallas import tpu as pltpu

LN_EPS = 1e-5  # torch.nn.LayerNorm default


# ------------------------------ Pallas kernel ------------------------------ #

def _omega_cnn_kernel(x_ref, l1_ref, cb1_ref, l2_ref, cb2_ref, l3_ref, cb3_ref,
                      g1_ref, gb1_ref, g2_ref, gb2_ref, g3_ref, gb3_ref,
                      ps1_ref, eb1_ref, ps2_ref, eb2_ref,
                      wh_ref, msel_ref, gsum_ref, o_ref):
    """One batch tile (bt images), fully lane-batched: 3x(conv[+pool]+tanh+LN) + linear."""

    def conv(xs, l_ref, cb_ref):
        # out[Cout*Ho, bt*Wo] = sum_kx  L[kx] @ X @ kron(I_bt, C[kx])
        xs = xs.astype(cb_ref.dtype)
        acc = jnp.zeros((l_ref.shape[1], cb_ref.shape[2]), jnp.float32)
        for kx in range(3):
            t = jnp.dot(xs, cb_ref[kx], preferred_element_type=jnp.float32)      # [Cin*H, bt*Wo]
            acc = acc + jnp.dot(l_ref[kx], t.astype(l_ref.dtype),
                                preferred_element_type=jnp.float32)              # [Cout*Ho, bt*Wo]
        return acc

    def tanh_ln(a, g_ref, gb_ref, ps_ref, eb_ref):
        # tanh then LayerNorm over each (image, channel)'s Ho x Wo block; all stats in f32.
        n_ch = g_ref.shape[0]
        ho = a.shape[0] // n_ch
        wo = eb_ref.shape[1] // eb_ref.shape[0]
        inv_n = 1.0 / float(ho * wo)

        y = jnp.tanh(a)                                                           # [C*Ho, bt*Wo]
        rs = jnp.dot(g_ref[...], y, preferred_element_type=jnp.float32)           # [C, bt*Wo]
        rq = jnp.dot(g_ref[...], y * y, preferred_element_type=jnp.float32)       # [C, bt*Wo]
        mean = jnp.dot(rs, ps_ref[...], preferred_element_type=jnp.float32) * inv_n   # [C, bt]
        ex2 = jnp.dot(rq, ps_ref[...], preferred_element_type=jnp.float32) * inv_n    # [C, bt]
        rstd = jax.lax.rsqrt(ex2 - mean * mean + LN_EPS)                           # [C, bt]
        shift = mean * rstd                                                        # [C, bt]
        rstd_f = jnp.dot(gb_ref[...],
                         jnp.dot(rstd, eb_ref[...], preferred_element_type=jnp.float32),
                         preferred_element_type=jnp.float32)                       # [C*Ho, bt*Wo]
        shift_f = jnp.dot(gb_ref[...],
                          jnp.dot(shift, eb_ref[...], preferred_element_type=jnp.float32),
                          preferred_element_type=jnp.float32)                      # [C*Ho, bt*Wo]
        return y * rstd_f - shift_f

    x = x_ref[0]                                                        # [H, bt*W]
    y1 = tanh_ln(conv(x, l1_ref, cb1_ref), g1_ref, gb1_ref, ps1_ref, eb1_ref)   # [C1*14, bt*14]
    y2 = tanh_ln(conv(y1, l2_ref, cb2_ref), g2_ref, gb2_ref, ps2_ref, eb2_ref)  # [C2*7,  bt*7]
    y3 = tanh_ln(conv(y2, l3_ref, cb3_ref), g3_ref, gb3_ref, ps2_ref, eb2_ref)  # [C3*7,  bt*7]

    # Head: logits[o, j] = sum_{c,h,w} Wlin[o, c*49 + h*7 + w] * y3[(c,h), (j,w)]
    u = jnp.dot(wh_ref[...], y3, preferred_element_type=jnp.float32)                   # [out*7, bt*7]
    z = jnp.dot(u * msel_ref[...], ps2_ref[...], preferred_element_type=jnp.float32)   # [out*7, bt]
    o_ref[0] = jnp.dot(gsum_ref[...], z, preferred_element_type=jnp.float32)           # [out, bt]


# ---------------------- wrapper-side operand construction ------------------- #

def _band_np(h, k):
    """[H, H] with m[i, i + k - 1] = 1 (zero outside the image): row shift for tap k."""
    m = np.zeros((h, h), np.float32)
    for i in range(h):
        src = i + k - 1
        if 0 <= src < h:
            m[i, src] = 1.0
    return m


def _pool_np(h):
    """[H//2, H] averaging matrix for AvgPool2d(2) along one axis (0.5 per tap)."""
    ho = h // 2
    m = np.zeros((ho, h), np.float32)
    for p in range(ho):
        m[p, 2 * p] = 0.5
        m[p, 2 * p + 1] = 0.5
    return m


def _conv_row_mats(w, h, pool):
    """L [3, Cout*Ho, Cin*H]: channel mixing + row shift + row pool for each kx."""
    ph = _pool_np(h) if pool else np.eye(h, dtype=np.float32)
    ls = []
    for kx in range(3):
        lkx = 0.0
        for ky in range(3):
            lkx = lkx + jnp.kron(w[:, :, ky, kx], jnp.asarray(ph @ _band_np(h, ky)))
        ls.append(lkx)
    return jnp.stack(ls, 0).astype(jnp.float32)


def _conv_col_mats(h, bt, pool):
    """Cb [3, bt*W, bt*Wo]: block-diagonal kron(I_bt, column shift (+pool)) — constants."""
    ph = _pool_np(h) if pool else np.eye(h, dtype=np.float32)
    eye_bt = np.eye(bt, dtype=np.float32)
    cs = [np.kron(eye_bt, _band_np(h, kx).T @ ph.T) for kx in range(3)]
    return jnp.asarray(np.stack(cs, 0))


def _group_mats(c, ho):
    """G [C, C*Ho] per-channel row-group sum matrix and its transpose (broadcast back)."""
    g = np.zeros((c, c * ho), np.float32)
    for i in range(c):
        g[i, i * ho:(i + 1) * ho] = 1.0
    return jnp.asarray(g), jnp.asarray(g.T.copy())


def _seg_mats(bt, wo):
    """ps [bt*Wo, bt] per-image lane segment-sum; eb = ps.T for the lane broadcast."""
    ps = np.kron(np.eye(bt, dtype=np.float32), np.ones((wo, 1), np.float32))
    return jnp.asarray(ps), jnp.asarray(ps.T.copy())


def _head_mats(wlin, c3, hw, bt, out_dim):
    """Wh [(o,w),(c,h)], msel [(o,w),(j,w')] (w==w'), gsum [o,(o',w)] (o==o')."""
    wr = wlin.astype(jnp.float32).reshape(out_dim, c3, hw, hw)          # [o, c, h, w]
    wh = jnp.transpose(wr, (0, 3, 1, 2)).reshape(out_dim * hw, c3 * hw)
    p_mod = np.arange(out_dim * hw) % hw
    l_mod = np.arange(bt * hw) % hw
    msel = (p_mod[:, None] == l_mod[None, :]).astype(np.float32)
    gsum = ((np.arange(out_dim * hw)[None, :] // hw)
            == np.arange(out_dim)[:, None]).astype(np.float32)
    return wh, jnp.asarray(msel), jnp.asarray(gsum)


def _pick_bt(B, max_bt=16):
    """Largest divisor of B <= max_bt; keep >= 2 grid steps once B >= 4 (v7x has 2 TCs)."""
    best = 1
    for d in range(1, min(B, max_bt) + 1):
        if B % d:
            continue
        if B >= 4 and B // d < 2:
            continue
        best = d
    return best


def omega_cnn_forward(x_nchw, w1, w2, w3, wlin, matmul_dtype=jnp.float32):
    B = x_nchw.shape[0]
    H = x_nchw.shape[2]                    # 28 (square MNIST-like images, in_channels = 1)
    assert x_nchw.shape[3] == H
    h1, h2, h3 = H, H // 2, H // 4         # 28, 14, 7
    c1o, c2o, c3o = w1.shape[0], w2.shape[0], w3.shape[0]
    out_dim = wlin.shape[0]

    bt = _pick_bt(B)
    nb = B // bt

    # Input as lane-batched slabs: [nb, H, bt*W], lanes = (image-in-tile, column).
    x = x_nchw[:, 0, :, :].astype(jnp.float32)
    x2 = (x.reshape(nb, bt, h1, h1).transpose(0, 2, 1, 3)
            .reshape(nb, h1, bt * h1).astype(matmul_dtype))

    # Derived matmul operands (tiny, built once per call).
    l1 = _conv_row_mats(w1.astype(jnp.float32), h1, True).astype(matmul_dtype)
    l2 = _conv_row_mats(w2.astype(jnp.float32), h2, True).astype(matmul_dtype)
    l3 = _conv_row_mats(w3.astype(jnp.float32), h3, False).astype(matmul_dtype)
    cb1 = _conv_col_mats(h1, bt, True).astype(matmul_dtype)
    cb2 = _conv_col_mats(h2, bt, True).astype(matmul_dtype)
    cb3 = _conv_col_mats(h3, bt, False).astype(matmul_dtype)
    g1, gb1 = _group_mats(c1o, h2)
    g2, gb2 = _group_mats(c2o, h3)
    g3, gb3 = _group_mats(c3o, h3)
    ps1, eb1 = _seg_mats(bt, h2)
    ps2, eb2 = _seg_mats(bt, h3)          # ps2 also serves as the per-image comb in the head
    wh, msel, gsum = _head_mats(wlin, c3o, h3, bt, out_dim)

    full3 = lambda i: (0, 0, 0)
    full2 = lambda i: (0, 0)

    out = pl.pallas_call(
        _omega_cnn_kernel,
        out_shape=jax.ShapeDtypeStruct((nb, out_dim, bt), jnp.float32),
        grid=(nb,),
        in_specs=[
            pl.BlockSpec((1, h1, bt * h1), lambda i: (i, 0, 0)),
            pl.BlockSpec(l1.shape, full3), pl.BlockSpec(cb1.shape, full3),
            pl.BlockSpec(l2.shape, full3), pl.BlockSpec(cb2.shape, full3),
            pl.BlockSpec(l3.shape, full3), pl.BlockSpec(cb3.shape, full3),
            pl.BlockSpec(g1.shape, full2), pl.BlockSpec(gb1.shape, full2),
            pl.BlockSpec(g2.shape, full2), pl.BlockSpec(gb2.shape, full2),
            pl.BlockSpec(g3.shape, full2), pl.BlockSpec(gb3.shape, full2),
            pl.BlockSpec(ps1.shape, full2), pl.BlockSpec(eb1.shape, full2),
            pl.BlockSpec(ps2.shape, full2), pl.BlockSpec(eb2.shape, full2),
            pl.BlockSpec(wh.shape, full2), pl.BlockSpec(msel.shape, full2),
            pl.BlockSpec(gsum.shape, full2),
        ],
        out_specs=pl.BlockSpec((1, out_dim, bt), lambda i: (i, 0, 0)),
        compiler_params=pltpu.CompilerParams(dimension_semantics=("parallel",)),
    )(x2, l1, cb1, l2, cb2, l3, cb3, g1, gb1, g2, gb2, g3, gb3,
      ps1, eb1, ps2, eb2, wh, msel, gsum)

    # [nb, out, bt] -> [B, out]  (image index = tile * bt + in-tile position)
    return out.transpose(0, 2, 1).reshape(B, out_dim)


# ----------------------------- pure-JAX reference --------------------------- #

def reference_forward(x_nchw, w1, w2, w3, wlin):
    def conv(x, w):
        return jax.lax.conv_general_dilated(
            x, w, window_strides=(1, 1), padding="SAME",
            dimension_numbers=("NCHW", "OIHW", "NCHW"))

    def pool(x):
        s = jax.lax.reduce_window(x, 0.0, jax.lax.add, (1, 1, 2, 2), (1, 1, 2, 2), "VALID")
        return s / 4.0

    def ln(x):
        m = x.mean(axis=(-2, -1), keepdims=True)
        v = ((x - m) ** 2).mean(axis=(-2, -1), keepdims=True)
        return (x - m) / jnp.sqrt(v + LN_EPS)

    x = ln(jnp.tanh(pool(conv(x_nchw, w1))))
    x = ln(jnp.tanh(pool(conv(x, w2))))
    x = ln(jnp.tanh(conv(x, w3)))
    h = x.reshape(x.shape[0], -1)
    return h @ wlin.T


# ----------------------------------- main ----------------------------------- #

if __name__ == "__main__":
    hidden = (16, 16, 16)
    key = jax.random.PRNGKey(0)
    k0, k1, k2, k3, k4 = jax.random.split(key, 5)

    # MNIST-like input implied by the module (LayerNorm(14,14)/(7,7), Linear(16*7*7, 10)).
    B = 8                                  # -> bt=4, nb=2 grid steps (both v7x TCs busy)
    x = jax.random.normal(k0, (B, 1, 28, 28), jnp.float32)

    # Deterministic synthetic parameters playing the role of the dense 3x3 effective
    # weights produced by omegaConv.calculate_weight_tensor().
    w1 = jax.random.normal(k1, (hidden[0], 1, 3, 3), jnp.float32) / jnp.sqrt(1.0 * 9.0)
    w2 = jax.random.normal(k2, (hidden[1], hidden[0], 3, 3), jnp.float32) / jnp.sqrt(hidden[0] * 9.0)
    w3 = jax.random.normal(k3, (hidden[2], hidden[1], 3, 3), jnp.float32) / jnp.sqrt(hidden[1] * 9.0)
    wlin = jax.random.normal(k4, (10, hidden[2] * 7 * 7), jnp.float32) / jnp.sqrt(hidden[2] * 49.0)

    out = jax.jit(omega_cnn_forward)(x, w1, w2, w3, wlin)
    out = jax.block_until_ready(out)

    ref = reference_forward(x, w1, w2, w3, wlin)
    assert out.shape == (B, 10), out.shape
    assert jnp.allclose(out, ref, rtol=5e-3, atol=5e-3), (out, ref)

    print("KERNEL_OK")
</pallas_src>

<mosaic_0001>
module attributes {stable_mosaic.version = 11 : i64} {
  func.func @_omega_cnn_kernel(%arg0: i32, %arg1: memref<1x28x112xf32, #tpu.memory_space<vmem>>, %arg2: memref<3x224x28xf32, #tpu.memory_space<vmem>>, %arg3: memref<3x112x56xf32, #tpu.memory_space<vmem>>, %arg4: memref<3x112x224xf32, #tpu.memory_space<vmem>>, %arg5: memref<3x56x28xf32, #tpu.memory_space<vmem>>, %arg6: memref<3x112x112xf32, #tpu.memory_space<vmem>>, %arg7: memref<3x28x28xf32, #tpu.memory_space<vmem>>, %arg8: memref<16x224xf32, #tpu.memory_space<vmem>>, %arg9: memref<224x16xf32, #tpu.memory_space<vmem>>, %arg10: memref<16x112xf32, #tpu.memory_space<vmem>>, %arg11: memref<112x16xf32, #tpu.memory_space<vmem>>, %arg12: memref<16x112xf32, #tpu.memory_space<vmem>>, %arg13: memref<112x16xf32, #tpu.memory_space<vmem>>, %arg14: memref<56x4xf32, #tpu.memory_space<vmem>>, %arg15: memref<4x56xf32, #tpu.memory_space<vmem>>, %arg16: memref<28x4xf32, #tpu.memory_space<vmem>>, %arg17: memref<4x28xf32, #tpu.memory_space<vmem>>, %arg18: memref<70x112xf32, #tpu.memory_space<vmem>>, %arg19: memref<70x28xf32, #tpu.memory_space<vmem>>, %arg20: memref<10x70xf32, #tpu.memory_space<vmem>>, %arg21: memref<1x10x4xf32, #tpu.memory_space<vmem>>) attributes {dimension_semantics = [#tpu.dimension_semantics<parallel>], iteration_bounds = array<i64: 2>, scalar_prefetch = 0 : i64, scratch_operands = 0 : i64, tpu.core_type = #tpu.core_type<tc>, window_params = [{transform_indices = @transform_0, window_bounds = array<i64: 1, 28, 112>}, {pipeline_mode = #tpu.pipeline_mode<synchronous>, transform_indices = @transform_1, window_bounds = array<i64: 3, 224, 28>}, {pipeline_mode = #tpu.pipeline_mode<synchronous>, transform_indices = @transform_2, window_bounds = array<i64: 3, 112, 56>}, {pipeline_mode = #tpu.pipeline_mode<synchronous>, transform_indices = @transform_3, window_bounds = array<i64: 3, 112, 224>}, {pipeline_mode = #tpu.pipeline_mode<synchronous>, transform_indices = @transform_4, window_bounds = array<i64: 3, 56, 28>}, {pipeline_mode = #tpu.pipeline_mode<synchronous>, transform_indices = @transform_5, window_bounds = array<i64: 3, 112, 112>}, {pipeline_mode = #tpu.pipeline_mode<synchronous>, transform_indices = @transform_6, window_bounds = array<i64: 3, 28, 28>}, {pipeline_mode = #tpu.pipeline_mode<synchronous>, transform_indices = @transform_7, window_bounds = array<i64: 16, 224>}, {pipeline_mode = #tpu.pipeline_mode<synchronous>, transform_indices = @transform_8, window_bounds = array<i64: 224, 16>}, {pipeline_mode = #tpu.pipeline_mode<synchronous>, transform_indices = @transform_9, window_bounds = array<i64: 16, 112>}, {pipeline_mode = #tpu.pipeline_mode<synchronous>, transform_indices = @transform_10, window_bounds = array<i64: 112, 16>}, {pipeline_mode = #tpu.pipeline_mode<synchronous>, transform_indices = @transform_11, window_bounds = array<i64: 16, 112>}, {pipeline_mode = #tpu.pipeline_mode<synchronous>, transform_indices = @transform_12, window_bounds = array<i64: 112, 16>}, {pipeline_mode = #tpu.pipeline_mode<synchronous>, transform_indices = @transform_13, window_bounds = array<i64: 56, 4>}, {pipeline_mode = #tpu.pipeline_mode<synchronous>, transform_indices = @transform_14, window_bounds = array<i64: 4, 56>}, {pipeline_mode = #tpu.pipeline_mode<synchronous>, transform_indices = @transform_15, window_bounds = array<i64: 28, 4>}, {pipeline_mode = #tpu.pipeline_mode<synchronous>, transform_indices = @transform_16, window_bounds = array<i64: 4, 28>}, {pipeline_mode = #tpu.pipeline_mode<synchronous>, transform_indices = @transform_17, window_bounds = array<i64: 70, 112>}, {pipeline_mode = #tpu.pipeline_mode<synchronous>, transform_indices = @transform_18, window_bounds = array<i64: 70, 28>}, {pipeline_mode = #tpu.pipeline_mode<synchronous>, transform_indices = @transform_19, window_bounds = array<i64: 10, 70>}, {transform_indices = @transform_20, window_bounds = array<i64: 1, 10, 4>}]} {
    %c0 = arith.constant 0 : index
    %c0_0 = arith.constant 0 : index
    %c0_1 = arith.constant 0 : index
    %0 = vector.load %arg1[%c0, %c0_0, %c0_1] : memref<1x28x112xf32, #tpu.memory_space<vmem>>, vector<1x28x112xf32>
    %1 = vector.shape_cast %0 : vector<1x28x112xf32> to vector<28x112xf32>
    %cst = arith.constant 0.000000e+00 : f32
    %2 = vector.broadcast %cst : f32 to vector<224x56xf32>
    %c0_2 = arith.constant 0 : index
    %c0_3 = arith.constant 0 : index
    %c0_4 = arith.constant 0 : index
    %3 = vector.load %arg3[%c0_2, %c0_3, %c0_4] : memref<3x112x56xf32, #tpu.memory_space<vmem>>, vector<1x112x56xf32>
    %4 = vector.shape_cast %3 : vector<1x112x56xf32> to vector<112x56xf32>
    %cst_5 = arith.constant dense<0.000000e+00> : vector<28x56xf32>
    %5 = tpu.matmul %1, %4, %cst_5 {dimension_numbers = #tpu.dot_dimension_numbers<[1], [0], [0], [1], [0, 0, 1, 1], [], []>} : vector<28x112xf32>, vector<112x56xf32>, vector<28x56xf32> -> vector<28x56xf32>
    %c0_6 = arith.constant 0 : index
    %c0_7 = arith.constant 0 : index
    %c0_8 = arith.constant 0 : index
    %6 = vector.load %arg2[%c0_6, %c0_7, %c0_8] : memref<3x224x28xf32, #tpu.memory_space<vmem>>, vector<1x224x28xf32>
    %7 = vector.shape_cast %6 : vector<1x224x28xf32> to vector<224x28xf32>
    %cst_9 = arith.constant dense<0.000000e+00> : vector<224x56xf32>
    %8 = tpu.matmul %7, %5, %cst_9 {dimension_numbers = #tpu.dot_dimension_numbers<[1], [0], [0], [1], [0, 0, 1, 1], [], []>} : vector<224x28xf32>, vector<28x56xf32>, vector<224x56xf32> -> vector<224x56xf32>
    %9 = arith.addf %2, %8 : vector<224x56xf32>
    %c1 = arith.constant 1 : index
    %c0_10 = arith.constant 0 : index
    %c0_11 = arith.constant 0 : index
    %10 = vector.load %arg3[%c1, %c0_10, %c0_11] : memref<3x112x56xf32, #tpu.memory_space<vmem>>, vector<1x112x56xf32>
    %11 = vector.shape_cast %10 : vector<1x112x56xf32> to vector<112x56xf32>
    %cst_12 = arith.constant dense<0.000000e+00> : vector<28x56xf32>
    %12 = tpu.matmul %1, %11, %cst_12 {dimension_numbers = #tpu.dot_dimension_numbers<[1], [0], [0], [1], [0, 0, 1, 1], [], []>} : vector<28x112xf32>, vector<112x56xf32>, vector<28x56xf32> -> vector<28x56xf32>
    %c1_13 = arith.constant 1 : index
    %c0_14 = arith.constant 0 : index
    %c0_15 = arith.constant 0 : index
    %13 = vector.load %arg2[%c1_13, %c0_14, %c0_15] : memref<3x224x28xf32, #tpu.memory_space<vmem>>, vector<1x224x28xf32>
    %14 = vector.shape_cast %13 : vector<1x224x28xf32> to vector<224x28xf32>
    %cst_16 = arith.constant dense<0.000000e+00> : vector<224x56xf32>
    %15 = tpu.matmul %14, %12, %cst_16 {dimension_numbers = #tpu.dot_dimension_numbers<[1], [0], [0], [1], [0, 0, 1, 1], [], []>} : vector<224x28xf32>, vector<28x56xf32>, vector<224x56xf32> -> vector<224x56xf32>
    %16 = arith.addf %9, %15 : vector<224x56xf32>
    %c2 = arith.constant 2 : index
    %c0_17 = arith.constant 0 : index
    %c0_18 = arith.constant 0 : index
    %17 = vector.load %arg3[%c2, %c0_17, %c0_18] : memref<3x112x56xf32, #tpu.memory_space<vmem>>, vector<1x112x56xf32>
    %18 = vector.shape_cast %17 : vector<1x112x56xf32> to vector<112x56xf32>
    %cst_19 = arith.constant dense<0.000000e+00> : vector<28x56xf32>
    %19 = tpu.matmul %1, %18, %cst_19 {dimension_numbers = #tpu.dot_dimension_numbers<[1], [0], [0], [1], [0, 0, 1, 1], [], []>} : vector<28x112xf32>, vector<112x56xf32>, vector<28x56xf32> -> vector<28x56xf32>
    %c2_20 = arith.constant 2 : index
    %c0_21 = arith.constant 0 : index
    %c0_22 = arith.constant 0 : index
    %20 = vector.load %arg2[%c2_20, %c0_21, %c0_22] : memref<3x224x28xf32, #tpu.memory_space<vmem>>, vector<1x224x28xf32>
    %21 = vector.shape_cast %20 : vector<1x224x28xf32> to vector<224x28xf32>
    %cst_23 = arith.constant dense<0.000000e+00> : vector<224x56xf32>
    %22 = tpu.matmul %21, %19, %cst_23 {dimension_numbers = #tpu.dot_dimension_numbers<[1], [0], [0], [1], [0, 0, 1, 1], [], []>} : vector<224x28xf32>, vector<28x56xf32>, vector<224x56xf32> -> vector<224x56xf32>
    %23 = arith.addf %16, %22 : vector<224x56xf32>
    %24 = math.tanh %23 : vector<224x56xf32>
    %c0_24 = arith.constant 0 : index
    %c0_25 = arith.constant 0 : index
    %25 = vector.load %arg8[%c0_24, %c0_25] : memref<16x224xf32, #tpu.memory_space<vmem>>, vector<16x224xf32>
    %cst_26 = arith.constant dense<0.000000e+00> : vector<16x56xf32>
    %26 = tpu.matmul %25, %24, %cst_26 {dimension_numbers = #tpu.dot_dimension_numbers<[1], [0], [0], [1], [0, 0, 1, 1], [], []>} : vector<16x224xf32>, vector<224x56xf32>, vector<16x56xf32> -> vector<16x56xf32>
    %c0_27 = arith.constant 0 : index
    %c0_28 = arith.constant 0 : index
    %27 = vector.load %arg8[%c0_27, %c0_28] : memref<16x224xf32, #tpu.memory_space<vmem>>, vector<16x224xf32>
    %28 = arith.mulf %24, %24 : vector<224x56xf32>
    %cst_29 = arith.constant dense<0.000000e+00> : vector<16x56xf32>
    %29 = tpu.matmul %27, %28, %cst_29 {dimension_numbers = #tpu.dot_dimension_numbers<[1], [0], [0], [1], [0, 0, 1, 1], [], []>} : vector<16x224xf32>, vector<224x56xf32>, vector<16x56xf32> -> vector<16x56xf32>
    %c0_30 = arith.constant 0 : index
    %c0_31 = arith.constant 0 : index
    %30 = vector.load %arg14[%c0_30, %c0_31] : memref<56x4xf32, #tpu.memory_space<vmem>>, vector<56x4xf32>
    %cst_32 = arith.constant dense<0.000000e+00> : vector<16x4xf32>
    %31 = tpu.matmul %26, %30, %cst_32 {dimension_numbers = #tpu.dot_dimension_numbers<[1], [0], [0], [1], [0, 0, 1, 1], [], []>} : vector<16x56xf32>, vector<56x4xf32>, vector<16x4xf32> -> vector<16x4xf32>
    %cst_33 = arith.constant 0.00510204071 : f32
    %32 = vector.broadcast %cst_33 : f32 to vector<16x4xf32>
    %33 = arith.mulf %31, %32 : vector<16x4xf32>
    %c0_34 = arith.constant 0 : index
    %c0_35 = arith.constant 0 : index
    %34 = vector.load %arg14[%c0_34, %c0_35] : memref<56x4xf32, #tpu.memory_space<vmem>>, vector<56x4xf32>
    %cst_36 = arith.constant dense<0.000000e+00> : vector<16x4xf32>
    %35 = tpu.matmul %29, %34, %cst_36 {dimension_numbers = #tpu.dot_dimension_numbers<[1], [0], [0], [1], [0, 0, 1, 1], [], []>} : vector<16x56xf32>, vector<56x4xf32>, vector<16x4xf32> -> vector<16x4xf32>
    %cst_37 = arith.constant 0.00510204071 : f32
    %36 = vector.broadcast %cst_37 : f32 to vector<16x4xf32>
    %37 = arith.mulf %35, %36 : vector<16x4xf32>
    %38 = arith.mulf %33, %33 : vector<16x4xf32>
    %39 = arith.subf %37, %38 : vector<16x4xf32>
    %cst_38 = arith.constant 9.99999974E-6 : f32
    %40 = vector.broadcast %cst_38 : f32 to vector<16x4xf32>
    %41 = arith.addf %39, %40 : vector<16x4xf32>
    %42 = math.rsqrt %41 : vector<16x4xf32>
    %43 = arith.mulf %33, %42 : vector<16x4xf32>
    %c0_39 = arith.constant 0 : index
    %c0_40 = arith.constant 0 : index
    %44 = vector.load %arg9[%c0_39, %c0_40] : memref<224x16xf32, #tpu.memory_space<vmem>>, vector<224x16xf32>
    %c0_41 = arith.constant 0 : index
    %c0_42 = arith.constant 0 : index
    %45 = vector.load %arg15[%c0_41, %c0_42] : memref<4x56xf32, #tpu.memory_space<vmem>>, vector<4x56xf32>
    %cst_43 = arith.constant dense<0.000000e+00> : vector<16x56xf32>
    %46 = tpu.matmul %42, %45, %cst_43 {dimension_numbers = #tpu.dot_dimension_numbers<[1], [0], [0], [1], [0, 0, 1, 1], [], []>} : vector<16x4xf32>, vector<4x56xf32>, vector<16x56xf32> -> vector<16x56xf32>
    %cst_44 = arith.constant dense<0.000000e+00> : vector<224x56xf32>
    %47 = tpu.matmul %44, %46, %cst_44 {dimension_numbers = #tpu.dot_dimension_numbers<[1], [0], [0], [1], [0, 0, 1, 1], [], []>} : vector<224x16xf32>, vector<16x56xf32>, vector<224x56xf32> -> vector<224x56xf32>
    %c0_45 = arith.constant 0 : index
    %c0_46 = arith.constant 0 : index
    %48 = vector.load %arg9[%c0_45, %c0_46] : memref<224x16xf32, #tpu.memory_space<vmem>>, vector<224x16xf32>
    %c0_47 = arith.constant 0 : index
    %c0_48 = arith.constant 0 : index
    %49 = vector.load %arg15[%c0_47, %c0_48] : memref<4x56xf32, #tpu.memory_space<vmem>>, vector<4x56xf32>
    %cst_49 = arith.constant dense<0.000000e+00> : vector<16x56xf32>
    %50 = tpu.matmul %43, %49, %cst_49 {dimension_numbers = #tpu.dot_dimension_numbers<[1], [0], [0], [1], [0, 0, 1, 1], [], []>} : vector<16x4xf32>, vector<4x56xf32>, vector<16x56xf32> -> vector<16x56xf32>
    %cst_50 = arith.constant dense<0.000000e+00> : vector<224x56xf32>
    %51 = tpu.matmul %48, %50, %cst_50 {dimension_numbers = #tpu.dot_dimension_numbers<[1], [0], [0], [1], [0, 0, 1, 1], [], []>} : vector<224x16xf32>, vector<16x56xf32>, vector<224x56xf32> -> vector<224x56xf32>
    %52 = arith.mulf %24, %47 : vector<224x56xf32>
    %53 = arith.subf %52, %51 : vector<224x56xf32>
    %cst_51 = arith.constant 0.000000e+00 : f32
    %54 = vector.broadcast %cst_51 : f32 to vector<112x28xf32>
    %c0_52 = arith.constant 0 : index
    %c0_53 = arith.constant 0 : index
    %c0_54 = arith.constant 0 : index
    %55 = vector.load %arg5[%c0_52, %c0_53, %c0_54] : memref<3x56x28xf32, #tpu.memory_space<vmem>>, vector<1x56x28xf32>
    %56 = vector.shape_cast %55 : vector<1x56x28xf32> to vector<56x28xf32>
    %cst_55 = arith.constant dense<0.000000e+00> : vector<224x28xf32>
    %57 = tpu.matmul %53, %56, %cst_55 {dimension_numbers = #tpu.dot_dimension_numbers<[1], [0], [0], [1], [0, 0, 1, 1], [], []>} : vector<224x56xf32>, vector<56x28xf32>, vector<224x28xf32> -> vector<224x28xf32>
    %c0_56 = arith.constant 0 : index
    %c0_57 = arith.constant 0 : index
    %c0_58 = arith.constant 0 : index
    %58 = vector.load %arg4[%c0_56, %c0_57, %c0_58] : memref<3x112x224xf32, #tpu.memory_space<vmem>>, vector<1x112x224xf32>
    %59 = vector.shape_cast %58 : vector<1x112x224xf32> to vector<112x224xf32>
    %cst_59 = arith.constant dense<0.000000e+00> : vector<112x28xf32>
    %60 = tpu.matmul %59, %57, %cst_59 {dimension_numbers = #tpu.dot_dimension_numbers<[1], [0], [0], [1], [0, 0, 1, 1], [], []>} : vector<112x224xf32>, vector<224x28xf32>, vector<112x28xf32> -> vector<112x28xf32>
    %61 = arith.addf %54, %60 : vector<112x28xf32>
    %c1_60 = arith.constant 1 : index
    %c0_61 = arith.constant 0 : index
    %c0_62 = arith.constant 0 : index
    %62 = vector.load %arg5[%c1_60, %c0_61, %c0_62] : memref<3x56x28xf32, #tpu.memory_space<vmem>>, vector<1x56x28xf32>
    %63 = vector.shape_cast %62 : vector<1x56x28xf32> to vector<56x28xf32>
    %cst_63 = arith.constant dense<0.000000e+00> : vector<224x28xf32>
    %64 = tpu.matmul %53, %63, %cst_63 {dimension_numbers = #tpu.dot_dimension_numbers<[1], [0], [0], [1], [0, 0, 1, 1], [], []>} : vector<224x56xf32>, vector<56x28xf32>, vector<224x28xf32> -> vector<224x28xf32>
    %c1_64 = arith.constant 1 : index
    %c0_65 = arith.constant 0 : index
    %c0_66 = arith.constant 0 : index
    %65 = vector.load %arg4[%c1_64, %c0_65, %c0_66] : memref<3x112x224xf32, #tpu.memory_space<vmem>>, vector<1x112x224xf32>
    %66 = vector.shape_cast %65 : vector<1x112x224xf32> to vector<112x224xf32>
    %cst_67 = arith.constant dense<0.000000e+00> : vector<112x28xf32>
    %67 = tpu.matmul %66, %64, %cst_67 {dimension_numbers = #tpu.dot_dimension_numbers<[1], [0], [0], [1], [0, 0, 1, 1], [], []>} : vector<112x224xf32>, vector<224x28xf32>, vector<112x28xf32> -> vector<112x28xf32>
    %68 = arith.addf %61, %67 : vector<112x28xf32>
    %c2_68 = arith.constant 2 : index
    %c0_69 = arith.constant 0 : index
    %c0_70 = arith.constant 0 : index
    %69 = vector.load %arg5[%c2_68, %c0_69, %c0_70] : memref<3x56x28xf32, #tpu.memory_space<vmem>>, vector<1x56x28xf32>
    %70 = vector.shape_cast %69 : vector<1x56x28xf32> to vector<56x28xf32>
    %cst_71 = arith.constant dense<0.000000e+00> : vector<224x28xf32>
    %71 = tpu.matmul %53, %70, %cst_71 {dimension_numbers = #tpu.dot_dimension_numbers<[1], [0], [0], [1], [0, 0, 1, 1], [], []>} : vector<224x56xf32>, vector<56x28xf32>, vector<224x28xf32> -> vector<224x28xf32>
    %c2_72 = arith.constant 2 : index
    %c0_73 = arith.constant 0 : index
    %c0_74 = arith.constant 0 : index
    %72 = vector.load %arg4[%c2_72, %c0_73, %c0_74] : memref<3x112x224xf32, #tpu.memory_space<vmem>>, vector<1x112x224xf32>
    %73 = vector.shape_cast %72 : vector<1x112x224xf32> to vector<112x224xf32>
    %cst_75 = arith.constant dense<0.000000e+00> : vector<112x28xf32>
    %74 = tpu.matmul %73, %71, %cst_75 {dimension_numbers = #tpu.dot_dimension_numbers<[1], [0], [0], [1], [0, 0, 1, 1], [], []>} : vector<112x224xf32>, vector<224x28xf32>, vector<112x28xf32> -> vector<112x28xf32>
    %75 = arith.addf %68, %74 : vector<112x28xf32>
    %76 = math.tanh %75 : vector<112x28xf32>
    %c0_76 = arith.constant 0 : index
    %c0_77 = arith.constant 0 : index
    %77 = vector.load %arg10[%c0_76, %c0_77] : memref<16x112xf32, #tpu.memory_space<vmem>>, vector<16x112xf32>
    %cst_78 = arith.constant dense<0.000000e+00> : vector<16x28xf32>
    %78 = tpu.matmul %77, %76, %cst_78 {dimension_numbers = #tpu.dot_dimension_numbers<[1], [0], [0], [1], [0, 0, 1, 1], [], []>} : vector<16x112xf32>, vector<112x28xf32>, vector<16x28xf32> -> vector<16x28xf32>
    %c0_79 = arith.constant 0 : index
    %c0_80 = arith.constant 0 : index
    %79 = vector.load %arg10[%c0_79, %c0_80] : memref<16x112xf32, #tpu.memory_space<vmem>>, vector<16x112xf32>
    %80 = arith.mulf %76, %76 : vector<112x28xf32>
    %cst_81 = arith.constant dense<0.000000e+00> : vector<16x28xf32>
    %81 = tpu.matmul %79, %80, %cst_81 {dimension_numbers = #tpu.dot_dimension_numbers<[1], [0], [0], [1], [0, 0, 1, 1], [], []>} : vector<16x112xf32>, vector<112x28xf32>, vector<16x28xf32> -> vector<16x28xf32>
    %c0_82 = arith.constant 0 : index
    %c0_83 = arith.constant 0 : index
    %82 = vector.load %arg16[%c0_82, %c0_83] : memref<28x4xf32, #tpu.memory_space<vmem>>, vector<28x4xf32>
    %cst_84 = arith.constant dense<0.000000e+00> : vector<16x4xf32>
    %83 = tpu.matmul %78, %82, %cst_84 {dimension_numbers = #tpu.dot_dimension_numbers<[1], [0], [0], [1], [0, 0, 1, 1], [], []>} : vector<16x28xf32>, vector<28x4xf32>, vector<16x4xf32> -> vector<16x4xf32>
    %cst_85 = arith.constant 0.0204081628 : f32
    %84 = vector.broadcast %cst_85 : f32 to vector<16x4xf32>
    %85 = arith.mulf %83, %84 : vector<16x4xf32>
    %c0_86 = arith.constant 0 : index
    %c0_87 = arith.constant 0 : index
    %86 = vector.load %arg16[%c0_86, %c0_87] : memref<28x4xf32, #tpu.memory_space<vmem>>, vector<28x4xf32>
    %cst_88 = arith.constant dense<0.000000e+00> : vector<16x4xf32>
    %87 = tpu.matmul %81, %86, %cst_88 {dimension_numbers = #tpu.dot_dimension_numbers<[1], [0], [0], [1], [0, 0, 1, 1], [], []>} : vector<16x28xf32>, vector<28x4xf32>, vector<16x4xf32> -> vector<16x4xf32>
    %cst_89 = arith.constant 0.0204081628 : f32
    %88 = vector.broadcast %cst_89 : f32 to vector<16x4xf32>
    %89 = arith.mulf %87, %88 : vector<16x4xf32>
    %90 = arith.mulf %85, %85 : vector<16x4xf32>
    %91 = arith.subf %89, %90 : vector<16x4xf32>
    %cst_90 = arith.constant 9.99999974E-6 : f32
    %92 = vector.broadcast %cst_90 : f32 to vector<16x4xf32>
    %93 = arith.addf %91, %92 : vector<16x4xf32>
    %94 = math.rsqrt %93 : vector<16x4xf32>
    %95 = arith.mulf %85, %94 : vector<16x4xf32>
    %c0_91 = arith.constant 0 : index
    %c0_92 = arith.constant 0 : index
    %96 = vector.load %arg11[%c0_91, %c0_92] : memref<112x16xf32, #tpu.memory_space<vmem>>, vector<112x16xf32>
    %c0_93 = arith.constant 0 : index
    %c0_94 = arith.constant 0 : index
    %97 = vector.load %arg17[%c0_93, %c0_94] : memref<4x28xf32, #tpu.memory_space<vmem>>, vector<4x28xf32>
    %cst_95 = arith.constant dense<0.000000e+00> : vector<16x28xf32>
    %98 = tpu.matmul %94, %97, %cst_95 {dimension_numbers = #tpu.dot_dimension_numbers<[1], [0], [0], [1], [0, 0, 1, 1], [], []>} : vector<16x4xf32>, vector<4x28xf32>, vector<16x28xf32> -> vector<16x28xf32>
    %cst_96 = arith.constant dense<0.000000e+00> : vector<112x28xf32>
    %99 = tpu.matmul %96, %98, %cst_96 {dimension_numbers = #tpu.dot_dimension_numbers<[1], [0], [0], [1], [0, 0, 1, 1], [], []>} : vector<112x16xf32>, vector<16x28xf32>, vector<112x28xf32> -> vector<112x28xf32>
    %c0_97 = arith.constant 0 : index
    %c0_98 = arith.constant 0 : index
    %100 = vector.load %arg11[%c0_97, %c0_98] : memref<112x16xf32, #tpu.memory_space<vmem>>, vector<112x16xf32>
    %c0_99 = arith.constant 0 : index
    %c0_100 = arith.constant 0 : index
    %101 = vector.load %arg17[%c0_99, %c0_100] : memref<4x28xf32, #tpu.memory_space<vmem>>, vector<4x28xf32>
    %cst_101 = arith.constant dense<0.000000e+00> : vector<16x28xf32>
    %102 = tpu.matmul %95, %101, %cst_101 {dimension_numbers = #tpu.dot_dimension_numbers<[1], [0], [0], [1], [0, 0, 1, 1], [], []>} : vector<16x4xf32>, vector<4x28xf32>, vector<16x28xf32> -> vector<16x28xf32>
    %cst_102 = arith.constant dense<0.000000e+00> : vector<112x28xf32>
    %103 = tpu.matmul %100, %102, %cst_102 {dimension_numbers = #tpu.dot_dimension_numbers<[1], [0], [0], [1], [0, 0, 1, 1], [], []>} : vector<112x16xf32>, vector<16x28xf32>, vector<112x28xf32> -> vector<112x28xf32>
    %104 = arith.mulf %76, %99 : vector<112x28xf32>
    %105 = arith.subf %104, %103 : vector<112x28xf32>
    %cst_103 = arith.constant 0.000000e+00 : f32
    %106 = vector.broadcast %cst_103 : f32 to vector<112x28xf32>
    %c0_104 = arith.constant 0 : index
    %c0_105 = arith.constant 0 : index
    %c0_106 = arith.constant 0 : index
    %107 = vector.load %arg7[%c0_104, %c0_105, %c0_106] : memref<3x28x28xf32, #tpu.memory_space<vmem>>, vector<1x28x28xf32>
    %108 = vector.shape_cast %107 : vector<1x28x28xf32> to vector<28x28xf32>
    %cst_107 = arith.constant dense<0.000000e+00> : vector<112x28xf32>
    %109 = tpu.matmul %105, %108, %cst_107 {dimension_numbers = #tpu.dot_dimension_numbers<[1], [0], [0], [1], [0, 0, 1, 1], [], []>} : vector<112x28xf32>, vector<28x28xf32>, vector<112x28xf32> -> vector<112x28xf32>
    %c0_108 = arith.constant 0 : index
    %c0_109 = arith.constant 0 : index
    %c0_110 = arith.constant 0 : index
    %110 = vector.load %arg6[%c0_108, %c0_109, %c0_110] : memref<3x112x112xf32, #tpu.memory_space<vmem>>, vector<1x112x112xf32>
    %111 = vector.shape_cast %110 : vector<1x112x112xf32> to vector<112x112xf32>
    %cst_111 = arith.constant dense<0.000000e+00> : vector<112x28xf32>
    %112 = tpu.matmul %111, %109, %cst_111 {dimension_numbers = #tpu.dot_dimension_numbers<[1], [0], [0], [1], [0, 0, 1, 1], [], []>} : vector<112x112xf32>, vector<112x28xf32>, vector<112x28xf32> -> vector<112x28xf32>
    %113 = arith.addf %106, %112 : vector<112x28xf32>
    %c1_112 = arith.constant 1 : index
    %c0_113 = arith.constant 0 : index
    %c0_114 = arith.constant 0 : index
    %114 = vector.load %arg7[%c1_112, %c0_113, %c0_114] : memref<3x28x28xf32, #tpu.memory_space<vmem>>, vector<1x28x28xf32>
    %115 = vector.shape_cast %114 : vector<1x28x28xf32> to vector<28x28xf32>
    %cst_115 = arith.constant dense<0.000000e+00> : vector<112x28xf32>
    %116 = tpu.matmul %105, %115, %cst_115 {dimension_numbers = #tpu.dot_dimension_numbers<[1], [0], [0], [1], [0, 0, 1, 1], [], []>} : vector<112x28xf32>, vector<28x28xf32>, vector<112x28xf32> -> vector<112x28xf32>
    %c1_116 = arith.constant 1 : index
    %c0_117 = arith.constant 0 : index
    %c0_118 = arith.constant 0 : index
    %117 = vector.load %arg6[%c1_116, %c0_117, %c0_118] : memref<3x112x112xf32, #tpu.memory_space<vmem>>, vector<1x112x112xf32>
    %118 = vector.shape_cast %117 : vector<1x112x112xf32> to vector<112x112xf32>
    %cst_119 = arith.constant dense<0.000000e+00> : vector<112x28xf32>
    %119 = tpu.matmul %118, %116, %cst_119 {dimension_numbers = #tpu.dot_dimension_numbers<[1], [0], [0], [1], [0, 0, 1, 1], [], []>} : vector<112x112xf32>, vector<112x28xf32>, vector<112x28xf32> -> vector<112x28xf32>
    %120 = arith.addf %113, %119 : vector<112x28xf32>
    %c2_120 = arith.constant 2 : index
    %c0_121 = arith.constant 0 : index
    %c0_122 = arith.constant 0 : index
    %121 = vector.load %arg7[%c2_120, %c0_121, %c0_122] : memref<3x28x28xf32, #tpu.memory_space<vmem>>, vector<1x28x28xf32>
    %122 = vector.shape_cast %121 : vector<1x28x28xf32> to vector<28x28xf32>
    %cst_123 = arith.constant dense<0.000000e+00> : vector<112x28xf32>
    %123 = tpu.matmul %105, %122, %cst_123 {dimension_numbers = #tpu.dot_dimension_numbers<[1], [0], [0], [1], [0, 0, 1, 1], [], []>} : vector<112x28xf32>, vector<28x28xf32>, vector<112x28xf32> -> vector<112x28xf32>
    %c2_124 = arith.constant 2 : index
    %c0_125 = arith.constant 0 : index
    %c0_126 = arith.constant 0 : index
    %124 = vector.load %arg6[%c2_124, %c0_125, %c0_126] : memref<3x112x112xf32, #tpu.memory_space<vmem>>, vector<1x112x112xf32>
    %125 = vector.shape_cast %124 : vector<1x112x112xf32> to vector<112x112xf32>
    %cst_127 = arith.constant dense<0.000000e+00> : vector<112x28xf32>
    %126 = tpu.matmul %125, %123, %cst_127 {dimension_numbers = #tpu.dot_dimension_numbers<[1], [0], [0], [1], [0, 0, 1, 1], [], []>} : vector<112x112xf32>, vector<112x28xf32>, vector<112x28xf32> -> vector<112x28xf32>
    %127 = arith.addf %120, %126 : vector<112x28xf32>
    %128 = math.tanh %127 : vector<112x28xf32>
    %c0_128 = arith.constant 0 : index
    %c0_129 = arith.constant 0 : index
    %129 = vector.load %arg12[%c0_128, %c0_129] : memref<16x112xf32, #tpu.memory_space<vmem>>, vector<16x112xf32>
    %cst_130 = arith.constant dense<0.000000e+00> : vector<16x28xf32>
    %130 = tpu.matmul %129, %128, %cst_130 {dimension_numbers = #tpu.dot_dimension_numbers<[1], [0], [0], [1], [0, 0, 1, 1], [], []>} : vector<16x112xf32>, vector<112x28xf32>, vector<16x28xf32> -> vector<16x28xf32>
    %c0_131 = arith.constant 0 : index
    %c0_132 = arith.constant 0 : index
    %131 = vector.load %arg12[%c0_131, %c0_132] : memref<16x112xf32, #tpu.memory_space<vmem>>, vector<16x112xf32>
    %132 = arith.mulf %128, %128 : vector<112x28xf32>
    %cst_133 = arith.constant dense<0.000000e+00> : vector<16x28xf32>
    %133 = tpu.matmul %131, %132, %cst_133 {dimension_numbers = #tpu.dot_dimension_numbers<[1], [0], [0], [1], [0, 0, 1, 1], [], []>} : vector<16x112xf32>, vector<112x28xf32>, vector<16x28xf32> -> vector<16x28xf32>
    %c0_134 = arith.constant 0 : index
    %c0_135 = arith.constant 0 : index
    %134 = vector.load %arg16[%c0_134, %c0_135] : memref<28x4xf32, #tpu.memory_space<vmem>>, vector<28x4xf32>
    %cst_136 = arith.constant dense<0.000000e+00> : vector<16x4xf32>
    %135 = tpu.matmul %130, %134, %cst_136 {dimension_numbers = #tpu.dot_dimension_numbers<[1], [0], [0], [1], [0, 0, 1, 1], [], []>} : vector<16x28xf32>, vector<28x4xf32>, vector<16x4xf32> -> vector<16x4xf32>
    %cst_137 = arith.constant 0.0204081628 : f32
    %136 = vector.broadcast %cst_137 : f32 to vector<16x4xf32>
    %137 = arith.mulf %135, %136 : vector<16x4xf32>
    %c0_138 = arith.constant 0 : index
    %c0_139 = arith.constant 0 : index
    %138 = vector.load %arg16[%c0_138, %c0_139] : memref<28x4xf32, #tpu.memory_space<vmem>>, vector<28x4xf32>
    %cst_140 = arith.constant dense<0.000000e+00> : vector<16x4xf32>
    %139 = tpu.matmul %133, %138, %cst_140 {dimension_numbers = #tpu.dot_dimension_numbers<[1], [0], [0], [1], [0, 0, 1, 1], [], []>} : vector<16x28xf32>, vector<28x4xf32>, vector<16x4xf32> -> vector<16x4xf32>
    %cst_141 = arith.constant 0.0204081628 : f32
    %140 = vector.broadcast %cst_141 : f32 to vector<16x4xf32>
    %141 = arith.mulf %139, %140 : vector<16x4xf32>
    %142 = arith.mulf %137, %137 : vector<16x4xf32>
    %143 = arith.subf %141, %142 : vector<16x4xf32>
    %cst_142 = arith.constant 9.99999974E-6 : f32
    %144 = vector.broadcast %cst_142 : f32 to vector<16x4xf32>
    %145 = arith.addf %143, %144 : vector<16x4xf32>
    %146 = math.rsqrt %145 : vector<16x4xf32>
    %147 = arith.mulf %137, %146 : vector<16x4xf32>
    %c0_143 = arith.constant 0 : index
    %c0_144 = arith.constant 0 : index
    %148 = vector.load %arg13[%c0_143, %c0_144] : memref<112x16xf32, #tpu.memory_space<vmem>>, vector<112x16xf32>
    %c0_145 = arith.constant 0 : index
    %c0_146 = arith.constant 0 : index
    %149 = vector.load %arg17[%c0_145, %c0_146] : memref<4x28xf32, #tpu.memory_space<vmem>>, vector<4x28xf32>
    %cst_147 = arith.constant dense<0.000000e+00> : vector<16x28xf32>
    %150 = tpu.matmul %146, %149, %cst_147 {dimension_numbers = #tpu.dot_dimension_numbers<[1], [0], [0], [1], [0, 0, 1, 1], [], []>} : vector<16x4xf32>, vector<4x28xf32>, vector<16x28xf32> -> vector<16x28xf32>
    %cst_148 = arith.constant dense<0.000000e+00> : vector<112x28xf32>
    %151 = tpu.matmul %148, %150, %cst_148 {dimension_numbers = #tpu.dot_dimension_numbers<[1], [0], [0], [1], [0, 0, 1, 1], [], []>} : vector<112x16xf32>, vector<16x28xf32>, vector<112x28xf32> -> vector<112x28xf32>
    %c0_149 = arith.constant 0 : index
    %c0_150 = arith.constant 0 : index
    %152 = vector.load %arg13[%c0_149, %c0_150] : memref<112x16xf32, #tpu.memory_space<vmem>>, vector<112x16xf32>
    %c0_151 = arith.constant 0 : index
    %c0_152 = arith.constant 0 : index
    %153 = vector.load %arg17[%c0_151, %c0_152] : memref<4x28xf32, #tpu.memory_space<vmem>>, vector<4x28xf32>
    %cst_153 = arith.constant dense<0.000000e+00> : vector<16x28xf32>
    %154 = tpu.matmul %147, %153, %cst_153 {dimension_numbers = #tpu.dot_dimension_numbers<[1], [0], [0], [1], [0, 0, 1, 1], [], []>} : vector<16x4xf32>, vector<4x28xf32>, vector<16x28xf32> -> vector<16x28xf32>
    %cst_154 = arith.constant dense<0.000000e+00> : vector<112x28xf32>
    %155 = tpu.matmul %152, %154, %cst_154 {dimension_numbers = #tpu.dot_dimension_numbers<[1], [0], [0], [1], [0, 0, 1, 1], [], []>} : vector<112x16xf32>, vector<16x28xf32>, vector<112x28xf32> -> vector<112x28xf32>
    %156 = arith.mulf %128, %151 : vector<112x28xf32>
    %157 = arith.subf %156, %155 : vector<112x28xf32>
    %c0_155 = arith.constant 0 : index
    %c0_156 = arith.constant 0 : index
    %158 = vector.load %arg18[%c0_155, %c0_156] : memref<70x112xf32, #tpu.memory_space<vmem>>, vector<70x112xf32>
    %cst_157 = arith.constant dense<0.000000e+00> : vector<70x28xf32>
    %159 = tpu.matmul %158, %157, %cst_157 {dimension_numbers = #tpu.dot_dimension_numbers<[1], [0], [0], [1], [0, 0, 1, 1], [], []>} : vector<70x112xf32>, vector<112x28xf32>, vector<70x28xf32> -> vector<70x28xf32>
    %c0_158 = arith.constant 0 : index
    %c0_159 = arith.constant 0 : index
    %160 = vector.load %arg19[%c0_158, %c0_159] : memref<70x28xf32, #tpu.memory_space<vmem>>, vector<70x28xf32>
    %161 = arith.mulf %159, %160 : vector<70x28xf32>
    %c0_160 = arith.constant 0 : index
    %c0_161 = arith.constant 0 : index
    %162 = vector.load %arg16[%c0_160, %c0_161] : memref<28x4xf32, #tpu.memory_space<vmem>>, vector<28x4xf32>
    %cst_162 = arith.constant dense<0.000000e+00> : vector<70x4xf32>
    %163 = tpu.matmul %161, %162, %cst_162 {dimension_numbers = #tpu.dot_dimension_numbers<[1], [0], [0], [1], [0, 0, 1, 1], [], []>} : vector<70x28xf32>, vector<28x4xf32>, vector<70x4xf32> -> vector<70x4xf32>
    %c0_163 = arith.constant 0 : index
    %c0_164 = arith.constant 0 : index
    %164 = vector.load %arg20[%c0_163, %c0_164] : memref<10x70xf32, #tpu.memory_space<vmem>>, vector<10x70xf32>
    %cst_165 = arith.constant dense<0.000000e+00> : vector<10x4xf32>
    %165 = tpu.matmul %164, %163, %cst_165 {dimension_numbers = #tpu.dot_dimension_numbers<[1], [0], [0], [1], [0, 0, 1, 1], [], []>} : vector<10x70xf32>, vector<70x4xf32>, vector<10x4xf32> -> vector<10x4xf32>
    %c0_166 = arith.constant 0 : index
    %c0_167 = arith.constant 0 : index
    %c0_168 = arith.constant 0 : index
    %166 = vector.load %arg21[%c0_166, %c0_167, %c0_168] : memref<1x10x4xf32, #tpu.memory_space<vmem>>, vector<1x10x4xf32>
    %167 = vector.shape_cast %166 : vector<1x10x4xf32> to vector<10x4xf32>
    %168 = vector.shape_cast %165 : vector<10x4xf32> to vector<1x10x4xf32>
    tpu.vector_store %arg21[%c0_166, %c0_167, %c0_168], %168 {strides = array<i32>} : memref<1x10x4xf32, #tpu.memory_space<vmem>>, vector<1x10x4xf32>,
    return
  }
  func.func @transform_0(%arg0: i32) -> (i32, i32, i32) {
    %c0_i32 = arith.constant 0 : i32
    %c0_i32_0 = arith.constant 0 : i32
    %c0_i32_1 = arith.constant 0 : i32
    return %arg0, %c0_i32, %c0_i32_0 : i32, i32, i32
  }
  func.func @transform_1(%arg0: i32) -> (i32, i32, i32) {
    %c0_i32 = arith.constant 0 : i32
    %c0_i32_0 = arith.constant 0 : i32
    %c0_i32_1 = arith.constant 0 : i32
    %c0_i32_2 = arith.constant 0 : i32
    return %c0_i32, %c0_i32_0, %c0_i32_1 : i32, i32, i32
  }
  func.func @transform_2(%arg0: i32) -> (i32, i32, i32) {
    %c0_i32 = arith.constant 0 : i32
    %c0_i32_0 = arith.constant 0 : i32
    %c0_i32_1 = arith.constant 0 : i32
    %c0_i32_2 = arith.constant 0 : i32
    return %c0_i32, %c0_i32_0, %c0_i32_1 : i32, i32, i32
  }
  func.func @transform_3(%arg0: i32) -> (i32, i32, i32) {
    %c0_i32 = arith.constant 0 : i32
    %c0_i32_0 = arith.constant 0 : i32
    %c0_i32_1 = arith.constant 0 : i32
    %c0_i32_2 = arith.constant 0 : i32
    return %c0_i32, %c0_i32_0, %c0_i32_1 : i32, i32, i32
  }
  func.func @transform_4(%arg0: i32) -> (i32, i32, i32) {
    %c0_i32 = arith.constant 0 : i32
    %c0_i32_0 = arith.constant 0 : i32
    %c0_i32_1 = arith.constant 0 : i32
    %c0_i32_2 = arith.constant 0 : i32
    return %c0_i32, %c0_i32_0, %c0_i32_1 : i32, i32, i32
  }
  func.func @transform_5(%arg0: i32) -> (i32, i32, i32) {
    %c0_i32 = arith.constant 0 : i32
    %c0_i32_0 = arith.constant 0 : i32
    %c0_i32_1 = arith.constant 0 : i32
    %c0_i32_2 = arith.constant 0 : i32
    return %c0_i32, %c0_i32_0, %c0_i32_1 : i32, i32, i32
  }
  func.func @transform_6(%arg0: i32) -> (i32, i32, i32) {
    %c0_i32 = arith.constant 0 : i32
    %c0_i32_0 = arith.constant 0 : i32
    %c0_i32_1 = arith.constant 0 : i32
    %c0_i32_2 = arith.constant 0 : i32
    return %c0_i32, %c0_i32_0, %c0_i32_1 : i32, i32, i32
  }
  func.func @transform_7(%arg0: i32) -> (i32, i32) {
    %c0_i32 = arith.constant 0 : i32
    %c0_i32_0 = arith.constant 0 : i32
    %c0_i32_1 = arith.constant 0 : i32
    return %c0_i32, %c0_i32_0 : i32, i32
  }
  func.func @transform_8(%arg0: i32) -> (i32, i32) {
    %c0_i32 = arith.constant 0 : i32
    %c0_i32_0 = arith.constant 0 : i32
    %c0_i32_1 = arith.constant 0 : i32
    return %c0_i32, %c0_i32_0 : i32, i32
  }
  func.func @transform_9(%arg0: i32) -> (i32, i32) {
    %c0_i32 = arith.constant 0 : i32
    %c0_i32_0 = arith.constant 0 : i32
    %c0_i32_1 = arith.constant 0 : i32
    return %c0_i32, %c0_i32_0 : i32, i32
  }
  func.func @transform_10(%arg0: i32) -> (i32, i32) {
    %c0_i32 = arith.constant 0 : i32
    %c0_i32_0 = arith.constant 0 : i32
    %c0_i32_1 = arith.constant 0 : i32
    return %c0_i32, %c0_i32_0 : i32, i32
  }
  func.func @transform_11(%arg0: i32) -> (i32, i32) {
    %c0_i32 = arith.constant 0 : i32
    %c0_i32_0 = arith.constant 0 : i32
    %c0_i32_1 = arith.constant 0 : i32
    return %c0_i32, %c0_i32_0 : i32, i32
  }
  func.func @transform_12(%arg0: i32) -> (i32, i32) {
    %c0_i32 = arith.constant 0 : i32
    %c0_i32_0 = arith.constant 0 : i32
    %c0_i32_1 = arith.constant 0 : i32
    return %c0_i32, %c0_i32_0 : i32, i32
  }
  func.func @transform_13(%arg0: i32) -> (i32, i32) {
    %c0_i32 = arith.constant 0 : i32
    %c0_i32_0 = arith.constant 0 : i32
    %c0_i32_1 = arith.constant 0 : i32
    return %c0_i32, %c0_i32_0 : i32, i32
  }
  func.func @transform_14(%arg0: i32) -> (i32, i32) {
    %c0_i32 = arith.constant 0 : i32
    %c0_i32_0 = arith.constant 0 : i32
    %c0_i32_1 = arith.constant 0 : i32
    return %c0_i32, %c0_i32_0 : i32, i32
  }
  func.func @transform_15(%arg0: i32) -> (i32, i32) {
    %c0_i32 = arith.constant 0 : i32
    %c0_i32_0 = arith.constant 0 : i32
    %c0_i32_1 = arith.constant 0 : i32
    return %c0_i32, %c0_i32_0 : i32, i32
  }
  func.func @transform_16(%arg0: i32) -> (i32, i32) {
    %c0_i32 = arith.constant 0 : i32
    %c0_i32_0 = arith.constant 0 : i32
    %c0_i32_1 = arith.constant 0 : i32
    return %c0_i32, %c0_i32_0 : i32, i32
  }
  func.func @transform_17(%arg0: i32) -> (i32, i32) {
    %c0_i32 = arith.constant 0 : i32
    %c0_i32_0 = arith.constant 0 : i32
    %c0_i32_1 = arith.constant 0 : i32
    return %c0_i32, %c0_i32_0 : i32, i32
  }
  func.func @transform_18(%arg0: i32) -> (i32, i32) {
    %c0_i32 = arith.constant 0 : i32
    %c0_i32_0 = arith.constant 0 : i32
    %c0_i32_1 = arith.constant 0 : i32
    return %c0_i32, %c0_i32_0 : i32, i32
  }
  func.func @transform_19(%arg0: i32) -> (i32, i32) {
    %c0_i32 = arith.constant 0 : i32
    %c0_i32_0 = arith.constant 0 : i32
    %c0_i32_1 = arith.constant 0 : i32
    return %c0_i32, %c0_i32_0 : i32, i32
  }
  func.func @transform_20(%arg0: i32) -> (i32, i32, i32) {
    %c0_i32 = arith.constant 0 : i32
    %c0_i32_0 = arith.constant 0 : i32
    %c0_i32_1 = arith.constant 0 : i32
    return %arg0, %c0_i32, %c0_i32_0 : i32, i32, i32
  }
}

</mosaic_0001>

<bundles_post_ra>
// kernel: omega_cnn_forward.1
= control target key start
LH: loop header
LB: loop body
LE: loop exit
PB: predicated region body
PF: predicated region fallthrough
CT: control target
= control target key end

     0   :  { %s8524_s0 = inlined_call_operand.vmem [shape: f32[2,28,112], index: 0, kind: input, shape index: {}]   ;;  %s8525_s1 = inlined_call_operand.vmem [shape: f32[3,224,28], index: 1, kind: input, shape index: {}]   ;;  %s8526_s2 = inlined_call_operand.vmem [shape: f32[3,112,56], index: 2, kind: input, shape index: {}]   ;;  %s8527_s3 = inlined_call_operand.vmem [shape: f32[3,112,224], index: 3, kind: input, shape index: {}]   ;;  %s8528_s4 = inlined_call_operand.vmem [shape: f32[3,56,28], index: 4, kind: input, shape index: {}]   ;;  %s8529_s5 = inlined_call_operand.vmem [shape: f32[3,112,112], index: 5, kind: input, shape index: {}]   ;;  %s8530_s6 = inlined_call_operand.vmem [shape: f32[3,28,28], index: 6, kind: input, shape index: {}]   ;;  %s8531_s7 = inlined_call_operand.vmem [shape: f32[16,224], index: 7, kind: input, shape index: {}]   ;;  %s8532_s8 = inlined_call_operand.vmem [shape: f32[224,16], index: 8, kind: input, shape index: {}]   ;;  %s8533_s9 = inlined_call_operand.vmem [shape: f32[16,112], index: 9, kind: input, shape index: {}, may-alias: {9,11}]   ;;  %s8534_s10 = inlined_call_operand.vmem [shape: f32[112,16], index: 10, kind: input, shape index: {}, may-alias: {10,12}]   ;;  %s8535_s11 = inlined_call_operand.vmem [shape: f32[16,112], index: 11, kind: input, shape index: {}, may-alias: {9,11}]   ;;  %s8536_s12 = inlined_call_operand.vmem [shape: f32[112,16], index: 12, kind: input, shape index: {}, may-alias: {10,12}]   ;;  %s8537_s13 = inlined_call_operand.vmem [shape: f32[56,4], index: 13, kind: input, shape index: {}]   ;;  %s8538_s14 = inlined_call_operand.vmem [shape: f32[4,56], index: 14, kind: input, shape index: {}]   ;;  %s8539_s15 = inlined_call_operand.vmem [shape: f32[28,4], index: 15, kind: input, shape index: {}]   ;;  %s8540_s16 = inlined_call_operand.vmem [shape: f32[4,28], index: 16, kind: input, shape index: {}]   ;;  %s8541_s17 = inlined_call_operand.vmem [shape: f32[70,112], index: 17, kind: input, shape index: {}]   ;;  %s8542_s18 = inlined_call_operand.vmem [shape: f32[70,28], index: 18, kind: input, shape index: {}]   ;;  %s8543_s19 = inlined_call_operand.vmem [shape: f32[10,70], index: 19, kind: input, shape index: {}]   ;;  %s8544_s20 = inlined_call_operand.vmem [shape: f32[2,10,4], index: 20, kind: output, shape index: {}]  }
   0x1   :  { %8555 = sst [smem:[#allocation33_spill]] %s8524_s0 }
   0x2   :  { %8556 = sst [smem:[#allocation34_spill]] %s8525_s1  ;;  %s5843_s1 = smov 0  }
   0x3   :  { %8557 = sst [smem:[#allocation35_spill]] %s8526_s2 }
   0x4   :  { %8558 = sst [smem:[#allocation36_spill]] %s8527_s3 }
   0x5   :  { %8559 = sst [smem:[#allocation37_spill]] %s8528_s4 }
   0x6 LB: > { %8560 = sst [smem:[#allocation2_spill]] %s5736_s1  ;;  %s4880_s22 = sadd.s32 4294967295, %s5736_s1   ;;  %s5736_s1 = sphi %s5843_s1, %s30_s1  }
   0x7   : > { %p4884_p0 = scmp.ge.s32.totalorder %s5736_s1, 1  ;;  %p562_p1 = scmp.lt.s32.totalorder %s5736_s1, 3 }
   0x9   : > { %p563_p2 = pnand %p4884_p0, %p562_p1 }
   0xb   : > { %566 = sbr.rel (%p563_p2) target bundleno = 4647 (0x1227), region = 100 }
  0x10   : > { %s8561_s2 = sld [smem:[#allocation35_spill]]  ;;  %p620_p3 = scmp.lt.s32.totalorder %s4880_s22, 1  ;;  %vm648_vm0 = vcmask 916480   ;;  %vm876_vm1 = vcmask 1043456   ;;  %vm791_vm2 = vcmask 228352   ;;  %vm1490_vm3 = vcmask 785408  }
  0x11   : > { %s8562_s4 = sld [smem:[#allocation33_spill]]  ;;  %vm1624_vm4 = vcmask 457728   ;;  %vm1744_vm7 = vcmask 31744   ;;  %vm1777_vm12 = vcmask 130048  }
  0x12   : > { %s8635_s22 = smov (!%p620_p3, %s4880_s22), 1  ;;  %s8563_s27 = sld [smem:[#allocation34_spill]] }
  0x13   : > { %s5573_s29 = sshll.u32 %s8635_s22, 5  ;;  %s8572_s25 = sld [smem:[#allocation36_spill]] }
  0x16   : > { %v647_v0 = vld [vmem:[%s8561_s2 + $0x68] sm:$0xff]  ;;  %v4906_v1 = vld [vmem:[%s8561_s2 + $0xd8] sm:$0xff]  ;;  %v646_v2 = vld [vmem:[%s8561_s2 + $0x60] sm:$0xff] }
  0x17   : > { %663 = vmatpush.msra.mxu0 %v647_v0  ;;  %735 = vmatpush.msra.mxu1 %v4906_v1  ;;  %v4905_v3 = vld [vmem:[%s8561_s2 + $0xd0] sm:$0xff]  ;;  %v645_v4 = vld [vmem:[%s8561_s2 + $0x58] sm:$0xff]  ;;  %v4904_v5 = vld [vmem:[%s8561_s2 + $0xc8] sm:$0xff]  ;;  %s5939_s1 = scalar_lea.vmem %s8562_s4, %s5573_s29 }
  0x18   : > { %v644_v6 = vld [vmem:[%s8561_s2 + $0x50] sm:$0xff]  ;;  %v4903_v7 = vld [vmem:[%s8561_s2 + $0xc0] sm:$0xff]  ;;  %v643_v8 = vld [vmem:[%s8561_s2 + $0x48] sm:$0xff] }
  0x19   : > { %664 = vmatpush.msra.mxu0 %v646_v2  ;;  %736 = vmatpush.msra.mxu1 %v4905_v3  ;;  %v4902_v9 = vld [vmem:[%s8561_s2 + $0xb8] sm:$0xff]  ;;  %v642_v10 = vld [vmem:[%s8561_s2 + $0x40] sm:$0xff]  ;;  %v4901_v11 = vld [vmem:[%s8561_s2 + $0xb0] sm:$0xff] }
  0x1a   : > { %v641_v12 = vld [vmem:[%s8561_s2 + $0x38] sm:$0xff]  ;;  %v4900_v13 = vld [vmem:[%s8561_s2 + $0xa8] sm:$0xff]  ;;  %v640_v14 = vld [vmem:[%s8561_s2 + $0x30] sm:$0xff] }
  0x1b   : > { %665 = vmatpush.msra.mxu0 %v645_v4  ;;  %737 = vmatpush.msra.mxu1 %v4904_v5  ;;  %v4899_v15 = vld [vmem:[%s8561_s2 + $0xa0] sm:$0xff]  ;;  %v639_v16 = vld [vmem:[%s8561_s2 + $0x28] sm:$0xff]  ;;  %v4898_v17 = vld [vmem:[%s8561_s2 + $0x98] sm:$0xff] }
  0x1c   : > { %v638_v18 = vld [vmem:[%s8561_s2 + $0x20] sm:$0xff]  ;;  %v4897_v19 = vld [vmem:[%s8561_s2 + $0x90] sm:$0xff]  ;;  %v637_v20 = vld [vmem:[%s8561_s2 + $0x18] sm:$0xff] }
  0x1d   : > { %666 = vmatpush.msra.mxu0 %v644_v6  ;;  %738 = vmatpush.msra.mxu1 %v4903_v7  ;;  %v4896_v21 = vld [vmem:[%s8561_s2 + $0x88] sm:$0xff]  ;;  %v636_v22 = vld [vmem:[%s8561_s2 + $0x10] sm:$0xff]  ;;  %v4895_v23 = vld [vmem:[%s8561_s2 + $0x80] sm:$0xff] }
  0x1e   : > { %v635_v24 = vld [vmem:[%s8561_s2 + $0x8] sm:$0xff]  ;;  %v4894_v25 = vld [vmem:[%s8561_s2 + $0x78] sm:$0xff]  ;;  %v634_v26 = vld [vmem:[%s8561_s2] sm:$0xff] }
  0x1f   : > { %667 = vmatpush.msra.mxu0 %v643_v8  ;;  %739 = vmatpush.msra.mxu1 %v4902_v9  ;;  %v4893_v27 = vld [vmem:[%s8561_s2 + $0x70] sm:$0xff]  ;;  %v630_v28 = vld [vmem:[%s5939_s1] sm:$0xff]  ;;  %v5010_v29 = vld [vmem:[%s8561_s2 + $0x148] sm:$0xff] }
  0x20   : > { %v5009_v30 = vld [vmem:[%s8561_s2 + $0x140] sm:$0xff]  ;;  %v5008_v31 = vld [vmem:[%s8561_s2 + $0x138] sm:$0xff]  ;;  %v5007_v32 = vld [vmem:[%s8561_s2 + $0x130] sm:$0xff] }
  0x21   : > { %668 = vmatpush.msra.mxu0 %v642_v10  ;;  %740 = vmatpush.msra.mxu1 %v4901_v11  ;;  %v631_v33 = vld [vmem:[%s5939_s1 + $0x8] sm:$0xff]  ;;  %v5005_v35 = vld [vmem:[%s8561_s2 + $0x120] sm:$0xff]  ;;  %v5004_v36 = vld [vmem:[%s8561_s2 + $0x118] sm:$0xff] }
  0x22   : > { %v5006_v34 = vld [vmem:[%s8561_s2 + $0x128] sm:$0xff]  ;;  %v5003_v37 = vld [vmem:[%s8561_s2 + $0x110] sm:$0xff]  ;;  %v5001_v40 = vld [vmem:[%s8561_s2 + $0x100] sm:$0xff] }
  0x23   : > { %669 = vmatpush.msra.mxu0 %v641_v12  ;;  %741 = vmatpush.msra.mxu1 %v4900_v13  ;;  %v632_v38 = vld [vmem:[%s5939_s1 + $0x10] sm:$0xff]  ;;  %v5002_v39 = vld [vmem:[%s8561_s2 + $0x108] sm:$0xff]  ;;  %v5000_v41 = vld [vmem:[%s8561_s2 + $0xf8] sm:$0xff] }
  0x24   : > { %v4999_v42 = vld [vmem:[%s8561_s2 + $0xf0] sm:$0xff]  ;;  %v633_v43 = vld [vmem:[%s5939_s1 + $0x18] sm:$0xf]  ;;  %v4998_v44 = vld [vmem:[%s8561_s2 + $0xe8] sm:$0xff]  ;;  %s8570_s1 = sld [smem:[#allocation37_spill]] }
  0x25   : > { %670 = vmatpush.msra.mxu0 %v640_v14  ;;  %742 = vmatpush.msra.mxu1 %v4899_v15  ;;  %v4997_v45 = vld [vmem:[%s8561_s2 + $0xe0] sm:$0xff]  ;;  %v4913_v57 = vld [vmem:[%s8563_s27 + $0xf0] sm:$0xff]  ;;  %v4912_v58 = vld [vmem:[%s8563_s27 + $0xe8] sm:$0xff] }
  0x26   : > { %v4911_v54 = vld [vmem:[%s8563_s27 + $0xe0] sm:$0xff]  ;;  %v691_v59 = vld [vmem:[%s8563_s27 + $0x8] sm:$0xff]  ;;  %v4914_v61 = vld [vmem:[%s8563_s27 + $0xf8] sm:$0xff] }
  0x27   : > { %671 = vmatpush.msra.mxu0 %v639_v16  ;;  %743 = vmatpush.msra.mxu1 %v4898_v17  ;;  %v690_v55 = vld [vmem:[%s8563_s27] sm:$0xff]  ;;  %v692_v62 = vld [vmem:[%s8563_s27 + $0x10] sm:$0xff]  ;;  %v693_v1 = vld [vmem:[%s8563_s27 + $0x18] sm:$0xff] }
  0x28   : > { %v4915_v0 = vld [vmem:[%s8563_s27 + $0x100] sm:$0xff]  ;;  %v4916_v3 = vld [vmem:[%s8563_s27 + $0x108] sm:$0xff]  ;;  %v4917_v6 = vld [vmem:[%s8563_s27 + $0x110] sm:$0xff] }
  0x29   : > { %672 = vmatpush.msra.mxu0 %v638_v18  ;;  %744 = vmatpush.msra.mxu1 %v4897_v19  ;;  %v5015_v4 = vld [vmem:[%s8563_s27 + $0x1c0] sm:$0xff]  ;;  %v5016_v7 = vld [vmem:[%s8563_s27 + $0x1c8] sm:$0xff]  ;;  %v4918_v9 = vld [vmem:[%s8563_s27 + $0x118] sm:$0xff] }
  0x2a   : > { %v694_v5 = vld [vmem:[%s8563_s27 + $0x20] sm:$0xff]  ;;  %v695_v8 = vld [vmem:[%s8563_s27 + $0x28] sm:$0xff]  ;;  %v5017_v10 = vld [vmem:[%s8563_s27 + $0x1d0] sm:$0xff]  ;;  %s8571_s26 = smov %s8570_s1 }
  0x2b   : > { %673 = vmatpush.msra.mxu0 %v637_v20  ;;  %745 = vmatpush.msra.mxu1 %v4896_v21  ;;  %v696_v11 = vld [vmem:[%s8563_s27 + $0x30] sm:$0xff]  ;;  %v4919_v12 = vld [vmem:[%s8563_s27 + $0x120] sm:$0xff]  ;;  %v5018_v13 = vld [vmem:[%s8563_s27 + $0x1d8] sm:$0xff] }
  0x2c   : > { %v697_v14 = vld [vmem:[%s8563_s27 + $0x38] sm:$0xff]  ;;  %v4920_v15 = vld [vmem:[%s8563_s27 + $0x128] sm:$0xff]  ;;  %v5019_v16 = vld [vmem:[%s8563_s27 + $0x1e0] sm:$0xff] }
  0x2d   : > { %674 = vmatpush.msra.mxu0 %v636_v22  ;;  %746 = vmatpush.msra.mxu1 %v4895_v23  ;;  %v698_v17 = vld [vmem:[%s8563_s27 + $0x40] sm:$0xff]  ;;  %v4921_v18 = vld [vmem:[%s8563_s27 + $0x130] sm:$0xff]  ;;  %v5020_v19 = vld [vmem:[%s8563_s27 + $0x1e8] sm:$0xff] }
  0x2e   : > { %v699_v20 = vld [vmem:[%s8563_s27 + $0x48] sm:$0xff]  ;;  %v4922_v21 = vld [vmem:[%s8563_s27 + $0x138] sm:$0xff]  ;;  %v5021_v22 = vld [vmem:[%s8563_s27 + $0x1f0] sm:$0xff] }
  0x2f   : > { %675 = vmatpush.msra.mxu0 %v635_v24  ;;  %747 = vmatpush.msra.mxu1 %v4894_v25  ;;  %v700_v23 = vld [vmem:[%s8563_s27 + $0x50] sm:$0xff]  ;;  %v4923_v24 = vld [vmem:[%s8563_s27 + $0x140] sm:$0xff]  ;;  %v5022_v25 = vld [vmem:[%s8563_s27 + $0x1f8] sm:$0xff] }
  0x31   : > { %676 = vmatpush.msra.mxu0 %v634_v26  ;;  %748 = vmatpush.msra.mxu1 %v4893_v27  ;;  %v701_v26 = vld [vmem:[%s8563_s27 + $0x58] sm:$0xff]  ;;  %v4924_v27 = vld [vmem:[%s8563_s27 + $0x148] sm:$0xff] }
  0x32   : > { %4889 = vmatmul.msk.f32.vlgmr.msra.gmra.mxu0 %vm648_vm0, %v630_v28  ;;  %4907 = vmatmul.msk.f32.vlgmr.msra.gmra.mxu1 %vm648_vm0, %v630_v28 }
  0x33   : > { %1186 = vmatpush.msrb.mxu0 %v5010_v29  ;;  %v702_v29 = vld [vmem:[%s8563_s27 + $0x60] sm:$0xff] }
  0x35   : > { %1187 = vmatpush.msrb.mxu0 %v5009_v30  ;;  %v4925_v30 = vld [vmem:[%s8563_s27 + $0x150] sm:$0xff] }
  0x37   : > { %1188 = vmatpush.msrb.mxu0 %v5008_v31  ;;  %v5024_v31 = vld [vmem:[%s8563_s27 + $0x208] sm:$0xff] }
  0x39   : > { %1189 = vmatpush.msrb.mxu0 %v5007_v32  ;;  %v703_v32 = vld [vmem:[%s8563_s27 + $0x68] sm:$0xff] }
  0x3a   : > { %4890 = vmatmul.msk.f32.gmra.mxu0 %vm648_vm0, %v631_v33  ;;  %4908 = vmatmul.msk.f32.gmra.mxu1 %vm648_vm0, %v631_v33 }
  0x3b   : > { %1190 = vmatpush.msrb.mxu0 %v5006_v34  ;;  %v5025_v34 = vld [vmem:[%s8563_s27 + $0x210] sm:$0xff] }
  0x3d   : > { %1191 = vmatpush.msrb.mxu0 %v5005_v35  ;;  %v704_v35 = vld [vmem:[%s8563_s27 + $0x70] sm:$0xff] }
  0x3f   : > { %1192 = vmatpush.msrb.mxu0 %v5004_v36  ;;  %v4927_v36 = vld [vmem:[%s8563_s27 + $0x160] sm:$0xff] }
  0x41   : > { %1193 = vmatpush.msrb.mxu0 %v5003_v37  ;;  %v5026_v37 = vld [vmem:[%s8563_s27 + $0x218] sm:$0xff] }
  0x42   : > { %4891 = vmatmul.msk.f32.gmra.mxu0 %vm648_vm0, %v632_v38  ;;  %4909 = vmatmul.msk.f32.gmra.mxu1 %vm648_vm0, %v632_v38 }
  0x43   : > { %1194 = vmatpush.msrb.mxu0 %v5002_v39  ;;  %v5027_v39 = vld [vmem:[%s8563_s27 + $0x220] sm:$0xff] }
  0x45   : > { %1195 = vmatpush.msrb.mxu0 %v5001_v40  ;;  %v706_v40 = vld [vmem:[%s8563_s27 + $0x80] sm:$0xff] }
  0x47   : > { %1196 = vmatpush.msrb.mxu0 %v5000_v41  ;;  %v4928_v41 = vld [vmem:[%s8563_s27 + $0x168] sm:$0xff] }
  0x49   : > { %1197 = vmatpush.msrb.mxu0 %v4999_v42 }
  0x4a   : > { %4892 = vmatmul.msk.f32.gmra.mxu0 %vm648_vm0, %v633_v43  ;;  %4910 = vmatmul.msk.f32.gmra.mxu1 %vm648_vm0, %v633_v43 }
  0x4b   : > { %1198 = vmatpush.msrb.mxu0 %v4998_v44  ;;  %v707_v44 = vld [vmem:[%s8563_s27 + $0x88] sm:$0xff] }
  0x4d   : > { %1199 = vmatpush.msrb.mxu0 %v4997_v45  ;;  %v4929_v45 = vld [vmem:[%s8563_s27 + $0x170] sm:$0xff] }
  0x52   : > { %5011 = vmatmul.msk.f32.vlgmr.msrb.gmra.mxu0 %vm648_vm0, %v630_v28  ;;  %v5023_v28 = vld [vmem:[%s8563_s27 + $0x200] sm:$0xff] }
  0x5a   : > { %5012 = vmatmul.msk.f32.gmra.mxu0 %vm648_vm0, %v631_v33  ;;  %v4926_v33 = vld [vmem:[%s8563_s27 + $0x158] sm:$0xff] }
  0x62   : > { %5013 = vmatmul.msk.f32.gmra.mxu0 %vm648_vm0, %v632_v38  ;;  %v705_v38 = vld [vmem:[%s8563_s27 + $0x78] sm:$0xff] }
  0x6a   : > { %5014 = vmatmul.msk.f32.gmra.mxu0 %vm648_vm0, %v633_v43  ;;  %v5028_v43 = vld [vmem:[%s8563_s27 + $0x228] sm:$0xff] }
  0xaf   : > { %v678_v46 = vpop.f32.mrf.mxu0  ;;  %v750_v47 = vpop.f32.mrf.mxu1 }
  0xb7   : > { %v681_v48 = vpop.f32.mrf.mxu0  ;;  %v753_v49 = vpop.f32.mrf.mxu1 }
  0xbf   : > { %v684_v50 = vpop.f32.mrf.mxu0  ;;  %v756_v51 = vpop.f32.mrf.mxu1 }
  0xc7   : > { %v687_v52 = vpop.f32.mrf.mxu0  ;;  %v759_v53 = vpop.f32.mrf.mxu1 }
  0xc8   : > { %4939 = vmatpush.msk.msrb.mxu1 %vm876_vm1, %v759_v53  ;;  %5575 = vmatpush.msk.msra.mxu2 %vm876_vm1, %v759_v53 }
  0xc9   : > { %4968 = vmatpush.msk.msra.mxu3 %vm876_vm1, %v687_v52 }
  0xca   : > { %893 = vmatpush.msrb.mxu1 %v756_v51  ;;  %5576 = vmatpush.msra.mxu2 %v756_v51  ;;  %v4930_v51 = vld [vmem:[%s8563_s27 + $0x178] sm:$0xff] }
  0xcb   : > { %1081 = vmatpush.msra.mxu3 %v684_v50  ;;  %v708_v50 = vld [vmem:[%s8563_s27 + $0x90] sm:$0xff] }
  0xcc   : > { %894 = vmatpush.msrb.mxu1 %v753_v49  ;;  %5577 = vmatpush.msra.mxu2 %v753_v49  ;;  %v5029_v49 = vld [vmem:[%s8563_s27 + $0x230] sm:$0xff] }
  0xcd   : > { %1082 = vmatpush.msra.mxu3 %v681_v48 }
  0xce   : > { %895 = vmatpush.msrb.mxu1 %v750_v47  ;;  %5578 = vmatpush.msra.mxu2 %v750_v47 }
  0xcf   : > { %1083 = vmatpush.msra.mxu3 %v678_v46  ;;  %v1201_v56 = vpop.f32.mrf.mxu0  ;;  %4940 = vmatmul.msk.f32.vlgmr.msrb.gmra.mxu1 %vm791_vm2, %v4911_v54 }
  0xd0   : > { %4969 = vmatmul.msk.f32.vlgmr.msra.gmra.mxu3 %vm791_vm2, %v690_v55  ;;  %4942 = vmatmul.msk.f32.vlgmr.msra.gmra.mxu2 %vm791_vm2, %v4913_v57  ;;  %v5030_v55 = vld [vmem:[%s8563_s27 + $0x238] sm:$0xff] }
  0xd1   : > { %v709_v57 = vld [vmem:[%s8563_s27 + $0x98] sm:$0xff] }
  0xd7   : > { %v1204_v60 = vpop.f32.mrf.mxu0  ;;  %4941 = vmatmul.msk.f32.gmra.mxu1 %vm791_vm2, %v4912_v58  ;;  %v4931_v58 = vld [vmem:[%s8563_s27 + $0x180] sm:$0xff] }
  0xd8   : > { %4970 = vmatmul.msk.f32.gmra.mxu3 %vm791_vm2, %v691_v59  ;;  %4943 = vmatmul.msk.f32.gmra.mxu2 %vm791_vm2, %v4914_v61 }
  0xdf   : > { %v1207_v63 = vpop.f32.mrf.mxu0 }
  0xe0   : > { %4971 = vmatmul.msk.f32.gmra.mxu3 %vm791_vm2, %v692_v62  ;;  %4944 = vmatmul.msk.f32.gmra.mxu2 %vm791_vm2, %v4915_v0  ;;  %v5031_v62 = vld [vmem:[%s8563_s27 + $0x240] sm:$0xff] }
  0xe1   : > { %v710_v0 = vld [vmem:[%s8563_s27 + $0xa0] sm:$0xff] }
  0xe7   : > { %v1210_v2 = vpop.f32.mrf.mxu0 }
  0xe8   : > { %5043 = vmatpush.msk.msra.mxu1 %vm876_vm1, %v1210_v2  ;;  %4972 = vmatmul.msk.f32.gmra.mxu3 %vm791_vm2, %v693_v1  ;;  %v4932_v1 = vld [vmem:[%s8563_s27 + $0x188] sm:$0xff] }
  0xe9   : > { %4945 = vmatmul.msk.f32.gmra.mxu2 %vm791_vm2, %v4916_v3 }
  0xea   : > { %1342 = vmatpush.msra.mxu1 %v1207_v63 }
  0xec   : > { %1343 = vmatpush.msra.mxu1 %v1204_v60 }
  0xee   : > { %1344 = vmatpush.msra.mxu1 %v1201_v56 }
  0xef   : > { %5044 = vmatmul.msk.f32.vlgmr.msra.gmra.mxu1 %vm791_vm2, %v5015_v4 }
  0xf0   : > { %4973 = vmatmul.msk.f32.gmra.mxu3 %vm791_vm2, %v694_v5  ;;  %v5032_v5 = vld [vmem:[%s8563_s27 + $0x248] sm:$0xff] }
  0xf1   : > { %4946 = vmatmul.msk.f32.gmra.mxu2 %vm791_vm2, %v4917_v6  ;;  %v711_v6 = vld [vmem:[%s8563_s27 + $0xa8] sm:$0xff] }
  0xf7   : > { %5045 = vmatmul.msk.f32.gmra.mxu1 %vm791_vm2, %v5016_v7  ;;  %v4933_v7 = vld [vmem:[%s8563_s27 + $0x190] sm:$0xff] }
  0xf8   : > { %4974 = vmatmul.msk.f32.gmra.mxu3 %vm791_vm2, %v695_v8 }
  0xf9   : > { %4947 = vmatmul.msk.f32.gmra.mxu2 %vm791_vm2, %v4918_v9 }
  0xff   : > { %5046 = vmatmul.msk.f32.gmra.mxu1 %vm791_vm2, %v5017_v10 }
 0x100   : > { %4975 = vmatmul.msk.f32.gmra.mxu3 %vm791_vm2, %v696_v11  ;;  %v5033_v11 = vld [vmem:[%s8563_s27 + $0x250] sm:$0xff] }
 0x101   : > { %4948 = vmatmul.msk.f32.gmra.mxu2 %vm791_vm2, %v4919_v12  ;;  %v712_v12 = vld [vmem:[%s8563_s27 + $0xb0] sm:$0xff] }
 0x107   : > { %5047 = vmatmul.msk.f32.gmra.mxu1 %vm791_vm2, %v5018_v13  ;;  %v4934_v13 = vld [vmem:[%s8563_s27 + $0x198] sm:$0xff] }
 0x108   : > { %4976 = vmatmul.msk.f32.gmra.mxu3 %vm791_vm2, %v697_v14 }
 0x109   : > { %4949 = vmatmul.msk.f32.gmra.mxu2 %vm791_vm2, %v4920_v15 }
 0x10f   : > { %5048 = vmatmul.msk.f32.gmra.mxu1 %vm791_vm2, %v5019_v16 }
 0x110   : > { %4977 = vmatmul.msk.f32.gmra.mxu3 %vm791_vm2, %v698_v17  ;;  %v5034_v17 = vld [vmem:[%s8563_s27 + $0x258] sm:$0xff] }
 0x111   : > { %4950 = vmatmul.msk.f32.gmra.mxu2 %vm791_vm2, %v4921_v18  ;;  %v713_v18 = vld [vmem:[%s8563_s27 + $0xb8] sm:$0xff] }
 0x117   : > { %5049 = vmatmul.msk.f32.gmra.mxu1 %vm791_vm2, %v5020_v19  ;;  %v4935_v19 = vld [vmem:[%s8563_s27 + $0x1a0] sm:$0xff] }
 0x118   : > { %4978 = vmatmul.msk.f32.gmra.mxu3 %vm791_vm2, %v699_v20 }
 0x119   : > { %4951 = vmatmul.msk.f32.gmra.mxu2 %vm791_vm2, %v4922_v21 }
 0x11f   : > { %5050 = vmatmul.msk.f32.gmra.mxu1 %vm791_vm2, %v5021_v22 }
 0x120   : > { %4979 = vmatmul.msk.f32.gmra.mxu3 %vm791_vm2, %v700_v23  ;;  %v5035_v23 = vld [vmem:[%s8563_s27 + $0x260] sm:$0xff] }
 0x121   : > { %4952 = vmatmul.msk.f32.gmra.mxu2 %vm791_vm2, %v4923_v24  ;;  %v714_v24 = vld [vmem:[%s8563_s27 + $0xc0] sm:$0xff] }
 0x127   : > { %5051 = vmatmul.msk.f32.gmra.mxu1 %vm791_vm2, %v5022_v25  ;;  %v4936_v25 = vld [vmem:[%s8563_s27 + $0x1a8] sm:$0xff] }
 0x128   : > { %4980 = vmatmul.msk.f32.gmra.mxu3 %vm791_vm2, %v701_v26 }
 0x129   : > { %4953 = vmatmul.msk.f32.gmra.mxu2 %vm791_vm2, %v4924_v27 }
 0x12f   : > { %5052 = vmatmul.msk.f32.gmra.mxu1 %vm791_vm2, %v5023_v28 }
 0x130   : > { %4981 = vmatmul.msk.f32.gmra.mxu3 %vm791_vm2, %v702_v29  ;;  %v5036_v29 = vld [vmem:[%s8563_s27 + $0x268] sm:$0xff] }
 0x131   : > { %4954 = vmatmul.msk.f32.gmra.mxu2 %vm791_vm2, %v4925_v30  ;;  %v715_v30 = vld [vmem:[%s8563_s27 + $0xc8] sm:$0xff] }
 0x137   : > { %5053 = vmatmul.msk.f32.gmra.mxu1 %vm791_vm2, %v5024_v31  ;;  %v4937_v31 = vld [vmem:[%s8563_s27 + $0x1b0] sm:$0xff] }
 0x138   : > { %4982 = vmatmul.msk.f32.gmra.mxu3 %vm791_vm2, %v703_v32 }
 0x139   : > { %4955 = vmatmul.msk.f32.gmra.mxu2 %vm791_vm2, %v4926_v33 }
 0x13f   : > { %5054 = vmatmul.msk.f32.gmra.mxu1 %vm791_vm2, %v5025_v34 }
 0x140   : > { %4983 = vmatmul.msk.f32.gmra.mxu3 %vm791_vm2, %v704_v35  ;;  %v5037_v35 = vld [vmem:[%s8563_s27 + $0x270] sm:$0xff] }
 0x141   : > { %4956 = vmatmul.msk.f32.gmra.mxu2 %vm791_vm2, %v4927_v36  ;;  %v716_v36 = vld [vmem:[%s8563_s27 + $0xd0] sm:$0xff] }
 0x147   : > { %5055 = vmatmul.msk.f32.gmra.mxu1 %vm791_vm2, %v5026_v37  ;;  %v4938_v37 = vld [vmem:[%s8563_s27 + $0x1b8] sm:$0xff] }
 0x148   : > { %4984 = vmatmul.msk.f32.gmra.mxu3 %vm791_vm2, %v705_v38 }
 0x149   : > { %4957 = vmatmul.msk.f32.gmra.mxu2 %vm791_vm2, %v4928_v41  ;;  %v5038_v41 = vld [vmem:[%s8563_s27 + $0x278] sm:$0xff] }
 0x14c   : > { %v6213_v47 = vpop.f32.mrf.mxu1 }
 0x14f   : > { %5056 = vmatmul.msk.f32.gmra.mxu1 %vm791_vm2, %v5027_v39 }
 0x150   : > { %4985 = vmatmul.msk.f32.gmra.mxu3 %vm791_vm2, %v706_v40 }
 0x151   : > { %4958 = vmatmul.msk.f32.gmra.mxu2 %vm791_vm2, %v4929_v45 }
 0x153   : > { %v6201_v42 = vpop.f32.mrf.mxu3  ;;  %v903_v46 = vpop.f32.mrf.mxu2 }
 0x154   : > { %v6231_v53 = vpop.f32.mrf.mxu1 }
 0x157   : > { %5057 = vmatmul.msk.f32.gmra.mxu1 %vm791_vm2, %v5028_v43  ;;  %v717_v43 = vld [vmem:[%s8563_s27 + $0xd8] sm:$0xff] }
 0x158   : > { %4986 = vmatmul.msk.f32.gmra.mxu3 %vm791_vm2, %v707_v44 }
 0x159   : > { %4959 = vmatmul.msk.f32.gmra.mxu2 %vm791_vm2, %v4930_v51 }
 0x15b   : > { %v6217_v48 = vpop.f32.mrf.mxu3  ;;  %v906_v52 = vpop.f32.mrf.mxu2 }
 0x15f   : > { %5058 = vmatmul.msk.f32.gmra.mxu1 %vm791_vm2, %v5029_v49  ;;  %v5039_v49 = vld [vmem:[%s8563_s27 + $0x280] sm:$0xff] }
 0x160   : > { %4987 = vmatmul.msk.f32.gmra.mxu3 %vm791_vm2, %v708_v50 }
 0x161   : > { %4960 = vmatmul.msk.f32.gmra.mxu2 %vm791_vm2, %v4931_v58 }
 0x163   : > { %v1091_v54 = vpop.f32.mrf.mxu3  ;;  %v6245_v59 = vpop.f32.mrf.mxu2 }
 0x164   : > { %v6236_v56 = vadd.f32 %v1091_v54, %v903_v46  ;;  %v5040_v54 = vld [vmem:[%s8563_s27 + $0x288] sm:$0xff] }
 0x167   : > { %5059 = vmatmul.msk.f32.gmra.mxu1 %vm791_vm2, %v5030_v55 }
 0x168   : > { %4988 = vmatmul.msk.f32.gmra.mxu3 %vm791_vm2, %v709_v57 }
 0x169   : > { %4961 = vmatmul.msk.f32.gmra.mxu2 %vm791_vm2, %v4932_v1  ;;  %v5042_v1 = vld [vmem:[%s8563_s27 + $0x298] sm:$0xff] }
 0x16b   : > { %v1094_v60 = vpop.f32.mrf.mxu3 }
 0x16c   : > { %v6249_v61 = vpop.f32.mrf.mxu1  ;;  %v6254_v63 = vadd.f32 %v1094_v60, %v906_v52  ;;  %v6263_v2 = vpop.f32.mrf.mxu2  ;;  %v5041_v60 = vld [vmem:[%s8563_s27 + $0x290] sm:$0xff] }
 0x16f   : > { %5060 = vmatmul.msk.f32.gmra.mxu1 %vm791_vm2, %v5031_v62 }
 0x170   : > { %4989 = vmatmul.msk.f32.gmra.mxu3 %vm791_vm2, %v710_v0 }
 0x171   : > { %4962 = vmatmul.msk.f32.gmra.mxu2 %vm791_vm2, %v4933_v7 }
 0x173   : > { %v6267_v3 = vpop.f32.mrf.mxu3 }
 0x174   : > { %v6269_v4 = vpop.f32.mrf.mxu1  ;;  %v6281_v8 = vpop.f32.mrf.mxu2 }
 0x177   : > { %5061 = vmatmul.msk.f32.gmra.mxu1 %vm791_vm2, %v5032_v5 }
 0x178   : > { %4990 = vmatmul.msk.f32.gmra.mxu3 %vm791_vm2, %v711_v6 }
 0x179   : > { %4963 = vmatmul.msk.f32.gmra.mxu2 %vm791_vm2, %v4934_v13 }
 0x17b   : > { %v6285_v9 = vpop.f32.mrf.mxu3 }
 0x17c   : > { %v6287_v10 = vpop.f32.mrf.mxu1  ;;  %v6299_v14 = vpop.f32.mrf.mxu2 }
 0x17f   : > { %5062 = vmatmul.msk.f32.gmra.mxu1 %vm791_vm2, %v5033_v11 }
 0x180   : > { %4991 = vmatmul.msk.f32.gmra.mxu3 %vm791_vm2, %v712_v12 }
 0x181   : > { %4964 = vmatmul.msk.f32.gmra.mxu2 %vm791_vm2, %v4935_v19 }
 0x183   : > { %v6303_v15 = vpop.f32.mrf.mxu3 }
 0x184   : > { %v6305_v16 = vpop.f32.mrf.mxu1  ;;  %v6317_v20 = vpop.f32.mrf.mxu2 }
 0x187   : > { %5063 = vmatmul.msk.f32.gmra.mxu1 %vm791_vm2, %v5034_v17 }
 0x188   : > { %4992 = vmatmul.msk.f32.gmra.mxu3 %vm791_vm2, %v713_v18 }
 0x189   : > { %4965 = vmatmul.msk.f32.gmra.mxu2 %vm791_vm2, %v4936_v25 }
 0x18b   : > { %v6321_v21 = vpop.f32.mrf.mxu3 }
 0x18c   : > { %v6323_v22 = vpop.f32.mrf.mxu1  ;;  %v6335_v26 = vpop.f32.mrf.mxu2 }
 0x18f   : > { %5064 = vmatmul.msk.f32.gmra.mxu1 %vm791_vm2, %v5035_v23 }
 0x190   : > { %4993 = vmatmul.msk.f32.gmra.mxu3 %vm791_vm2, %v714_v24 }
 0x191   : > { %4966 = vmatmul.msk.f32.gmra.mxu2 %vm791_vm2, %v4937_v31 }
 0x193   : > { %v6339_v27 = vpop.f32.mrf.mxu3 }
 0x194   : > { %v6341_v28 = vpop.f32.mrf.mxu1  ;;  %v927_v32 = vpop.f32.mrf.mxu2 }
 0x197   : > { %5065 = vmatmul.msk.f32.gmra.mxu1 %vm791_vm2, %v5036_v29 }
 0x198   : > { %4994 = vmatmul.msk.f32.gmra.mxu3 %vm791_vm2, %v715_v30 }
 0x199   : > { %4967 = vmatmul.msk.f32.gmra.mxu2 %vm791_vm2, %v4938_v37 }
 0x19b   : > { %v1112_v33 = vpop.f32.mrf.mxu3 }
 0x19c   : > { %v6355_v34 = vpop.f32.mrf.mxu1  ;;  %v930_v38 = vpop.f32.mrf.mxu2 }
 0x19f   : > { %5066 = vmatmul.msk.f32.gmra.mxu1 %vm791_vm2, %v5037_v35 }
 0x1a0   : > { %4995 = vmatmul.msk.f32.gmra.mxu3 %vm791_vm2, %v716_v36 }
 0x1a3   : > { %v1115_v39 = vpop.f32.mrf.mxu3 }
 0x1a4   : > { %v6369_v40 = vpop.f32.mrf.mxu1  ;;  %v933_v44 = vpop.f32.mrf.mxu2 }
 0x1a7   : > { %5067 = vmatmul.msk.f32.gmra.mxu1 %vm791_vm2, %v5038_v41 }
 0x1a8   : > { %4996 = vmatmul.msk.f32.gmra.mxu3 %vm791_vm2, %v717_v43 }
 0x1ab   : > { %v1118_v45 = vpop.f32.mrf.mxu3 }
 0x1ac   : > { %v1370_v46 = vpop.f32.mrf.mxu1  ;;  %v936_v50 = vpop.f32.mrf.mxu2  ;;  %v1119_v41 = vadd.f32 %v1118_v45, %v930_v38 }
 0x1af   : > { %5068 = vmatmul.msk.f32.gmra.mxu1 %vm791_vm2, %v5039_v49  ;;  %v1116_v49 = vadd.f32 %v1115_v39, %v927_v32 }
 0x1b3   : > { %v1121_v51 = vpop.f32.mrf.mxu3 }
 0x1b4   : > { %v1373_v52 = vpop.f32.mrf.mxu1  ;;  %v939_v57 = vpop.f32.mrf.mxu2  ;;  %v1122_v35 = vadd.f32 %v1121_v51, %v933_v44 }
 0x1b7   : > { %5069 = vmatmul.msk.f32.gmra.mxu1 %vm791_vm2, %v5040_v54 }
 0x1bb   : > { %v1124_v55 = vpop.f32.mrf.mxu3 }
 0x1bc   : > { %v1376_v58 = vpop.f32.mrf.mxu1  ;;  %v942_v5 = vpop.f32.mrf.mxu2  ;;  %v1125_v25 = vadd.f32 %v1124_v55, %v936_v50  ;;  %v1110_v55 = vadd.f32 %v6339_v27, %v6317_v20  ;;  %v1104_v20 = vadd.f32 %v6303_v15, %v6281_v8  ;;  %v1098_v8 = vadd.f32 %v6267_v3, %v6245_v59 }
 0x1bd   : > { %v1440_v44 = vadd.f32 %v1376_v58, %v1116_v49  ;;  %v1101_v58 = vadd.f32 %v6285_v9, %v6263_v2 }
 0x1be   : > { %v1438_v27 = vadd.f32 %v1370_v46, %v1110_v55  ;;  %v1436_v15 = vadd.f32 %v6355_v34, %v1104_v20  ;;  %v1434_v59 = vadd.f32 %v6323_v22, %v1098_v8  ;;  %v1433_v34 = vadd.f32 %v6305_v16, %v6254_v63  ;;  %v6505_v20 = vld [vmem:[%s8531_s7 + $0x10] sm:$0xff] }
 0x1bf   : > { %5070 = vmatmul.msk.f32.gmra.mxu1 %vm791_vm2, %v5041_v60  ;;  %v1113_v60 = vadd.f32 %v1112_v33, %v6335_v26  ;;  %v1107_v26 = vadd.f32 %v6321_v21, %v6299_v14  ;;  %v1435_v2 = vadd.f32 %v6341_v28, %v1101_v58  ;;  %v1432_v22 = vadd.f32 %v6287_v10, %v6236_v56 }
 0x1c0   : > { %v1086_v63 = vadd.f32 %v6201_v42, %v6213_v47 }
 0x1c1   : > { %v1439_v33 = vadd.f32 %v1373_v52, %v1113_v60  ;;  %v1437_v14 = vadd.f32 %v6369_v40, %v1107_v26  ;;  %v6499_v26 = vld [vmem:[%s8531_s7] sm:$0xff] }
 0x1c2   : > { %8566 = vst [vmem:[#allocation5_spill] sm:$0xff] %v6499_v26 }
 0x1c3   : > { %v1127_v62 = vpop.f32.mrf.mxu3 }
 0x1c4   : > { %v1379_v0 = vpop.f32.mrf.mxu1  ;;  %v6395_v11 = vpop.f32.mrf.mxu2  ;;  %v1128_v23 = vadd.f32 %v1127_v62, %v939_v57 }
 0x1c7   : > { %5071 = vmatmul.msk.f32.gmra.mxu1 %vm791_vm2, %v5042_v1  ;;  %v1441_v1 = vadd.f32 %v1379_v0, %v1119_v41 }
 0x1cb   : > { %v1130_v6 = vpop.f32.mrf.mxu3 }
 0x1cc   : > { %v1382_v7 = vpop.f32.mrf.mxu1  ;;  %v6399_v17 = vpop.f32.mrf.mxu2  ;;  %v1131_v24 = vadd.f32 %v1130_v6, %v942_v5  ;;  %v1089_v5 = vadd.f32 %v6217_v48, %v6231_v53  ;;  %v1430_v48 = vadd.f32 %v6249_v61, %v1086_v63 }
 0x1cd   : > { %v1442_v54 = vadd.f32 %v1382_v7, %v1122_v35 }
 0x1ce   : > { %v1431_v16 = vadd.f32 %v6269_v4, %v1089_v5 }
 0x1d3   : > { %v6397_v12 = vpop.f32.mrf.mxu3 }
 0x1d4   : > { %v1385_v13 = vpop.f32.mrf.mxu1  ;;  %v6403_v29 = vpop.f32.mrf.mxu2 }
 0x1d5   : > { %v1443_v43 = vadd.f32 %v1385_v13, %v1125_v25 }
 0x1db   : > { %v6401_v18 = vpop.f32.mrf.mxu3 }
 0x1dc   : > { %v1388_v19 = vpop.f32.mrf.mxu1  ;;  %v6414_v51 = vpop.f32.mrf.mxu2 }
 0x1dd   : > { %v1444_v36 = vadd.f32 %v1388_v19, %v1128_v23 }
 0x1e3   : > { %v6405_v31 = vpop.f32.mrf.mxu3 }
 0x1e4   : > { %v1391_v30 = vpop.f32.mrf.mxu1  ;;  %v6446_v9 = vpop.f32.mrf.mxu2 }
 0x1e5   : > { %v1445_v37 = vadd.f32 %v1391_v30, %v1131_v24 }
 0x1e7   : > { %5601 = vtanh.f32 %v1445_v37 }
 0x1e8   : > { %5603 = vtanh.f32 %v1444_v36 }
 0x1e9   : > { %5605 = vtanh.f32 %v1443_v43 }
 0x1ea   : > { %5607 = vtanh.f32 %v1442_v54 }
 0x1eb   : > { %v6417_v32 = vpop.f32.mrf.mxu3  ;;  %5609 = vtanh.f32 %v1441_v1 }
 0x1ec   : > { %v6408_v57 = vpop.f32.mrf.mxu1  ;;  %5611 = vtanh.f32 %v1440_v44  ;;  %v960_v53 = vpop.f32.mrf.mxu2 }
 0x1ed   : > { %v6410_v50 = vpop.eup %5601  ;;  %5613 = vtanh.f32 %v1439_v33 }
 0x1ee   : > { %1497 = vmatpush.msra.mxu0 %v6410_v50  ;;  %v6419_v38 = vpop.eup %5603  ;;  %5615 = vtanh.f32 %v1438_v27 }
 0x1ef   : > { %v6424_v39 = vpop.eup %5605  ;;  %5617 = vtanh.f32 %v1437_v14 }
 0x1f0   : > { %1498 = vmatpush.msra.mxu0 %v6419_v38  ;;  %v6429_v45 = vpop.eup %5607  ;;  %5619 = vtanh.f32 %v1436_v15 }
 0x1f1   : > { %v6437_v52 = vpop.eup %5609  ;;  %5621 = vtanh.f32 %v1435_v2 }
 0x1f2   : > { %1499 = vmatpush.msra.mxu0 %v6424_v39  ;;  %v6443_v46 = vpop.eup %5611  ;;  %5623 = vtanh.f32 %v1434_v59 }
 0x1f3   : > { %v6449_v40 = vpop.f32.mrf.mxu3  ;;  %v6451_v62 = vpop.eup %5613  ;;  %5625 = vtanh.f32 %v1433_v34 }
 0x1f4   : > { %v6434_v21 = vpop.f32.mrf.mxu1  ;;  %1500 = vmatpush.msra.mxu0 %v6429_v45  ;;  %v6455_v3 = vpop.eup %5615  ;;  %5627 = vtanh.f32 %v1432_v22 }
 0x1f5   : > { %v6462_v0 = vpop.eup %5617  ;;  %5629 = vtanh.f32 %v1431_v16  ;;  %v963_v19 = vpop.f32.mrf.mxu2 }
 0x1f6   : > { %1501 = vmatpush.msra.mxu0 %v6437_v52  ;;  %v6469_v6 = vpop.eup %5619  ;;  %5631 = vtanh.f32 %v1430_v48 }
 0x1f7   : > { %v6475_v7 = vpop.eup %5621 }
 0x1f8   : > { %1502 = vmatpush.msra.mxu0 %v6443_v46  ;;  %v6479_v10 = vpop.eup %5623 }
 0x1f9   : > { %v6484_v42 = vpop.eup %5625 }
 0x1fa   : > { %1503 = vmatpush.msra.mxu0 %v6451_v62  ;;  %v6487_v47 = vpop.eup %5627 }
 0x1fb   : > { %v1148_v56 = vpop.f32.mrf.mxu3  ;;  %v6490_v61 = vpop.eup %5629 }
 0x1fc   : > { %v6459_v28 = vpop.f32.mrf.mxu1  ;;  %1504 = vmatpush.msra.mxu0 %v6455_v3  ;;  %8564 = vst [vmem:[#allocation3_spill] sm:$0xff] %v6490_v61  ;;  %v6493_v4 = vpop.eup %5631 }
 0x1fd   : > { %8565 = vst [vmem:[#allocation4_spill] sm:$0xff] %v6493_v4  ;;  %v966_v30 = vpop.f32.mrf.mxu2 }
 0x1fe   : > { %1505 = vmatpush.msra.mxu0 %v6462_v0 }
 0x200   : > { %1506 = vmatpush.msra.mxu0 %v6469_v6 }
 0x202   : > { %1507 = vmatpush.msra.mxu0 %v6475_v7 }
 0x203   : > { %v1151_v24 = vpop.f32.mrf.mxu3 }
 0x204   : > { %v6481_v13 = vpop.f32.mrf.mxu1  ;;  %1508 = vmatpush.msra.mxu0 %v6479_v10  ;;  %v1152_v16 = vadd.f32 %v1151_v24, %v963_v19 }
 0x205   : > { %v969_v37 = vpop.f32.mrf.mxu2 }
 0x206   : > { %1509 = vmatpush.msra.mxu0 %v6484_v42 }
 0x208   : > { %1510 = vmatpush.msra.mxu0 %v6487_v47 }
 0x20a   : > { %1511 = vmatpush.msra.mxu0 %v6490_v61 }
 0x20b   : > { %v1154_v35 = vpop.f32.mrf.mxu3 }
 0x20c   : > { %v1406_v23 = vpop.f32.mrf.mxu1  ;;  %1512 = vmatpush.msra.mxu0 %v6493_v4  ;;  %v1155_v22 = vadd.f32 %v1154_v35, %v966_v30  ;;  %v1143_v30 = vadd.f32 %v6417_v32, %v6414_v51  ;;  %v1557_v35 = vmul.f32 %v6419_v38, %v6419_v38 }
 0x20d   : > { %v972_v49 = vpop.f32.mrf.mxu2  ;;  %1513 = vmatmul.f32.vlgmr.msra.gmra.mxu0 %v6499_v26  ;;  %v1149_v26 = vadd.f32 %v1148_v56, %v960_v53  ;;  %v1140_v56 = vadd.f32 %v6405_v31, %v6403_v29 }
 0x20e   : > { %v1449_v51 = vadd.f32 %v6481_v13, %v1143_v30 }
 0x20f   : > { %v1448_v29 = vadd.f32 %v6459_v28, %v1140_v56 }
 0x213   : > { %v1157_v41 = vpop.f32.mrf.mxu3 }
 0x214   : > { %v1409_v25 = vpop.f32.mrf.mxu1  ;;  %v1158_v59 = vadd.f32 %v1157_v41, %v969_v37  ;;  %v1555_v41 = vmul.f32 %v6429_v45, %v6429_v45 }
 0x215   : > { %v975_v1 = vpop.f32.mrf.mxu2  ;;  %1516 = vmatmul.f32.gmra.mxu0 %v6505_v20  ;;  %v1451_v19 = vadd.f32 %v1409_v25, %v1149_v26  ;;  %v1558_v25 = vmul.f32 %v6410_v50, %v6410_v50  ;;  %v1550_v26 = vmul.f32 %v6462_v0, %v6462_v0 }
 0x21b   : > { %v1160_v54 = vpop.f32.mrf.mxu3 }
 0x21c   : > { %v1412_v36 = vpop.f32.mrf.mxu1  ;;  %v1161_v15 = vadd.f32 %v1160_v54, %v972_v49  ;;  %v1554_v49 = vmul.f32 %v6437_v52, %v6437_v52  ;;  %v1553_v54 = vmul.f32 %v6443_v46, %v6443_v46 }
 0x21d   : > { %v978_v27 = vpop.f32.mrf.mxu2 }
 0x223   : > { %v1163_v44 = vpop.f32.mrf.mxu3 }
 0x224   : > { %v1415_v43 = vpop.f32.mrf.mxu1  ;;  %v1164_v14 = vadd.f32 %v1163_v44, %v975_v1  ;;  %v1146_v1 = vadd.f32 %v6449_v40, %v6446_v9  ;;  %v1452_v44 = vadd.f32 %v1412_v36, %v1152_v16  ;;  %v1137_v40 = vadd.f32 %v6401_v18, %v6399_v17 }
 0x225   : > { %v1453_v4 = vadd.f32 %v1415_v43, %v1155_v22  ;;  %v1556_v36 = vmul.f32 %v6424_v39, %v6424_v39  ;;  %v6576_v43 = vld [vmem:[%s8531_s7 + $0x18] sm:$0xff] }
 0x226   : > { %v1450_v24 = vadd.f32 %v1406_v23, %v1146_v1  ;;  %v1447_v23 = vadd.f32 %v6434_v21, %v1137_v40 }
 0x22b   : > { %v1166_v58 = vpop.f32.mrf.mxu3 }
 0x22c   : > { %v1418_v60 = vpop.f32.mrf.mxu1  ;;  %v1167_v8 = vadd.f32 %v1166_v58, %v978_v27  ;;  %v1548_v27 = vmul.f32 %v6475_v7, %v6475_v7  ;;  %v1547_v58 = vmul.f32 %v6479_v10, %v6479_v10 }
 0x22d   : > { %v1454_v48 = vadd.f32 %v1418_v60, %v1158_v59  ;;  %v1552_v60 = vmul.f32 %v6451_v62, %v6451_v62  ;;  %v8568_v59 = vld [vmem:[#allocation4_spill] sm:$0xff] }
 0x234   : > { %v1421_v55 = vpop.f32.mrf.mxu1 }
 0x235   : > { %v1455_v63 = vadd.f32 %v1421_v55, %v1161_v15  ;;  %v1551_v55 = vmul.f32 %v6455_v3, %v6455_v3  ;;  %v8567_v15 = vld [vmem:[#allocation3_spill] sm:$0xff] }
 0x23c   : > { %v1424_v33 = vpop.f32.mrf.mxu1 }
 0x23d   : > { %v1456_v34 = vadd.f32 %v1424_v33, %v1164_v14  ;;  %v1549_v33 = vmul.f32 %v6469_v6, %v6469_v6  ;;  %v1546_v14 = vmul.f32 %v6484_v42, %v6484_v42 }
 0x244   : > { %v1427_v2 = vpop.f32.mrf.mxu1 }
 0x245   : > { %v1457_v5 = vadd.f32 %v1427_v2, %v1167_v8  ;;  %v1545_v8 = vmul.f32 %v6487_v47, %v6487_v47  ;;  %v1544_v2 = vmul.f32 %v8567_v15, %v8567_v15 }
 0x247   : > { %5633 = vtanh.f32 %v1457_v5 }
 0x248   : > { %5635 = vtanh.f32 %v1456_v34  ;;  %v1543_v34 = vmul.f32 %v8568_v59, %v8568_v59 }
 0x249   : > { %5637 = vtanh.f32 %v1455_v63  ;;  %v8569_v63 = vld [vmem:[#allocation5_spill] sm:$0xff] }
 0x24a   : > { %5639 = vtanh.f32 %v1454_v48 }
 0x24b   : > { %5641 = vtanh.f32 %v1453_v4  ;;  %v1134_v4 = vadd.f32 %v6397_v12, %v6395_v11 }
 0x24c   : > { %5643 = vtanh.f32 %v1452_v44 }
 0x24d   : > { %v6508_v61 = vpop.eup %5633  ;;  %5645 = vtanh.f32 %v1451_v19  ;;  %v1446_v18 = vadd.f32 %v6408_v57, %v1134_v4  ;;  %v6558_v57 = vld [vmem:[%s8531_s7 + $0x8] sm:$0xff] }
 0x24e   : > { %1524 = vmatpush.msrb.mxu0 %v6508_v61  ;;  %v6513_v37 = vpop.eup %5635  ;;  %5647 = vtanh.f32 %v1450_v24  ;;  %v1570_v5 = vmul.f32 %v6508_v61, %v6508_v61  ;;  %v1622_v4 = vld [vmem:[%s8537_s13 + $0x28] sm:$0xff] }
 0x24f   : > { %v6518_v53 = vpop.eup %5637  ;;  %5649 = vtanh.f32 %v1449_v51  ;;  %v1569_v22 = vmul.f32 %v6513_v37, %v6513_v37  ;;  %v1623_v51 = vld [vmem:[%s8537_s13 + $0x30] sm:$0xff] }
 0x250   : > { %1525 = vmatpush.msrb.mxu0 %v6513_v37  ;;  %v6523_v9 = vpop.eup %5639  ;;  %5651 = vtanh.f32 %v1448_v29  ;;  %v1568_v16 = vmul.f32 %v6518_v53, %v6518_v53  ;;  %v1621_v29 = vld [vmem:[%s8537_s13 + $0x20] sm:$0xff] }
 0x251   : > { %v6529_v32 = vpop.eup %5641  ;;  %5653 = vtanh.f32 %v1447_v23  ;;  %v1567_v48 = vmul.f32 %v6523_v9, %v6523_v9  ;;  %v1620_v23 = vld [vmem:[%s8537_s13 + $0x18] sm:$0xff] }
 0x252   : > { %1526 = vmatpush.msrb.mxu0 %v6518_v53  ;;  %v6535_v31 = vpop.eup %5643  ;;  %5655 = vtanh.f32 %v1446_v18  ;;  %v1566_v1 = vmul.f32 %v6529_v32, %v6529_v32  ;;  %v1619_v18 = vld [vmem:[%s8537_s13 + $0x10] sm:$0xff] }
 0x253   : > { %v6539_v17 = vpop.eup %5645  ;;  %v1565_v44 = vmul.f32 %v6535_v31, %v6535_v31 }
 0x254   : > { %1527 = vmatpush.msrb.mxu0 %v6523_v9  ;;  %v6543_v11 = vpop.eup %5647  ;;  %v1564_v30 = vmul.f32 %v6539_v17, %v6539_v17 }
 0x255   : > { %v6546_v12 = vpop.eup %5649  ;;  %v1563_v19 = vmul.f32 %v6543_v11, %v6543_v11 }
 0x256   : > { %1528 = vmatpush.msrb.mxu0 %v6529_v32  ;;  %v6549_v21 = vpop.eup %5651  ;;  %v1562_v56 = vmul.f32 %v6546_v12, %v6546_v12 }
 0x257   : > { %v6552_v28 = vpop.eup %5653  ;;  %v1561_v24 = vmul.f32 %v6549_v21, %v6549_v21 }
 0x258   : > { %1529 = vmatpush.msrb.mxu0 %v6535_v31  ;;  %v6560_v13 = vpop.eup %5655 }
 0x259   : > { %v1559_v40 = vmul.f32 %v6560_v13, %v6560_v13 }
 0x25a   : > { %1530 = vmatpush.msrb.mxu0 %v6539_v17 }
 0x25c   : > { %1531 = vmatpush.msrb.mxu0 %v6543_v11 }
 0x25e   : > { %1532 = vmatpush.msrb.mxu0 %v6546_v12 }
 0x260   : > { %1533 = vmatpush.msrb.mxu0 %v6549_v21 }
 0x262   : > { %1534 = vmatpush.msrb.mxu0 %v6552_v28 }
 0x264   : > { %1535 = vmatpush.msrb.mxu0 %v6560_v13 }
 0x265   : > { %5072 = vmatmul.msk.f32.vlgmr.msrb.gmra.mxu0 %vm1490_vm3, %v6558_v57 }
 0x266   : > { %1571 = vmatpush.msra.mxu0 %v1558_v25  ;;  %v1617_v25 = vld [vmem:[%s8537_s13] sm:$0xff] }
 0x268   : > { %1572 = vmatpush.msra.mxu0 %v1557_v35 }
 0x26a   : > { %1573 = vmatpush.msra.mxu0 %v1556_v36 }
 0x26c   : > { %1574 = vmatpush.msra.mxu0 %v1555_v41 }
 0x26d   : > { %5073 = vmatmul.msk.f32.gmra.mxu0 %vm1490_vm3, %v6576_v43 }
 0x26e   : > { %1575 = vmatpush.msra.mxu0 %v1554_v49 }
 0x270   : > { %1576 = vmatpush.msra.mxu0 %v1553_v54 }
 0x272   : > { %1577 = vmatpush.msra.mxu0 %v1552_v60 }
 0x274   : > { %1578 = vmatpush.msra.mxu0 %v1551_v55 }
 0x276   : > { %1579 = vmatpush.msra.mxu0 %v1550_v26 }
 0x278   : > { %1580 = vmatpush.msra.mxu0 %v1549_v33 }
 0x27a   : > { %1581 = vmatpush.msra.mxu0 %v1548_v27 }
 0x27c   : > { %1582 = vmatpush.msra.mxu0 %v1547_v58 }
 0x27e   : > { %1583 = vmatpush.msra.mxu0 %v1546_v14 }
 0x280   : > { %1584 = vmatpush.msra.mxu0 %v1545_v8  ;;  %v1743_v8 = vld [vmem:[%s8538_s14] sm:$0xf] }
 0x281   : > { %5111 = vmatpush.msk.msrb.mxu3 %vm876_vm1, %v1743_v8 }
 0x282   : > { %1585 = vmatpush.msra.mxu0 %v1544_v2 }
 0x284   : > { %1586 = vmatpush.msra.mxu0 %v1543_v34 }
 0x285   : > { %1587 = vmatmul.f32.vlgmr.msra.gmra.mxu0 %v8569_v63 }
 0x286   : > { %1598 = vmatpush.msrb.mxu0 %v1570_v5 }
 0x288   : > { %1599 = vmatpush.msrb.mxu0 %v1569_v22 }
 0x28a   : > { %1600 = vmatpush.msrb.mxu0 %v1568_v16  ;;  %v1514_v35 = vpop.f32.mrf.mxu0 }
 0x28c   : > { %1601 = vmatpush.msrb.mxu0 %v1567_v48 }
 0x28d   : > { %1590 = vmatmul.f32.gmra.mxu0 %v6505_v20  ;;  %v1560_v20 = vmul.f32 %v6552_v28, %v6552_v28 }
 0x28e   : > { %1602 = vmatpush.msrb.mxu0 %v1566_v1 }
 0x290   : > { %1603 = vmatpush.msrb.mxu0 %v1565_v44 }
 0x292   : > { %1604 = vmatpush.msrb.mxu0 %v1564_v30  ;;  %v1517_v36 = vpop.f32.mrf.mxu0 }
 0x294   : > { %1605 = vmatpush.msrb.mxu0 %v1563_v19 }
 0x296   : > { %1606 = vmatpush.msrb.mxu0 %v1562_v56 }
 0x298   : > { %1607 = vmatpush.msrb.mxu0 %v1561_v24 }
 0x29a   : > { %1608 = vmatpush.msrb.mxu0 %v1560_v20 }
 0x29c   : > { %1609 = vmatpush.msrb.mxu0 %v1559_v40 }
 0x29d   : > { %5074 = vmatmul.msk.f32.vlgmr.msrb.gmra.mxu0 %vm1490_vm3, %v6558_v57  ;;  %v1618_v57 = vld [vmem:[%s8537_s13 + $0x8] sm:$0xff] }
 0x29e   : > { %1640 = vmatpush.msra.mxu0 %v1623_v51 }
 0x2a0   : > { %1641 = vmatpush.msra.mxu0 %v1622_v4 }
 0x2a2   : > { %1642 = vmatpush.msra.mxu0 %v1621_v29 }
 0x2a4   : > { %1643 = vmatpush.msra.mxu0 %v1620_v23 }
 0x2a5   : > { %5075 = vmatmul.msk.f32.gmra.mxu0 %vm1490_vm3, %v6576_v43 }
 0x2a6   : > { %1644 = vmatpush.msra.mxu0 %v1619_v18 }
 0x2a8   : > { %1645 = vmatpush.msra.mxu0 %v1618_v57 }
 0x2aa   : > { %1646 = vmatpush.msra.mxu0 %v1617_v25 }
 0x2ac   : > { %1671 = vmatpush.msrb.mxu0 %v1623_v51 }
 0x2ae   : > { %1672 = vmatpush.msrb.mxu0 %v1622_v4 }
 0x2b0   : > { %1673 = vmatpush.msrb.mxu0 %v1621_v29 }
 0x2b2   : > { %1674 = vmatpush.msrb.mxu0 %v1620_v23 }
 0x2b4   : > { %1675 = vmatpush.msrb.mxu0 %v1619_v18 }
 0x2b6   : > { %1676 = vmatpush.msrb.mxu0 %v1618_v57 }
 0x2b8   : > { %1677 = vmatpush.msrb.mxu0 %v1617_v25 }
 0x2e2   : > { %v1537_v41 = vpop.f32.mrf.mxu0 }
 0x2e3   : > { %v1538_v43 = vadd.f32 %v1537_v41, %v1514_v35 }
 0x2e5   : > { %5076 = vmatmul.msk.f32.vlgmr.msra.gmra.mxu0 %vm1624_vm4, %v1538_v43 }
 0x2e6   : > { %5080 = vmatpush.msk.msra.mxu0 %vm876_vm1, %v1743_v8  ;;  %v1717_v8 = vld [vmem:[%s8532_s8 + $0x10] sm:$0xff] }
 0x2ea   : > { %v1540_v49 = vpop.f32.mrf.mxu0 }
 0x2eb   : > { %v1541_v54 = vadd.f32 %v1540_v49, %v1517_v36 }
 0x2ed   : > { %5077 = vmatmul.msk.f32.gmra.mxu0 %vm1624_vm4, %v1541_v54 }
 0x302   : > { %v1588_v60 = vpop.f32.mrf.mxu0 }
 0x30a   : > { %v1591_v55 = vpop.f32.mrf.mxu0 }
 0x31a   : > { %v1611_v26 = vpop.f32.mrf.mxu0 }
 0x31b   : > { %v1612_v33 = vadd.f32 %v1611_v26, %v1588_v60 }
 0x31d   : > { %5078 = vmatmul.msk.f32.vlgmr.msrb.gmra.mxu0 %vm1624_vm4, %v1612_v33 }
 0x322   : > { %v1614_v27 = vpop.f32.mrf.mxu0 }
 0x323   : > { %v1615_v58 = vadd.f32 %v1614_v27, %v1591_v55  ;;  %v1715_v27 = vld [vmem:[%s8532_s8] sm:$0xff] }
 0x325   : > { %5079 = vmatmul.msk.f32.gmra.mxu0 %vm1624_vm4, %v1615_v58 }
 0x362   : > { %v1648_v14 = vpop.f32.mrf.mxu0 }
 0x363   : > { %v1654_v34 = vmul.f32 0.0051020407, %v1648_v14  ;;  %v1716_v14 = vld [vmem:[%s8532_s8 + $0x8] sm:$0xff] }
 0x365   : > { %v1687_v22 = vmul.f32 %v1654_v34, %v1654_v34 }
 0x36a   : > { %v1651_v2 = vpop.f32.mrf.mxu0 }
 0x36b   : > { %v1655_v48 = vmul.f32 0.0051020407, %v1651_v2  ;;  %v1718_v2 = vld [vmem:[%s8532_s8 + $0x18] sm:$0xff] }
 0x36d   : > { %v1688_v30 = vmul.f32 %v1655_v48, %v1655_v48 }
 0x39a   : > { %v1679_v5 = vpop.f32.mrf.mxu0 }
 0x39b   : > { %v1685_v63 = vmul.f32 0.0051020407, %v1679_v5  ;;  %v1720_v5 = vld [vmem:[%s8532_s8 + $0x28] sm:$0xff] }
 0x39d   : > { %v1689_v16 = vsub.f32 %v1685_v63, %v1687_v22  ;;  %v1721_v22 = vld [vmem:[%s8532_s8 + $0x30] sm:$0xff]  ;;  %v1722_v63 = vld [vmem:[%s8532_s8 + $0x38] sm:$0xff] }
 0x39f   : > { %v1691_v1 = vadd.f32 1e-05, %v1689_v16  ;;  %v1723_v16 = vld [vmem:[%s8532_s8 + $0x40] sm:$0xff] }
 0x3a1   : > { %5657 = vrsqrt.f32 %v1691_v1  ;;  %vm1699_vm6 = vweird.f32 %v1691_v1 }
 0x3a2   : > { %v1682_v44 = vpop.f32.mrf.mxu0 }
 0x3a3   : > { %v1686_v19 = vmul.f32 0.0051020407, %v1682_v44  ;;  %v5176_v44 = vld [vmem:[%s8570_s1 + $0x68] sm:$0xff]  ;;  %s5574_s1 = sshll.u32 %s8635_s22, 4 }
 0x3a4   : > { %2386 = vmatpush.msrb.mxu1 %v5176_v44  ;;  %s629_s30 = scalar_lea.vmem %s8544_s20, %s5574_s1 }
 0x3a5   : > { %v1690_v56 = vsub.f32 %v1686_v19, %v1688_v30  ;;  %v1726_v30 = vld [vmem:[%s8532_s8 + $0x58] sm:$0xff]  ;;  %v2155_v19 = vld [vmem:[%s8571_s26 + $0x30] sm:$0xff] }
 0x3a6   : > { %2249 = vmatpush.msra.mxu3 %v2155_v19 }
 0x3a7   : > { %v5658_v24 = vpop.eup %5657  ;;  %v1692_v20 = vadd.f32 1e-05, %v1690_v56  ;;  %v2154_v56 = vld [vmem:[%s8571_s26 + $0x28] sm:$0xff] }
 0x3a8   : > { %v1694_v40 = vmul.f32 %v5658_v24, %v1691_v1  ;;  %vm1700_vm5 = vweird.f32 %v5658_v24  ;;  %v1725_v1 = vld [vmem:[%s8532_s8 + $0x50] sm:$0xff]  ;;  %2250 = vmatpush.msra.mxu3 %v2154_v56  ;;  %v1736_v56 = vld [vmem:[%s8532_s8 + $0xa8] sm:$0xff] }
 0x3a9   : > { %5659 = vrsqrt.f32 %v1692_v20  ;;  %vm1701_vm8 = vmor %vm1699_vm6, %vm1700_vm5  ;;  %vm1709_vm10 = vweird.f32 %v1692_v20 }
 0x3aa   : > { %v1695_v51 = vmul.f32 %v5658_v24, %v1694_v40  ;;  %v2153_v40 = vld [vmem:[%s8571_s26 + $0x20] sm:$0xff] }
 0x3ab   : > { %2251 = vmatpush.msra.mxu3 %v2153_v40 }
 0x3ac   : > { %v1696_v4 = vmul.f32 0.5, %v1695_v51  ;;  %v1727_v51 = vld [vmem:[%s8532_s8 + $0x60] sm:$0xff] }
 0x3ae   : > { %v1697_v29 = vsub.f32 1.5, %v1696_v4  ;;  %v2152_v4 = vld [vmem:[%s8571_s26 + $0x18] sm:$0xff] }
 0x3af   : > { %v5660_v23 = vpop.eup %5659  ;;  %2252 = vmatpush.msra.mxu3 %v2152_v4 }
 0x3b0   : > { %v1704_v18 = vmul.f32 %v5660_v23, %v1692_v20  ;;  %v1698_v57 = vmul.f32 %v5658_v24, %v1697_v29  ;;  %vm1710_vm9 = vweird.f32 %v5660_v23  ;;  %v5174_v20 = vld [vmem:[%s8571_s26 + $0x58] sm:$0xff]  ;;  %v5173_v29 = vld [vmem:[%s8571_s26 + $0x50] sm:$0xff] }
 0x3b1   : > { %vm1711_vm11 = vmor %vm1709_vm10, %vm1710_vm9 }
 0x3b2   : > { %v1702_v25 = vsel %vm1701_vm8, %v5658_v24, %v1698_v57  ;;  %v1705_v35 = vmul.f32 %v5660_v23, %v1704_v18  ;;  %v5175_v24 = vld [vmem:[%s8571_s26 + $0x60] sm:$0xff]  ;;  %v5172_v18 = vld [vmem:[%s8571_s26 + $0x48] sm:$0xff] }
 0x3b3   : > { %v1713_v36 = vmul.f32 %v1702_v25, %v1654_v34  ;;  %5081 = vmatmul.msk.f32.vlgmr.msra.gmra.mxu0 %vm1744_vm7, %v1702_v25  ;;  %v1719_v34 = vld [vmem:[%s8532_s8 + $0x20] sm:$0xff]  ;;  %2387 = vmatpush.msrb.mxu1 %v5175_v24  ;;  %v2150_v57 = vld [vmem:[%s8571_s26 + $0x8] sm:$0xff] }
 0x3b4   : > { %v1706_v41 = vmul.f32 0.5, %v1705_v35  ;;  %v5171_v25 = vld [vmem:[%s8571_s26 + $0x40] sm:$0xff]  ;;  %v1728_v35 = vld [vmem:[%s8532_s8 + $0x68] sm:$0xff] }
 0x3b5   : > { %5112 = vmatmul.msk.f32.vlgmr.msrb.gmra.mxu3 %vm1744_vm7, %v1713_v36  ;;  %2388 = vmatpush.msrb.mxu1 %v5174_v20  ;;  %v2149_v36 = vld [vmem:[%s8571_s26] sm:$0xff] }
 0x3b6   : > { %v1707_v43 = vsub.f32 1.5, %v1706_v41  ;;  %v5170_v41 = vld [vmem:[%s8571_s26 + $0x38] sm:$0xff] }
 0x3b7   : > { %2389 = vmatpush.msrb.mxu1 %v5173_v29 }
 0x3b8   : > { %v1708_v49 = vmul.f32 %v5660_v23, %v1707_v43  ;;  %v1729_v43 = vld [vmem:[%s8532_s8 + $0x70] sm:$0xff] }
 0x3b9   : > { %2390 = vmatpush.msrb.mxu1 %v5172_v18  ;;  %v1738_v18 = vld [vmem:[%s8532_s8 + $0xb8] sm:$0xff] }
 0x3ba   : > { %v1712_v54 = vsel %vm1711_vm11, %v5660_v23, %v1708_v49  ;;  %v2151_v23 = vld [vmem:[%s8571_s26 + $0x10] sm:$0xff]  ;;  %v1730_v49 = vld [vmem:[%s8532_s8 + $0x78] sm:$0xff] }
 0x3bb   : > { %v1714_v60 = vmul.f32 %v1712_v54, %v1655_v48  ;;  %5082 = vmatmul.msk.f32.gmra.mxu0 %vm1744_vm7, %v1712_v54  ;;  %v1724_v48 = vld [vmem:[%s8532_s8 + $0x48] sm:$0xff]  ;;  %2253 = vmatpush.msra.mxu3 %v2151_v23  ;;  %v1731_v54 = vld [vmem:[%s8532_s8 + $0x80] sm:$0xff] }
 0x3bc   : > { %2391 = vmatpush.msrb.mxu1 %v5171_v25 }
 0x3bd   : > { %5113 = vmatmul.msk.f32.gmra.mxu3 %vm1744_vm7, %v1714_v60 }
 0x3be   : > { %2254 = vmatpush.msra.mxu3 %v2150_v57  ;;  %2392 = vmatpush.msrb.mxu1 %v5170_v41 }
 0x3c0   : > { %2255 = vmatpush.msra.mxu3 %v2149_v36  ;;  %v1739_v36 = vld [vmem:[%s8532_s8 + $0xc0] sm:$0xff] }
 0x430   : > { %v1771_v55 = vpop.f32.mrf.mxu0 }
 0x438   : > { %v1774_v26 = vpop.f32.mrf.mxu0  ;;  %v1986_v33 = vpop.f32.mrf.mxu3 }
 0x439   : > { %1876 = vmatpush.msrb.mxu2 %v1774_v26 }
 0x43b   : > { %1877 = vmatpush.msrb.mxu2 %v1771_v55 }
 0x43c   : > { %5083 = vmatmul.msk.f32.vlgmr.msrb.gmra.mxu2 %vm1777_vm12, %v1715_v27 }
 0x440   : > { %v1989_v58 = vpop.f32.mrf.mxu3 }
 0x441   : > { %2006 = vmatpush.msrb.mxu0 %v1989_v58 }
 0x443   : > { %2007 = vmatpush.msrb.mxu0 %v1986_v33  ;;  %v1732_v33 = vld [vmem:[%s8532_s8 + $0x88] sm:$0xff] }
 0x444   : > { %5084 = vmatmul.msk.f32.gmra.mxu2 %vm1777_vm12, %v1716_v14  ;;  %5114 = vmatmul.msk.f32.vlgmr.msrb.gmra.mxu0 %vm1777_vm12, %v1715_v27 }
 0x44c   : > { %5085 = vmatmul.msk.f32.gmra.mxu2 %vm1777_vm12, %v1717_v8  ;;  %5115 = vmatmul.msk.f32.gmra.mxu0 %vm1777_vm12, %v1716_v14 }
 0x454   : > { %5086 = vmatmul.msk.f32.gmra.mxu2 %vm1777_vm12, %v1718_v2  ;;  %5116 = vmatmul.msk.f32.gmra.mxu0 %vm1777_vm12, %v1717_v8  ;;  %v1733_v8 = vld [vmem:[%s8532_s8 + $0x90] sm:$0xff] }
 0x45c   : > { %5087 = vmatmul.msk.f32.gmra.mxu2 %vm1777_vm12, %v1719_v34  ;;  %5117 = vmatmul.msk.f32.gmra.mxu0 %vm1777_vm12, %v1718_v2 }
 0x464   : > { %5088 = vmatmul.msk.f32.gmra.mxu2 %vm1777_vm12, %v1720_v5  ;;  %5118 = vmatmul.msk.f32.gmra.mxu0 %vm1777_vm12, %v1719_v34 }
 0x46c   : > { %5089 = vmatmul.msk.f32.gmra.mxu2 %vm1777_vm12, %v1721_v22  ;;  %5119 = vmatmul.msk.f32.gmra.mxu0 %vm1777_vm12, %v1720_v5 }
 0x474   : > { %5090 = vmatmul.msk.f32.gmra.mxu2 %vm1777_vm12, %v1722_v63  ;;  %5120 = vmatmul.msk.f32.gmra.mxu0 %vm1777_vm12, %v1721_v22  ;;  %v1734_v22 = vld [vmem:[%s8532_s8 + $0x98] sm:$0xff] }
 0x47c   : > { %5091 = vmatmul.msk.f32.gmra.mxu2 %vm1777_vm12, %v1723_v16  ;;  %5121 = vmatmul.msk.f32.gmra.mxu0 %vm1777_vm12, %v1722_v63 }
 0x484   : > { %5092 = vmatmul.msk.f32.gmra.mxu2 %vm1777_vm12, %v1724_v48  ;;  %5122 = vmatmul.msk.f32.gmra.mxu0 %vm1777_vm12, %v1723_v16 }
 0x48c   : > { %5093 = vmatmul.msk.f32.gmra.mxu2 %vm1777_vm12, %v1725_v1  ;;  %5123 = vmatmul.msk.f32.gmra.mxu0 %vm1777_vm12, %v1724_v48 }
 0x494   : > { %5094 = vmatmul.msk.f32.gmra.mxu2 %vm1777_vm12, %v1726_v30  ;;  %5124 = vmatmul.msk.f32.gmra.mxu0 %vm1777_vm12, %v1725_v1  ;;  %v1735_v1 = vld [vmem:[%s8532_s8 + $0xa0] sm:$0xff] }
 0x49c   : > { %5095 = vmatmul.msk.f32.gmra.mxu2 %vm1777_vm12, %v1727_v51  ;;  %5125 = vmatmul.msk.f32.gmra.mxu0 %vm1777_vm12, %v1726_v30 }
 0x4a4   : > { %5096 = vmatmul.msk.f32.gmra.mxu2 %vm1777_vm12, %v1728_v35  ;;  %5126 = vmatmul.msk.f32.gmra.mxu0 %vm1777_vm12, %v1727_v51  ;;  %v1737_v51 = vld [vmem:[%s8532_s8 + $0xb0] sm:$0xff] }
 0x4ac   : > { %5097 = vmatmul.msk.f32.gmra.mxu2 %vm1777_vm12, %v1729_v43  ;;  %5127 = vmatmul.msk.f32.gmra.mxu0 %vm1777_vm12, %v1728_v35 }
 0x4b4   : > { %5098 = vmatmul.msk.f32.gmra.mxu2 %vm1777_vm12, %v1730_v49  ;;  %5128 = vmatmul.msk.f32.gmra.mxu0 %vm1777_vm12, %v1729_v43 }
 0x4bc   : > { %5099 = vmatmul.msk.f32.gmra.mxu2 %vm1777_vm12, %v1731_v54  ;;  %5129 = vmatmul.msk.f32.gmra.mxu0 %vm1777_vm12, %v1730_v49 }
 0x4bf   : > { %v1879_v60 = vpop.f32.mrf.mxu2 }
 0x4c0   : > { %v2093_v55 = vmul.f32 %v8568_v59, %v1879_v60 }
 0x4c1   : > { %v2009_v26 = vpop.f32.mrf.mxu0 }
 0x4c2   : > { %v6798_v27 = vsub.f32 %v2093_v55, %v2009_v26 }
 0x4c4   : > { %5100 = vmatmul.msk.f32.gmra.mxu2 %vm1777_vm12, %v1732_v33  ;;  %5130 = vmatmul.msk.f32.gmra.mxu0 %vm1777_vm12, %v1731_v54  ;;  %v1740_v54 = vld [vmem:[%s8532_s8 + $0xc8] sm:$0xff] }
 0x4c5   : > { %5142 = vmatmul.msk.f32.vlgmr.msra.gmra.mxu3 %vm1624_vm4, %v6798_v27  ;;  %5177 = vmatmul.msk.f32.vlgmr.msrb.gmra.mxu1 %vm1624_vm4, %v6798_v27 }
 0x4c7   : > { %v1882_v58 = vpop.f32.mrf.mxu2 }
 0x4c8   : > { %v2094_v59 = vmul.f32 %v8567_v15, %v1882_v58 }
 0x4c9   : > { %v2012_v14 = vpop.f32.mrf.mxu0 }
 0x4ca   : > { %v6810_v2 = vsub.f32 %v2094_v59, %v2012_v14 }
 0x4cc   : > { %5101 = vmatmul.msk.f32.gmra.mxu2 %vm1777_vm12, %v1733_v8  ;;  %5131 = vmatmul.msk.f32.gmra.mxu0 %vm1777_vm12, %v1732_v33  ;;  %v1741_v33 = vld [vmem:[%s8532_s8 + $0xd0] sm:$0xff] }
 0x4cd   : > { %5143 = vmatmul.msk.f32.gmra.mxu3 %vm1624_vm4, %v6810_v2  ;;  %5178 = vmatmul.msk.f32.gmra.mxu1 %vm1624_vm4, %v6810_v2 }
 0x4cf   : > { %v1885_v34 = vpop.f32.mrf.mxu2 }
 0x4d0   : > { %v2095_v15 = vmul.f32 %v6487_v47, %v1885_v34 }
 0x4d1   : > { %v2015_v5 = vpop.f32.mrf.mxu0 }
 0x4d2   : > { %v6822_v63 = vsub.f32 %v2095_v15, %v2015_v5 }
 0x4d4   : > { %5102 = vmatmul.msk.f32.gmra.mxu2 %vm1777_vm12, %v1734_v22  ;;  %5132 = vmatmul.msk.f32.gmra.mxu0 %vm1777_vm12, %v1733_v8  ;;  %v1742_v8 = vld [vmem:[%s8532_s8 + $0xd8] sm:$0xff] }
 0x4d5   : > { %5144 = vmatmul.msk.f32.gmra.mxu3 %vm1624_vm4, %v6822_v63  ;;  %5179 = vmatmul.msk.f32.gmra.mxu1 %vm1624_vm4, %v6822_v63 }
 0x4d7   : > { %v1888_v16 = vpop.f32.mrf.mxu2 }
 0x4d8   : > { %v2096_v47 = vmul.f32 %v6484_v42, %v1888_v16 }
 0x4d9   : > { %v2018_v48 = vpop.f32.mrf.mxu0 }
 0x4da   : > { %v6834_v44 = vsub.f32 %v2096_v47, %v2018_v48 }
 0x4dc   : > { %5103 = vmatmul.msk.f32.gmra.mxu2 %vm1777_vm12, %v1735_v1  ;;  %5133 = vmatmul.msk.f32.gmra.mxu0 %vm1777_vm12, %v1734_v22 }
 0x4dd   : > { %5145 = vmatmul.msk.f32.gmra.mxu3 %vm1624_vm4, %v6834_v44  ;;  %5180 = vmatmul.msk.f32.gmra.mxu1 %vm1624_vm4, %v6834_v44 }
 0x4df   : > { %v1891_v30 = vpop.f32.mrf.mxu2 }
 0x4e0   : > { %v2097_v42 = vmul.f32 %v6479_v10, %v1891_v30 }
 0x4e1   : > { %v2021_v19 = vpop.f32.mrf.mxu0 }
 0x4e2   : > { %v6846_v24 = vsub.f32 %v2097_v42, %v2021_v19 }
 0x4e4   : > { %5104 = vmatmul.msk.f32.gmra.mxu2 %vm1777_vm12, %v1736_v56  ;;  %5134 = vmatmul.msk.f32.gmra.mxu0 %vm1777_vm12, %v1735_v1 }
 0x4e5   : > { %5146 = vmatmul.msk.f32.gmra.mxu3 %vm1624_vm4, %v6846_v24  ;;  %5181 = vmatmul.msk.f32.gmra.mxu1 %vm1624_vm4, %v6846_v24 }
 0x4e7   : > { %v1894_v20 = vpop.f32.mrf.mxu2 }
 0x4e8   : > { %v2098_v10 = vmul.f32 %v6475_v7, %v1894_v20 }
 0x4e9   : > { %v2024_v40 = vpop.f32.mrf.mxu0 }
 0x4ea   : > { %v6858_v4 = vsub.f32 %v2098_v10, %v2024_v40 }
 0x4ec   : > { %5105 = vmatmul.msk.f32.gmra.mxu2 %vm1777_vm12, %v1737_v51  ;;  %5135 = vmatmul.msk.f32.gmra.mxu0 %vm1777_vm12, %v1736_v56 }
 0x4ed   : > { %5147 = vmatmul.msk.f32.gmra.mxu3 %vm1624_vm4, %v6858_v4  ;;  %5182 = vmatmul.msk.f32.gmra.mxu1 %vm1624_vm4, %v6858_v4 }
 0x4ef   : > { %v1897_v29 = vpop.f32.mrf.mxu2 }
 0x4f0   : > { %v2099_v7 = vmul.f32 %v6469_v6, %v1897_v29 }
 0x4f1   : > { %v2027_v23 = vpop.f32.mrf.mxu0 }
 0x4f2   : > { %v6870_v57 = vsub.f32 %v2099_v7, %v2027_v23 }
 0x4f4   : > { %5106 = vmatmul.msk.f32.gmra.mxu2 %vm1777_vm12, %v1738_v18  ;;  %5136 = vmatmul.msk.f32.gmra.mxu0 %vm1777_vm12, %v1737_v51 }
 0x4f5   : > { %5148 = vmatmul.msk.f32.gmra.mxu3 %vm1624_vm4, %v6870_v57  ;;  %5183 = vmatmul.msk.f32.gmra.mxu1 %vm1624_vm4, %v6870_v57 }
 0x4f7   : > { %v1900_v25 = vpop.f32.mrf.mxu2 }
 0x4f8   : > { %v2100_v6 = vmul.f32 %v6462_v0, %v1900_v25 }
 0x4f9   : > { %v2030_v35 = vpop.f32.mrf.mxu0 }
 0x4fa   : > { %v6882_v41 = vsub.f32 %v2100_v6, %v2030_v35 }
 0x4fc   : > { %5107 = vmatmul.msk.f32.gmra.mxu2 %vm1777_vm12, %v1739_v36  ;;  %5137 = vmatmul.msk.f32.gmra.mxu0 %vm1777_vm12, %v1738_v18 }
 0x4fd   : > { %5149 = vmatmul.msk.f32.gmra.mxu3 %vm1624_vm4, %v6882_v41  ;;  %5184 = vmatmul.msk.f32.gmra.mxu1 %vm1624_vm4, %v6882_v41 }
 0x4ff   : > { %v1903_v43 = vpop.f32.mrf.mxu2 }
 0x500   : > { %v2101_v0 = vmul.f32 %v6455_v3, %v1903_v43 }
 0x501   : > { %v2033_v49 = vpop.f32.mrf.mxu0 }
 0x502   : > { %v6894_v60 = vsub.f32 %v2101_v0, %v2033_v49 }
 0x504   : > { %5108 = vmatmul.msk.f32.gmra.mxu2 %vm1777_vm12, %v1740_v54  ;;  %5138 = vmatmul.msk.f32.gmra.mxu0 %vm1777_vm12, %v1739_v36 }
 0x505   : > { %5150 = vmatmul.msk.f32.gmra.mxu3 %vm1624_vm4, %v6894_v60  ;;  %5185 = vmatmul.msk.f32.gmra.mxu1 %vm1624_vm4, %v6894_v60 }
 0x507   : > { %v1906_v55 = vpop.f32.mrf.mxu2 }
 0x508   : > { %v2102_v3 = vmul.f32 %v6451_v62, %v1906_v55 }
 0x509   : > { %v2036_v26 = vpop.f32.mrf.mxu0 }
 0x50a   : > { %v6906_v58 = vsub.f32 %v2102_v3, %v2036_v26 }
 0x50c   : > { %5109 = vmatmul.msk.f32.gmra.mxu2 %vm1777_vm12, %v1741_v33  ;;  %5139 = vmatmul.msk.f32.gmra.mxu0 %vm1777_vm12, %v1740_v54 }
 0x50d   : > { %5151 = vmatmul.msk.f32.gmra.mxu3 %vm1624_vm4, %v6906_v58  ;;  %5186 = vmatmul.msk.f32.gmra.mxu1 %vm1624_vm4, %v6906_v58 }
 0x50f   : > { %v1909_v59 = vpop.f32.mrf.mxu2 }
 0x510   : > { %v2103_v62 = vmul.f32 %v6443_v46, %v1909_v59 }
 0x511   : > { %v2039_v14 = vpop.f32.mrf.mxu0 }
 0x512   : > { %v6918_v34 = vsub.f32 %v2103_v62, %v2039_v14 }
 0x514   : > { %5110 = vmatmul.msk.f32.gmra.mxu2 %vm1777_vm12, %v1742_v8  ;;  %5140 = vmatmul.msk.f32.gmra.mxu0 %vm1777_vm12, %v1741_v33 }
 0x515   : > { %5152 = vmatmul.msk.f32.gmra.mxu3 %vm1624_vm4, %v6918_v34  ;;  %5187 = vmatmul.msk.f32.gmra.mxu1 %vm1624_vm4, %v6918_v34 }
 0x517   : > { %v1912_v15 = vpop.f32.mrf.mxu2 }
 0x518   : > { %v2104_v46 = vmul.f32 %v6437_v52, %v1912_v15 }
 0x519   : > { %v2042_v5 = vpop.f32.mrf.mxu0 }
 0x51a   : > { %v6927_v22 = vsub.f32 %v2104_v46, %v2042_v5 }
 0x51c   : > { %5141 = vmatmul.msk.f32.gmra.mxu0 %vm1777_vm12, %v1742_v8 }
 0x51d   : > { %5153 = vmatmul.msk.f32.gmra.mxu3 %vm1624_vm4, %v6927_v22  ;;  %5188 = vmatmul.msk.f32.gmra.mxu1 %vm1624_vm4, %v6927_v22 }
 0x51f   : > { %v1915_v16 = vpop.f32.mrf.mxu2 }
 0x520   : > { %v2105_v47 = vmul.f32 %v6429_v45, %v1915_v16 }
 0x521   : > { %v2045_v48 = vpop.f32.mrf.mxu0 }
 0x522   : > { %v6935_v1 = vsub.f32 %v2105_v47, %v2045_v48 }
 0x525   : > { %5154 = vmatmul.msk.f32.gmra.mxu3 %vm1624_vm4, %v6935_v1  ;;  %5189 = vmatmul.msk.f32.gmra.mxu1 %vm1624_vm4, %v6935_v1 }
 0x527   : > { %v1918_v52 = vpop.f32.mrf.mxu2 }
 0x528   : > { %v2106_v30 = vmul.f32 %v6424_v39, %v1918_v52 }
 0x529   : > { %v2048_v42 = vpop.f32.mrf.mxu0 }
 0x52a   : > { %v6942_v19 = vsub.f32 %v2106_v30, %v2048_v42 }
 0x52d   : > { %5155 = vmatmul.msk.f32.gmra.mxu3 %vm1624_vm4, %v6942_v19  ;;  %5190 = vmatmul.msk.f32.gmra.mxu1 %vm1624_vm4, %v6942_v19 }
 0x52f   : > { %v1921_v45 = vpop.f32.mrf.mxu2 }
 0x530   : > { %v2107_v56 = vmul.f32 %v6419_v38, %v1921_v45 }
 0x531   : > { %v2051_v20 = vpop.f32.mrf.mxu0 }
 0x532   : > { %v6949_v10 = vsub.f32 %v2107_v56, %v2051_v20 }
 0x535   : > { %5156 = vmatmul.msk.f32.gmra.mxu3 %vm1624_vm4, %v6949_v10  ;;  %5191 = vmatmul.msk.f32.gmra.mxu1 %vm1624_vm4, %v6949_v10 }
 0x537   : > { %v1924_v39 = vpop.f32.mrf.mxu2 }
 0x538   : > { %v2108_v40 = vmul.f32 %v6410_v50, %v1924_v39 }
 0x539   : > { %v2054_v51 = vpop.f32.mrf.mxu0 }
 0x53a   : > { %v6956_v29 = vsub.f32 %v2108_v40, %v2054_v51 }
 0x53d   : > { %5157 = vmatmul.msk.f32.gmra.mxu3 %vm1624_vm4, %v6956_v29  ;;  %5192 = vmatmul.msk.f32.gmra.mxu1 %vm1624_vm4, %v6956_v29 }
 0x53f   : > { %v1927_v38 = vpop.f32.mrf.mxu2 }
 0x540   : > { %v2109_v7 = vmul.f32 %v6560_v13, %v1927_v38 }
 0x541   : > { %v2057_v23 = vpop.f32.mrf.mxu0 }
 0x542   : > { %v6963_v18 = vsub.f32 %v2109_v7, %v2057_v23  ;;  %v6965_v25 = vpop.f32.mrf.mxu1 }
 0x545   : > { %5158 = vmatmul.msk.f32.gmra.mxu3 %vm1624_vm4, %v6963_v18  ;;  %5193 = vmatmul.msk.f32.gmra.mxu1 %vm1624_vm4, %v6963_v18 }
 0x547   : > { %v1930_v50 = vpop.f32.mrf.mxu2 }
 0x548   : > { %v2110_v6 = vmul.f32 %v6552_v28, %v1930_v50  ;;  %v6972_v35 = vpop.f32.mrf.mxu3 }
 0x549   : > { %v2060_v36 = vpop.f32.mrf.mxu0 }
 0x54a   : > { %v6974_v43 = vsub.f32 %v2110_v6, %v2060_v36  ;;  %v6976_v13 = vpop.f32.mrf.mxu1 }
 0x54d   : > { %5159 = vmatmul.msk.f32.gmra.mxu3 %vm1624_vm4, %v6974_v43  ;;  %5194 = vmatmul.msk.f32.gmra.mxu1 %vm1624_vm4, %v6974_v43 }
 0x54f   : > { %v1933_v0 = vpop.f32.mrf.mxu2 }
 0x550   : > { %v2111_v49 = vmul.f32 %v6549_v21, %v1933_v0  ;;  %v6983_v54 = vpop.f32.mrf.mxu3 }
 0x551   : > { %v2063_v55 = vpop.f32.mrf.mxu0 }
 0x552   : > { %v6985_v28 = vsub.f32 %v2111_v49, %v2063_v55  ;;  %v6987_v3 = vpop.f32.mrf.mxu1 }
 0x555   : > { %5160 = vmatmul.msk.f32.gmra.mxu3 %vm1624_vm4, %v6985_v28  ;;  %5195 = vmatmul.msk.f32.gmra.mxu1 %vm1624_vm4, %v6985_v28 }
 0x557   : > { %v1936_v26 = vpop.f32.mrf.mxu2 }
 0x558   : > { %v2112_v33 = vmul.f32 %v6546_v12, %v1936_v26  ;;  %v6994_v59 = vpop.f32.mrf.mxu3 }
 0x559   : > { %v2066_v62 = vpop.f32.mrf.mxu0 }
 0x55a   : > { %v6996_v21 = vsub.f32 %v2112_v33, %v2066_v62  ;;  %v6998_v14 = vpop.f32.mrf.mxu1 }
 0x55d   : > { %5161 = vmatmul.msk.f32.gmra.mxu3 %vm1624_vm4, %v6996_v21  ;;  %5196 = vmatmul.msk.f32.gmra.mxu1 %vm1624_vm4, %v6996_v21 }
 0x55f   : > { %v1939_v8 = vpop.f32.mrf.mxu2 }
 0x560   : > { %v2113_v15 = vmul.f32 %v6543_v11, %v1939_v8  ;;  %v7005_v46 = vpop.f32.mrf.mxu3 }
 0x561   : > { %v2069_v5 = vpop.f32.mrf.mxu0 }
 0x562   : > { %v7007_v12 = vsub.f32 %v2113_v15, %v2069_v5  ;;  %v7009_v16 = vpop.f32.mrf.mxu1 }
 0x565   : > { %5162 = vmatmul.msk.f32.gmra.mxu3 %vm1624_vm4, %v7007_v12  ;;  %5197 = vmatmul.msk.f32.gmra.mxu1 %vm1624_vm4, %v7007_v12 }
 0x567   : > { %v1942_v47 = vpop.f32.mrf.mxu2 }
 0x568   : > { %v2114_v48 = vmul.f32 %v6539_v17, %v1942_v47  ;;  %v7016_v52 = vpop.f32.mrf.mxu3 }
 0x569   : > { %v2072_v30 = vpop.f32.mrf.mxu0 }
 0x56a   : > { %v7018_v11 = vsub.f32 %v2114_v48, %v2072_v30  ;;  %v7020_v42 = vpop.f32.mrf.mxu1 }
 0x56d   : > { %5163 = vmatmul.msk.f32.gmra.mxu3 %vm1624_vm4, %v7018_v11  ;;  %5198 = vmatmul.msk.f32.gmra.mxu1 %vm1624_vm4, %v7018_v11 }
 0x56f   : > { %v1945_v45 = vpop.f32.mrf.mxu2 }
 0x570   : > { %v2115_v56 = vmul.f32 %v6535_v31, %v1945_v45  ;;  %v7027_v20 = vpop.f32.mrf.mxu3 }
 0x571   : > { %v2075_v39 = vpop.f32.mrf.mxu0 }
 0x572   : > { %v7029_v17 = vsub.f32 %v2115_v56, %v2075_v39  ;;  %v7031_v40 = vpop.f32.mrf.mxu1 }
 0x575   : > { %5164 = vmatmul.msk.f32.gmra.mxu3 %vm1624_vm4, %v7029_v17  ;;  %5199 = vmatmul.msk.f32.gmra.mxu1 %vm1624_vm4, %v7029_v17 }
 0x577   : > { %v1948_v51 = vpop.f32.mrf.mxu2 }
 0x578   : > { %v2116_v38 = vmul.f32 %v6529_v32, %v1948_v51  ;;  %v7038_v7 = vpop.f32.mrf.mxu3 }
 0x579   : > { %v2078_v23 = vpop.f32.mrf.mxu0 }
 0x57a   : > { %v7040_v31 = vsub.f32 %v2116_v38, %v2078_v23  ;;  %v2415_v50 = vpop.f32.mrf.mxu1 }
 0x57d   : > { %5165 = vmatmul.msk.f32.gmra.mxu3 %vm1624_vm4, %v7040_v31  ;;  %5200 = vmatmul.msk.f32.gmra.mxu1 %vm1624_vm4, %v7040_v31 }
 0x57f   : > { %v1951_v6 = vpop.f32.mrf.mxu2 }
 0x580   : > { %v2117_v36 = vmul.f32 %v6523_v9, %v1951_v6  ;;  %v2278_v0 = vpop.f32.mrf.mxu3 }
 0x581   : > { %v2081_v49 = vpop.f32.mrf.mxu0 }
 0x582   : > { %v7047_v55 = vsub.f32 %v2117_v36, %v2081_v49  ;;  %v2418_v32 = vpop.f32.mrf.mxu1 }
 0x585   : > { %5166 = vmatmul.msk.f32.gmra.mxu3 %vm1624_vm4, %v7047_v55  ;;  %5201 = vmatmul.msk.f32.gmra.mxu1 %vm1624_vm4, %v7047_v55 }
 0x587   : > { %v1954_v26 = vpop.f32.mrf.mxu2 }
 0x588   : > { %v2118_v33 = vmul.f32 %v6518_v53, %v1954_v26  ;;  %v2281_v62 = vpop.f32.mrf.mxu3 }
 0x589   : > { %v2084_v8 = vpop.f32.mrf.mxu0 }
 0x58a   : > { %v7054_v15 = vsub.f32 %v2118_v33, %v2084_v8  ;;  %v2421_v5 = vpop.f32.mrf.mxu1 }
 0x58d   : > { %5167 = vmatmul.msk.f32.gmra.mxu3 %vm1624_vm4, %v7054_v15  ;;  %5202 = vmatmul.msk.f32.gmra.mxu1 %vm1624_vm4, %v7054_v15 }
 0x58f   : > { %v1957_v9 = vpop.f32.mrf.mxu2 }
 0x590   : > { %v2119_v47 = vmul.f32 %v6513_v37, %v1957_v9  ;;  %v2284_v48 = vpop.f32.mrf.mxu3 }
 0x591   : > { %v2087_v30 = vpop.f32.mrf.mxu0 }
 0x592   : > { %v7061_v45 = vsub.f32 %v2119_v47, %v2087_v30  ;;  %v2424_v56 = vpop.f32.mrf.mxu1 }
 0x595   : > { %5168 = vmatmul.msk.f32.gmra.mxu3 %vm1624_vm4, %v7061_v45  ;;  %5203 = vmatmul.msk.f32.gmra.mxu1 %vm1624_vm4, %v7061_v45 }
 0x597   : > { %v1960_v53 = vpop.f32.mrf.mxu2 }
 0x598   : > { %v2120_v39 = vmul.f32 %v6508_v61, %v1960_v53  ;;  %v2287_v51 = vpop.f32.mrf.mxu3 }
 0x599   : > { %v2090_v38 = vpop.f32.mrf.mxu0 }
 0x59a   : > { %v7068_v23 = vsub.f32 %v2120_v39, %v2090_v38  ;;  %v2427_v6 = vpop.f32.mrf.mxu1 }
 0x59d   : > { %5169 = vmatmul.msk.f32.gmra.mxu3 %vm1624_vm4, %v7068_v23  ;;  %5204 = vmatmul.msk.f32.gmra.mxu1 %vm1624_vm4, %v7068_v23 }
 0x5a0   : > { %v2290_v37 = vpop.f32.mrf.mxu3 }
 0x5a2   : > { %v2430_v36 = vpop.f32.mrf.mxu1 }
 0x5a8   : > { %v2293_v49 = vpop.f32.mrf.mxu3 }
 0x5aa   : > { %v2433_v26 = vpop.f32.mrf.mxu1 }
 0x5b0   : > { %v2296_v33 = vpop.f32.mrf.mxu3 }
 0x5b2   : > { %v2436_v8 = vpop.f32.mrf.mxu1 }
 0x5b8   : > { %v2299_v9 = vpop.f32.mrf.mxu3 }
 0x5ba   : > { %v2439_v47 = vpop.f32.mrf.mxu1 }
 0x5bb   : > { %2549 = vmatpush.msra.mxu2 %v2439_v47  ;;  %v5267_v47 = vld [vmem:[%s8571_s26 + $0xa0] sm:$0xff] }
 0x5bd   : > { %2550 = vmatpush.msra.mxu2 %v2436_v8 }
 0x5bf   : > { %2551 = vmatpush.msra.mxu2 %v2433_v26  ;;  %v2343_v26 = vld [vmem:[%s8572_s25 + $0x10] sm:$0xff] }
 0x5c0   : > { %v2302_v61 = vpop.f32.mrf.mxu3 }
 0x5c1   : > { %2552 = vmatpush.msra.mxu2 %v2430_v36  ;;  %2709 = vmatpush.msrb.mxu3 %v2302_v61  ;;  %v5266_v61 = vld [vmem:[%s8571_s26 + $0x98] sm:$0xff] }
 0x5c2   : > { %v7074_v30 = vpop.f32.mrf.mxu1 }
 0x5c3   : > { %2553 = vmatpush.msra.mxu2 %v2427_v6  ;;  %2710 = vmatpush.msrb.mxu3 %v2299_v9  ;;  %v2341_v6 = vld [vmem:[%s8572_s25] sm:$0xff] }
 0x5c5   : > { %2554 = vmatpush.msra.mxu2 %v2424_v56  ;;  %2711 = vmatpush.msrb.mxu3 %v2296_v33  ;;  %v5221_v33 = vld [vmem:[%s8572_s25 + $0x160] sm:$0xff] }
 0x5c7   : > { %2555 = vmatpush.msra.mxu2 %v2421_v5  ;;  %2712 = vmatpush.msrb.mxu3 %v2293_v49 }
 0x5c8   : > { %v7076_v53 = vpop.f32.mrf.mxu3 }
 0x5c9   : > { %2556 = vmatpush.msra.mxu2 %v2418_v32  ;;  %2713 = vmatpush.msrb.mxu3 %v2290_v37  ;;  %v5219_v37 = vld [vmem:[%s8572_s25 + $0x150] sm:$0xff] }
 0x5ca   : > { %v7078_v39 = vpop.f32.mrf.mxu1 }
 0x5cb   : > { %2557 = vmatpush.msra.mxu2 %v2415_v50  ;;  %2714 = vmatpush.msrb.mxu3 %v2287_v51 }
 0x5cd   : > { %2558 = vmatpush.msra.mxu2 %v7031_v40  ;;  %2715 = vmatpush.msrb.mxu3 %v2284_v48  ;;  %v5213_v40 = vld [vmem:[%s8572_s25 + $0x120] sm:$0xff] }
 0x5ce   : > { %v5217_v48 = vld [vmem:[%s8572_s25 + $0x140] sm:$0xff] }
 0x5cf   : > { %2559 = vmatpush.msra.mxu2 %v7020_v42  ;;  %2716 = vmatpush.msrb.mxu3 %v2281_v62  ;;  %v5205_v42 = vld [vmem:[%s8572_s25 + $0xe0] sm:$0xff] }
 0x5d0   : > { %v7082_v38 = vpop.f32.mrf.mxu3 }
 0x5d1   : > { %2560 = vmatpush.msra.mxu2 %v7009_v16  ;;  %2717 = vmatpush.msrb.mxu3 %v2278_v0  ;;  %v5215_v0 = vld [vmem:[%s8572_s25 + $0x130] sm:$0xff] }
 0x5d2   : > { %v7085_v5 = vpop.f32.mrf.mxu1 }
 0x5d3   : > { %2561 = vmatpush.msra.mxu2 %v6998_v14  ;;  %2718 = vmatpush.msrb.mxu3 %v7038_v7 }
 0x5d5   : > { %2562 = vmatpush.msra.mxu2 %v6987_v3  ;;  %2719 = vmatpush.msrb.mxu3 %v7027_v20 }
 0x5d7   : > { %2563 = vmatpush.msra.mxu2 %v6976_v13  ;;  %2720 = vmatpush.msrb.mxu3 %v7016_v52  ;;  %v5207_v13 = vld [vmem:[%s8572_s25 + $0xf0] sm:$0xff] }
 0x5d8   : > { %v7096_v16 = vpop.f32.mrf.mxu3 }
 0x5d9   : > { %2564 = vmatpush.msra.mxu2 %v6965_v25  ;;  %2721 = vmatpush.msrb.mxu3 %v7005_v46  ;;  %v5209_v25 = vld [vmem:[%s8572_s25 + $0x100] sm:$0xff] }
 0x5da   : > { %v7100_v14 = vpop.f32.mrf.mxu1  ;;  %2565 = vmatmul.f32.vlgmr.msra.gmra.mxu2 %v5205_v42  ;;  %v5265_v42 = vld [vmem:[%s8571_s26 + $0x90] sm:$0xff] }
 0x5db   : > { %2722 = vmatpush.msrb.mxu3 %v6994_v59  ;;  %2844 = vmatpush.msrb.mxu2 %v5267_v47  ;;  %v5220_v47 = vld [vmem:[%s8572_s25 + $0x158] sm:$0xff] }
 0x5dd   : > { %2723 = vmatpush.msrb.mxu3 %v6983_v54  ;;  %2845 = vmatpush.msrb.mxu2 %v5266_v61  ;;  %v2356_v61 = vld [vmem:[%s8572_s25 + $0x78] sm:$0xff] }
 0x5df   : > { %2724 = vmatpush.msrb.mxu3 %v6972_v35  ;;  %v5211_v35 = vld [vmem:[%s8572_s25 + $0x110] sm:$0xff]  ;;  %2846 = vmatpush.msrb.mxu2 %v5265_v42  ;;  %v2365_v42 = vld [vmem:[%s8572_s25 + $0xc0] sm:$0xff] }
 0x5e0   : > { %v7108_v3 = vpop.f32.mrf.mxu3  ;;  %2725 = vmatmul.f32.vlgmr.msrb.gmra.mxu3 %v2341_v6  ;;  %v5214_v6 = vld [vmem:[%s8572_s25 + $0x128] sm:$0xff] }
 0x5e2   : > { %v7110_v52 = vpop.f32.mrf.mxu1  ;;  %2568 = vmatmul.f32.gmra.mxu2 %v5207_v13  ;;  %v2345_v13 = vld [vmem:[%s8572_s25 + $0x20] sm:$0xff] }
 0x5e8   : > { %v7115_v46 = vpop.f32.mrf.mxu3  ;;  %2728 = vmatmul.f32.gmra.mxu3 %v2343_v26  ;;  %v2361_v26 = vld [vmem:[%s8572_s25 + $0xa0] sm:$0xff] }
 0x5ea   : > { %v2457_v59 = vpop.f32.mrf.mxu1  ;;  %2571 = vmatmul.f32.gmra.mxu2 %v5209_v25  ;;  %v5223_v25 = vld [vmem:[%s8572_s25 + $0x170] sm:$0xff] }
 0x5f0   : > { %v7120_v54 = vpop.f32.mrf.mxu3  ;;  %2731 = vmatmul.f32.gmra.mxu3 %v2345_v13  ;;  %v5222_v13 = vld [vmem:[%s8572_s25 + $0x168] sm:$0xff] }
 0x5f2   : > { %v2460_v20 = vpop.f32.mrf.mxu1  ;;  %2574 = vmatmul.f32.gmra.mxu2 %v5211_v35 }
 0x5f8   : > { %v2323_v7 = vpop.f32.mrf.mxu3 }
 0x5fa   : > { %v2463_v50 = vpop.f32.mrf.mxu1  ;;  %2577 = vmatmul.f32.gmra.mxu2 %v5213_v40  ;;  %v5264_v40 = vld [vmem:[%s8571_s26 + $0x88] sm:$0xff] }
 0x5fb   : > { %2847 = vmatpush.msrb.mxu2 %v5264_v40  ;;  %v5224_v40 = vld [vmem:[%s8572_s25 + $0x178] sm:$0xff] }
 0x600   : > { %v2326_v32 = vpop.f32.mrf.mxu3 }
 0x602   : > { %v2466_v62 = vpop.f32.mrf.mxu1  ;;  %2580 = vmatmul.f32.gmra.mxu2 %v5215_v0  ;;  %v5263_v0 = vld [vmem:[%s8571_s26 + $0x80] sm:$0xff] }
 0x603   : > { %2848 = vmatpush.msrb.mxu2 %v5263_v0  ;;  %v2360_v0 = vld [vmem:[%s8572_s25 + $0x98] sm:$0xff] }
 0x608   : > { %v2329_v56 = vpop.f32.mrf.mxu3 }
 0x60a   : > { %v2469_v51 = vpop.f32.mrf.mxu1  ;;  %2583 = vmatmul.f32.gmra.mxu2 %v5217_v48  ;;  %v5262_v48 = vld [vmem:[%s8571_s26 + $0x78] sm:$0xff] }
 0x60b   : > { %2849 = vmatpush.msrb.mxu2 %v5262_v48  ;;  %v5226_v48 = vld [vmem:[%s8572_s25 + $0x188] sm:$0xff] }
 0x610   : > { %v2332_v36 = vpop.f32.mrf.mxu3 }
 0x612   : > { %v2472_v49 = vpop.f32.mrf.mxu1  ;;  %2586 = vmatmul.f32.gmra.mxu2 %v5219_v37  ;;  %v2359_v37 = vld [vmem:[%s8572_s25 + $0x90] sm:$0xff] }
 0x618   : > { %v2335_v8 = vpop.f32.mrf.mxu3 }
 0x61a   : > { %v2475_v9 = vpop.f32.mrf.mxu1  ;;  %2589 = vmatmul.f32.gmra.mxu2 %v5221_v33  ;;  %v5218_v33 = vld [vmem:[%s8572_s25 + $0x148] sm:$0xff] }
 0x61b   : > { %2612 = vmatpush.msra.mxu0 %v2475_v9  ;;  %v2363_v9 = vld [vmem:[%s8572_s25 + $0xb0] sm:$0xff] }
 0x61d   : > { %2613 = vmatpush.msra.mxu0 %v2472_v49  ;;  %v2352_v49 = vld [vmem:[%s8572_s25 + $0x58] sm:$0xff] }
 0x61f   : > { %2614 = vmatpush.msra.mxu0 %v2469_v51  ;;  %v2357_v51 = vld [vmem:[%s8572_s25 + $0x80] sm:$0xff] }
 0x620   : > { %v2338_v35 = vpop.f32.mrf.mxu3 }
 0x621   : > { %2615 = vmatpush.msra.mxu0 %v2466_v62  ;;  %2772 = vmatpush.msra.mxu1 %v2338_v35  ;;  %v2347_v62 = vld [vmem:[%s8572_s25 + $0x30] sm:$0xff] }
 0x622   : > { %2592 = vmatmul.f32.gmra.mxu2 %v5223_v25  ;;  %2734 = vmatmul.f32.gmra.mxu3 %v2347_v62  ;;  %v2358_v25 = vld [vmem:[%s8572_s25 + $0x88] sm:$0xff]  ;;  %v2367_v35 = vld [vmem:[%s8572_s25 + $0xd0] sm:$0xff] }
 0x623   : > { %2616 = vmatpush.msra.mxu0 %v2463_v50  ;;  %2773 = vmatpush.msra.mxu1 %v2335_v8  ;;  %v5225_v50 = vld [vmem:[%s8572_s25 + $0x180] sm:$0xff]  ;;  %v2354_v8 = vld [vmem:[%s8572_s25 + $0x68] sm:$0xff] }
 0x624   : > { %v2362_v62 = vld [vmem:[%s8572_s25 + $0xa8] sm:$0xff] }
 0x625   : > { %2617 = vmatpush.msra.mxu0 %v2460_v20  ;;  %2774 = vmatpush.msra.mxu1 %v2332_v36  ;;  %v5261_v20 = vld [vmem:[%s8571_s26 + $0x70] sm:$0xff]  ;;  %v5216_v36 = vld [vmem:[%s8572_s25 + $0x138] sm:$0xff] }
 0x626   : > { %2850 = vmatpush.msrb.mxu2 %v5261_v20  ;;  %v2364_v20 = vld [vmem:[%s8572_s25 + $0xb8] sm:$0xff] }
 0x627   : > { %2618 = vmatpush.msra.mxu0 %v2457_v59  ;;  %2775 = vmatpush.msra.mxu1 %v2329_v56  ;;  %v2349_v59 = vld [vmem:[%s8572_s25 + $0x40] sm:$0xff]  ;;  %v2348_v56 = vld [vmem:[%s8572_s25 + $0x38] sm:$0xff] }
 0x629   : > { %2619 = vmatpush.msra.mxu0 %v7110_v52  ;;  %2776 = vmatpush.msra.mxu1 %v2326_v32  ;;  %v5227_v52 = vld [vmem:[%s8572_s25 + $0x190] sm:$0xff]  ;;  %v5212_v32 = vld [vmem:[%s8572_s25 + $0x118] sm:$0xff] }
 0x62a   : > { %2595 = vmatmul.f32.gmra.mxu2 %v5225_v50  ;;  %2737 = vmatmul.f32.gmra.mxu3 %v2349_v59  ;;  %v5228_v50 = vld [vmem:[%s8572_s25 + $0x198] sm:$0xff]  ;;  %v5230_v59 = vld [vmem:[%s8572_s25 + $0x1a8] sm:$0xff] }
 0x62b   : > { %2620 = vmatpush.msra.mxu0 %v7100_v14  ;;  %2777 = vmatpush.msra.mxu1 %v2323_v7  ;;  %v5206_v14 = vld [vmem:[%s8572_s25 + $0xe8] sm:$0xff]  ;;  %v2355_v7 = vld [vmem:[%s8572_s25 + $0x70] sm:$0xff] }
 0x62d   : > { %2621 = vmatpush.msra.mxu0 %v7085_v5  ;;  %2778 = vmatpush.msra.mxu1 %v7120_v54  ;;  %v2351_v5 = vld [vmem:[%s8572_s25 + $0x50] sm:$0xff]  ;;  %v2346_v54 = vld [vmem:[%s8572_s25 + $0x28] sm:$0xff] }
 0x62f   : > { %2622 = vmatpush.msra.mxu0 %v7078_v39  ;;  %2779 = vmatpush.msra.mxu1 %v7115_v46  ;;  %v2342_v39 = vld [vmem:[%s8572_s25 + $0x8] sm:$0xff] }
 0x630   : > { %v5210_v46 = vld [vmem:[%s8572_s25 + $0x108] sm:$0xff] }
 0x631   : > { %2623 = vmatpush.msra.mxu0 %v7074_v30  ;;  %2780 = vmatpush.msra.mxu1 %v7108_v3  ;;  %v5229_v30 = vld [vmem:[%s8572_s25 + $0x1a0] sm:$0xff]  ;;  %v5231_v3 = vld [vmem:[%s8572_s25 + $0x1b0] sm:$0xff] }
 0x632   : > { %2598 = vmatmul.f32.gmra.mxu2 %v5227_v52  ;;  %5233 = vmatmul.msk.f32.vlgmr.msra.gmra.mxu0 %vm1490_vm3, %v5206_v14  ;;  %v2366_v52 = vld [vmem:[%s8572_s25 + $0xc8] sm:$0xff]  ;;  %v5232_v14 = vld [vmem:[%s8572_s25 + $0x1b8] sm:$0xff] }
 0x633   : > { %2781 = vmatpush.msra.mxu1 %v7096_v16  ;;  %2740 = vmatmul.f32.gmra.mxu3 %v2351_v5  ;;  %v5208_v16 = vld [vmem:[%s8572_s25 + $0xf8] sm:$0xff] }
 0x635   : > { %2782 = vmatpush.msra.mxu1 %v7082_v38  ;;  %v2344_v38 = vld [vmem:[%s8572_s25 + $0x18] sm:$0xff] }
 0x637   : > { %2783 = vmatpush.msra.mxu1 %v7076_v53  ;;  %v2353_v53 = vld [vmem:[%s8572_s25 + $0x60] sm:$0xff] }
 0x638   : > { %5247 = vmatmul.msk.f32.vlgmr.msra.gmra.mxu1 %vm1490_vm3, %v2342_v39  ;;  %v2368_v39 = vld [vmem:[%s8572_s25 + $0xd8] sm:$0xff] }
 0x63a   : > { %2601 = vmatmul.f32.gmra.mxu2 %v5229_v30  ;;  %5234 = vmatmul.msk.f32.gmra.mxu0 %vm1490_vm3, %v5208_v16 }
 0x63b   : > { %2743 = vmatmul.f32.gmra.mxu3 %v2353_v53 }
 0x640   : > { %5248 = vmatmul.msk.f32.gmra.mxu1 %vm1490_vm3, %v2344_v38 }
 0x642   : > { %2604 = vmatmul.f32.gmra.mxu2 %v5231_v3  ;;  %5235 = vmatmul.msk.f32.gmra.mxu0 %vm1490_vm3, %v5210_v46 }
 0x643   : > { %2746 = vmatmul.f32.gmra.mxu3 %v2355_v7 }
 0x648   : > { %5249 = vmatmul.msk.f32.gmra.mxu1 %vm1490_vm3, %v2346_v54 }
 0x64a   : > { %5268 = vmatmul.msk.f32.vlgmr.msrb.gmra.mxu2 %vm1624_vm4, %v6798_v27  ;;  %5236 = vmatmul.msk.f32.gmra.mxu0 %vm1490_vm3, %v5212_v32  ;;  %v2350_v27 = vld [vmem:[%s8572_s25 + $0x48] sm:$0xff] }
 0x64b   : > { %2749 = vmatmul.f32.gmra.mxu3 %v2357_v51 }
 0x650   : > { %5250 = vmatmul.msk.f32.gmra.mxu1 %vm1490_vm3, %v2348_v56 }
 0x652   : > { %5269 = vmatmul.msk.f32.gmra.mxu2 %vm1624_vm4, %v6810_v2  ;;  %5237 = vmatmul.msk.f32.gmra.mxu0 %vm1490_vm3, %v5214_v6 }
 0x653   : > { %2752 = vmatmul.f32.gmra.mxu3 %v2359_v37 }
 0x658   : > { %5251 = vmatmul.msk.f32.gmra.mxu1 %vm1490_vm3, %v2350_v27 }
 0x65a   : > { %5270 = vmatmul.msk.f32.gmra.mxu2 %vm1624_vm4, %v6822_v63  ;;  %5238 = vmatmul.msk.f32.gmra.mxu0 %vm1490_vm3, %v5216_v36  ;;  %v5296_v36 = vld [vmem:[%s8572_s25 + $0x1c0] sm:$0xff] }
 0x65b   : > { %2755 = vmatmul.f32.gmra.mxu3 %v2361_v26 }
 0x65d   : > { %v7264_v2 = vpop.f32.mrf.mxu2 }
 0x65e   : > { %8573 = vst [vmem:[#allocation3_spill] sm:$0xff] %v7264_v2 }
 0x660   : > { %5252 = vmatmul.msk.f32.gmra.mxu1 %vm1490_vm3, %v2352_v49 }
 0x662   : > { %5271 = vmatmul.msk.f32.gmra.mxu2 %vm1624_vm4, %v6834_v44  ;;  %5239 = vmatmul.msk.f32.gmra.mxu0 %vm1490_vm3, %v5218_v33  ;;  %v5298_v33 = vld [vmem:[%s8572_s25 + $0x1d0] sm:$0xff] }
 0x663   : > { %2758 = vmatmul.f32.gmra.mxu3 %v2363_v9 }
 0x665   : > { %v7279_v63 = vpop.f32.mrf.mxu2 }
 0x666   : > { %8574 = vst [vmem:[#allocation4_spill] sm:$0xff] %v7279_v63 }
 0x668   : > { %5253 = vmatmul.msk.f32.gmra.mxu1 %vm1490_vm3, %v2354_v8  ;;  %v5300_v8 = vld [vmem:[%s8572_s25 + $0x1e0] sm:$0xff] }
 0x66a   : > { %5272 = vmatmul.msk.f32.gmra.mxu2 %vm1624_vm4, %v6846_v24  ;;  %5240 = vmatmul.msk.f32.gmra.mxu0 %vm1490_vm3, %v5220_v47  ;;  %v5302_v47 = vld [vmem:[%s8572_s25 + $0x1f0] sm:$0xff] }
 0x66b   : > { %2761 = vmatmul.f32.gmra.mxu3 %v2365_v42 }
 0x66d   : > { %v7294_v44 = vpop.f32.mrf.mxu2 }
 0x66e   : > { %8575 = vst [vmem:[#allocation5_spill] sm:$0xff] %v7294_v44 }
 0x670   : > { %5254 = vmatmul.msk.f32.gmra.mxu1 %vm1490_vm3, %v2356_v61  ;;  %v7440_v61 = vpop.f32.mrf.mxu3 }
 0x671   : > { %8579 = vst [vmem:[#allocation9_spill] sm:$0xff] %v7440_v61 }
 0x672   : > { %5273 = vmatmul.msk.f32.gmra.mxu2 %vm1624_vm4, %v6858_v4  ;;  %5241 = vmatmul.msk.f32.gmra.mxu0 %vm1490_vm3, %v5222_v13  ;;  %v5297_v13 = vld [vmem:[%s8572_s25 + $0x1c8] sm:$0xff] }
 0x673   : > { %2764 = vmatmul.f32.gmra.mxu3 %v2367_v35 }
 0x675   : > { %v7309_v24 = vpop.f32.mrf.mxu2 }
 0x678   : > { %5255 = vmatmul.msk.f32.gmra.mxu1 %vm1490_vm3, %v2358_v25  ;;  %v5304_v25 = vld [vmem:[%s8572_s25 + $0x200] sm:$0xff]  ;;  %v7451_v35 = vpop.f32.mrf.mxu3 }
 0x679   : > { %8580 = vst [vmem:[#allocation10_spill] sm:$0xff] %v7451_v35 }
 0x67a   : > { %5274 = vmatmul.msk.f32.gmra.mxu2 %vm1624_vm4, %v6870_v57  ;;  %5242 = vmatmul.msk.f32.gmra.mxu0 %vm1490_vm3, %v5224_v40 }
 0x67d   : > { %v7324_v4 = vpop.f32.mrf.mxu2 }
 0x680   : > { %5256 = vmatmul.msk.f32.gmra.mxu1 %vm1490_vm3, %v2360_v0  ;;  %v5299_v0 = vld [vmem:[%s8572_s25 + $0x1d8] sm:$0xff] }
 0x682   : > { %5275 = vmatmul.msk.f32.gmra.mxu2 %vm1624_vm4, %v6882_v41  ;;  %5243 = vmatmul.msk.f32.gmra.mxu0 %vm1490_vm3, %v5226_v48  ;;  %v5306_v48 = vld [vmem:[%s8572_s25 + $0x210] sm:$0xff] }
 0x685   : > { %v7336_v57 = vpop.f32.mrf.mxu2 }
 0x688   : > { %5257 = vmatmul.msk.f32.gmra.mxu1 %vm1490_vm3, %v2362_v62  ;;  %v7462_v62 = vpop.f32.mrf.mxu3 }
 0x689   : > { %8581 = vst [vmem:[#allocation11_spill] sm:$0xff] %v7462_v62 }
 0x68a   : > { %5276 = vmatmul.msk.f32.gmra.mxu2 %vm1624_vm4, %v6894_v60  ;;  %5244 = vmatmul.msk.f32.gmra.mxu0 %vm1490_vm3, %v5228_v50  ;;  %v5301_v50 = vld [vmem:[%s8572_s25 + $0x1e8] sm:$0xff] }
 0x68d   : > { %v7348_v41 = vpop.f32.mrf.mxu2 }
 0x690   : > { %5258 = vmatmul.msk.f32.gmra.mxu1 %vm1490_vm3, %v2364_v20 }
 0x692   : > { %5277 = vmatmul.msk.f32.gmra.mxu2 %vm1624_vm4, %v6906_v58  ;;  %5245 = vmatmul.msk.f32.gmra.mxu0 %vm1490_vm3, %v5230_v59  ;;  %v5308_v59 = vld [vmem:[%s8572_s25 + $0x220] sm:$0xff] }
 0x695   : > { %v7360_v60 = vpop.f32.mrf.mxu2 }
 0x698   : > { %5259 = vmatmul.msk.f32.gmra.mxu1 %vm1490_vm3, %v2366_v52  ;;  %v5303_v52 = vld [vmem:[%s8572_s25 + $0x1f8] sm:$0xff] }
 0x69a   : > { %5278 = vmatmul.msk.f32.gmra.mxu2 %vm1624_vm4, %v6918_v34  ;;  %5246 = vmatmul.msk.f32.gmra.mxu0 %vm1490_vm3, %v5232_v14 }
 0x69d   : > { %v7372_v58 = vpop.f32.mrf.mxu2 }
 0x6a0   : > { %5260 = vmatmul.msk.f32.gmra.mxu1 %vm1490_vm3, %v2368_v39  ;;  %v5310_v39 = vld [vmem:[%s8572_s25 + $0x230] sm:$0xff] }
 0x6a2   : > { %5279 = vmatmul.msk.f32.gmra.mxu2 %vm1624_vm4, %v6927_v22 }
 0x6a5   : > { %v7380_v5 = vpop.f32.mrf.mxu2  ;;  %v7476_v14 = vpop.f32.mrf.mxu3 }
 0x6a6   : > { %8582 = vst [vmem:[#allocation12_spill] sm:$0xff] %v7476_v14 }
 0x6aa   : > { %5280 = vmatmul.msk.f32.gmra.mxu2 %vm1624_vm4, %v6935_v1 }
 0x6ad   : > { %v7384_v30 = vpop.f32.mrf.mxu2 }
 0x6af   : > { %v7422_v27 = vpop.f32.mrf.mxu0 }
 0x6b0   : > { %8576 = vst [vmem:[#allocation6_spill] sm:$0xff] %v7422_v27 }
 0x6b2   : > { %5281 = vmatmul.msk.f32.gmra.mxu2 %vm1624_vm4, %v6942_v19 }
 0x6b5   : > { %v7388_v34 = vpop.f32.mrf.mxu2 }
 0x6b7   : > { %v7427_v49 = vpop.f32.mrf.mxu0 }
 0x6b8   : > { %8577 = vst [vmem:[#allocation7_spill] sm:$0xff] %v7427_v49 }
 0x6ba   : > { %5282 = vmatmul.msk.f32.gmra.mxu2 %vm1624_vm4, %v6949_v10 }
 0x6bd   : > { %v7392_v16 = vpop.f32.mrf.mxu2 }
 0x6bf   : > { %v7435_v9 = vpop.f32.mrf.mxu0 }
 0x6c0   : > { %8578 = vst [vmem:[#allocation8_spill] sm:$0xff] %v7435_v9 }
 0x6c2   : > { %5283 = vmatmul.msk.f32.gmra.mxu2 %vm1624_vm4, %v6956_v29 }
 0x6c5   : > { %v7396_v22 = vpop.f32.mrf.mxu2 }
 0x6c7   : > { %v7442_v42 = vpop.f32.mrf.mxu0 }
 0x6ca   : > { %5284 = vmatmul.msk.f32.gmra.mxu2 %vm1624_vm4, %v6963_v18 }
 0x6cd   : > { %v2852_v1 = vpop.f32.mrf.mxu2 }
 0x6cf   : > { %v7453_v40 = vpop.f32.mrf.mxu0 }
 0x6d2   : > { %5285 = vmatmul.msk.f32.gmra.mxu2 %vm1624_vm4, %v6974_v43 }
 0x6d5   : > { %v2855_v19 = vpop.f32.mrf.mxu2 }
 0x6d7   : > { %v7467_v20 = vpop.f32.mrf.mxu0 }
 0x6da   : > { %5286 = vmatmul.msk.f32.gmra.mxu2 %vm1624_vm4, %v6985_v28 }
 0x6dd   : > { %v2858_v38 = vpop.f32.mrf.mxu2 }
 0x6e2   : > { %5287 = vmatmul.msk.f32.gmra.mxu2 %vm1624_vm4, %v6996_v21 }
 0x6e5   : > { %v2861_v10 = vpop.f32.mrf.mxu2 }
 0x6ea   : > { %5288 = vmatmul.msk.f32.gmra.mxu2 %vm1624_vm4, %v7007_v12 }
 0x6ed   : > { %v2864_v29 = vpop.f32.mrf.mxu2 }
 0x6f2   : > { %5289 = vmatmul.msk.f32.gmra.mxu2 %vm1624_vm4, %v7018_v11 }
 0x6f5   : > { %v2867_v18 = vpop.f32.mrf.mxu2 }
 0x6fa   : > { %5290 = vmatmul.msk.f32.gmra.mxu2 %vm1624_vm4, %v7029_v17 }
 0x6fd   : > { %v2870_v43 = vpop.f32.mrf.mxu2 }
 0x702   : > { %5291 = vmatmul.msk.f32.gmra.mxu2 %vm1624_vm4, %v7040_v31 }
 0x705   : > { %v2873_v28 = vpop.f32.mrf.mxu2 }
 0x70a   : > { %5292 = vmatmul.msk.f32.gmra.mxu2 %vm1624_vm4, %v7047_v55 }
 0x70d   : > { %v2876_v21 = vpop.f32.mrf.mxu2 }
 0x712   : > { %5293 = vmatmul.msk.f32.gmra.mxu2 %vm1624_vm4, %v7054_v15 }
 0x715   : > { %v2879_v12 = vpop.f32.mrf.mxu2 }
 0x71a   : > { %5294 = vmatmul.msk.f32.gmra.mxu2 %vm1624_vm4, %v7061_v45 }
 0x71d   : > { %v2882_v11 = vpop.f32.mrf.mxu2 }
 0x722   : > { %5295 = vmatmul.msk.f32.gmra.mxu2 %vm1624_vm4, %v7068_v23 }
 0x725   : > { %v2885_v17 = vpop.f32.mrf.mxu2 }
 0x72d   : > { %v2888_v53 = vpop.f32.mrf.mxu2 }
 0x735   : > { %v2891_v3 = vpop.f32.mrf.mxu2 }
 0x73d   : > { %v2894_v31 = vpop.f32.mrf.mxu2 }
 0x745   : > { %v2897_v46 = vpop.f32.mrf.mxu2 }
 0x746   : > { %3007 = vmatpush.msrb.mxu0 %v2897_v46  ;;  %v5313_v46 = vld [vmem:[%s8572_s25 + $0x248] sm:$0xff] }
 0x748   : > { %3008 = vmatpush.msrb.mxu0 %v2894_v31  ;;  %v5318_v31 = vld [vmem:[%s8572_s25 + $0x270] sm:$0xff] }
 0x74a   : > { %3009 = vmatpush.msrb.mxu0 %v2891_v3 }
 0x74c   : > { %3010 = vmatpush.msrb.mxu0 %v2888_v53  ;;  %v5311_v53 = vld [vmem:[%s8572_s25 + $0x238] sm:$0xff] }
 0x74d   : > { %v2900_v55 = vpop.f32.mrf.mxu2 }
 0x74e   : > { %3011 = vmatpush.msrb.mxu0 %v2885_v17 }
 0x750   : > { %3012 = vmatpush.msrb.mxu0 %v2882_v11  ;;  %v5316_v11 = vld [vmem:[%s8572_s25 + $0x260] sm:$0xff] }
 0x752   : > { %3013 = vmatpush.msrb.mxu0 %v2879_v12  ;;  %v5309_v12 = vld [vmem:[%s8572_s25 + $0x228] sm:$0xff] }
 0x754   : > { %3014 = vmatpush.msrb.mxu0 %v2876_v21 }
 0x755   : > { %v2903_v15 = vpop.f32.mrf.mxu2 }
 0x756   : > { %3015 = vmatpush.msrb.mxu0 %v2873_v28 }
 0x758   : > { %3016 = vmatpush.msrb.mxu0 %v2870_v43  ;;  %v5314_v43 = vld [vmem:[%s8572_s25 + $0x250] sm:$0xff] }
 0x75a   : > { %3017 = vmatpush.msrb.mxu0 %v2867_v18  ;;  %v5307_v18 = vld [vmem:[%s8572_s25 + $0x218] sm:$0xff] }
 0x75c   : > { %3018 = vmatpush.msrb.mxu0 %v2864_v29 }
 0x75d   : > { %v2906_v45 = vpop.f32.mrf.mxu2 }
 0x75e   : > { %3019 = vmatpush.msrb.mxu0 %v2861_v10  ;;  %v7491_v10 = vpop.f32.mrf.mxu3 }
 0x75f   : > { %8583 = vst [vmem:[#allocation13_spill] sm:$0xff] %v7491_v10 }
 0x760   : > { %3020 = vmatpush.msrb.mxu0 %v2858_v38  ;;  %v5312_v38 = vld [vmem:[%s8572_s25 + $0x240] sm:$0xff] }
 0x762   : > { %3021 = vmatpush.msrb.mxu0 %v2855_v19  ;;  %v5305_v19 = vld [vmem:[%s8572_s25 + $0x208] sm:$0xff] }
 0x764   : > { %3022 = vmatpush.msrb.mxu0 %v2852_v1  ;;  %v7482_v1 = vpop.f32.mrf.mxu0 }
 0x765   : > { %v2909_v23 = vpop.f32.mrf.mxu2  ;;  %3023 = vmatmul.f32.vlgmr.msrb.gmra.mxu0 %v5296_v36 }
 0x766   : > { %v7502_v28 = vpop.f32.mrf.mxu3 }
 0x76c   : > { %v7493_v29 = vpop.f32.mrf.mxu0 }
 0x76d   : > { %v2912_v54 = vpop.f32.mrf.mxu2  ;;  %3026 = vmatmul.f32.gmra.mxu0 %v5298_v33 }
 0x76e   : > { %v7513_v17 = vpop.f32.mrf.mxu3 }
 0x774   : > { %v7504_v21 = vpop.f32.mrf.mxu0 }
 0x775   : > { %v2915_v7 = vpop.f32.mrf.mxu2  ;;  %3029 = vmatmul.f32.gmra.mxu0 %v5300_v8  ;;  %v5323_v8 = vld [vmem:[%s8572_s25 + $0x298] sm:$0xff] }
 0x77c   : > { %v7518_v3 = vpop.f32.mrf.mxu0 }
 0x77d   : > { %v2918_v32 = vpop.f32.mrf.mxu2  ;;  %3032 = vmatmul.f32.gmra.mxu0 %v5302_v47  ;;  %v7561_v47 = vpop.f32.mrf.mxu1 }
 0x77e   : > { %8584 = vst [vmem:[#allocation14_spill] sm:$0xff] %v7561_v47 }
 0x785   : > { %v2921_v56 = vpop.f32.mrf.mxu2  ;;  %3035 = vmatmul.f32.gmra.mxu0 %v5304_v25 }
 0x78d   : > { %v2924_v51 = vpop.f32.mrf.mxu2  ;;  %3038 = vmatmul.f32.gmra.mxu0 %v5306_v48 }
 0x795   : > { %v2927_v6 = vpop.f32.mrf.mxu2  ;;  %3041 = vmatmul.f32.gmra.mxu0 %v5308_v59 }
 0x79d   : > { %v2930_v37 = vpop.f32.mrf.mxu2  ;;  %3044 = vmatmul.f32.gmra.mxu0 %v5310_v39 }
 0x7a5   : > { %v2933_v26 = vpop.f32.mrf.mxu2  ;;  %3047 = vmatmul.f32.gmra.mxu0 %v5312_v38 }
 0x7a6   : > { %3070 = vmatpush.msra.mxu3 %v2933_v26  ;;  %v5321_v26 = vld [vmem:[%s8572_s25 + $0x288] sm:$0xff] }
 0x7a8   : > { %3071 = vmatpush.msra.mxu3 %v2930_v37  ;;  %v5319_v37 = vld [vmem:[%s8572_s25 + $0x278] sm:$0xff] }
 0x7aa   : > { %3072 = vmatpush.msra.mxu3 %v2927_v6 }
 0x7ac   : > { %3073 = vmatpush.msra.mxu3 %v2924_v51 }
 0x7ad   : > { %3050 = vmatmul.f32.gmra.mxu0 %v5314_v43 }
 0x7ae   : > { %3074 = vmatpush.msra.mxu3 %v2921_v56  ;;  %v5317_v56 = vld [vmem:[%s8572_s25 + $0x268] sm:$0xff] }
 0x7b0   : > { %3075 = vmatpush.msra.mxu3 %v2918_v32 }
 0x7b2   : > { %3076 = vmatpush.msra.mxu3 %v2915_v7 }
 0x7b4   : > { %3077 = vmatpush.msra.mxu3 %v2912_v54  ;;  %v5322_v54 = vld [vmem:[%s8572_s25 + $0x290] sm:$0xff] }
 0x7b5   : > { %3053 = vmatmul.f32.gmra.mxu0 %v5316_v11 }
 0x7b6   : > { %3078 = vmatpush.msra.mxu3 %v2909_v23  ;;  %v5315_v23 = vld [vmem:[%s8572_s25 + $0x258] sm:$0xff] }
 0x7b8   : > { %3079 = vmatpush.msra.mxu3 %v2906_v45  ;;  %v7533_v45 = vpop.f32.mrf.mxu0 }
 0x7b9   : > { %v2656_v63 = vadd.f32 %v7533_v45, %v7384_v30 }
 0x7ba   : > { %3080 = vmatpush.msra.mxu3 %v2903_v15  ;;  %v5320_v15 = vld [vmem:[%s8572_s25 + $0x280] sm:$0xff] }
 0x7bc   : > { %3081 = vmatpush.msra.mxu3 %v2900_v55  ;;  %v7527_v55 = vpop.f32.mrf.mxu3 }
 0x7bd   : > { %5324 = vmatmul.msk.f32.vlgmr.msra.gmra.mxu3 %vm1490_vm3, %v5297_v13  ;;  %3056 = vmatmul.f32.gmra.mxu0 %v5318_v31 }
 0x7c0   : > { %v2658_v32 = vpop.f32.mrf.mxu0 }
 0x7c1   : > { %v2659_v14 = vadd.f32 %v2658_v32, %v7388_v34 }
 0x7c4   : > { %v7542_v7 = vpop.f32.mrf.mxu3 }
 0x7c5   : > { %5325 = vmatmul.msk.f32.gmra.mxu3 %vm1490_vm3, %v5299_v0  ;;  %3059 = vmatmul.f32.gmra.mxu0 %v5320_v15  ;;  %v7566_v0 = vpop.f32.mrf.mxu1 }
 0x7c6   : > { %8586 = vst [vmem:[#allocation16_spill] sm:$0xff] %v7566_v0 }
 0x7c8   : > { %v2661_v6 = vpop.f32.mrf.mxu0 }
 0x7cc   : > { %v7548_v51 = vpop.f32.mrf.mxu3 }
 0x7cd   : > { %5326 = vmatmul.msk.f32.gmra.mxu3 %vm1490_vm3, %v5301_v50  ;;  %3062 = vmatmul.f32.gmra.mxu0 %v5322_v54  ;;  %v7570_v59 = vpop.f32.mrf.mxu1 }
 0x7ce   : > { %8588 = vst [vmem:[#allocation18_spill] sm:$0xff] %v7570_v59 }
 0x7d0   : > { %v2664_v33 = vpop.f32.mrf.mxu0 }
 0x7d1   : > { %v2665_v49 = vadd.f32 %v2664_v33, %v7396_v22 }
 0x7d4   : > { %v2756_v36 = vpop.f32.mrf.mxu3 }
 0x7d5   : > { %5327 = vmatmul.msk.f32.gmra.mxu3 %vm1490_vm3, %v5303_v52  ;;  %v7576_v38 = vpop.f32.mrf.mxu1  ;;  %v2757_v34 = vadd.f32 %v2756_v36, %v2656_v63 }
 0x7d6   : > { %8591 = vst [vmem:[#allocation21_spill] sm:$0xff] %v7576_v38 }
 0x7dc   : > { %v2759_v13 = vpop.f32.mrf.mxu3 }
 0x7dd   : > { %5328 = vmatmul.msk.f32.gmra.mxu3 %vm1490_vm3, %v5305_v19 }
 0x7e2   : > { %v7563_v25 = vpop.f32.mrf.mxu0 }
 0x7e3   : > { %8585 = vst [vmem:[#allocation15_spill] sm:$0xff] %v7563_v25 }
 0x7e4   : > { %v2762_v48 = vpop.f32.mrf.mxu3 }
 0x7e5   : > { %5329 = vmatmul.msk.f32.gmra.mxu3 %vm1490_vm3, %v5307_v18 }
 0x7ea   : > { %v7568_v50 = vpop.f32.mrf.mxu0 }
 0x7eb   : > { %8587 = vst [vmem:[#allocation17_spill] sm:$0xff] %v7568_v50 }
 0x7ec   : > { %v2765_v52 = vpop.f32.mrf.mxu3 }
 0x7ed   : > { %5330 = vmatmul.msk.f32.gmra.mxu3 %vm1490_vm3, %v5309_v12  ;;  %v7582_v12 = vpop.f32.mrf.mxu1 }
 0x7ee   : > { %8594 = vst [vmem:[#allocation24_spill] sm:$0xff] %v7582_v12 }
 0x7f2   : > { %v7572_v39 = vpop.f32.mrf.mxu0 }
 0x7f3   : > { %8589 = vst [vmem:[#allocation19_spill] sm:$0xff] %v7572_v39 }
 0x7f5   : > { %5331 = vmatmul.msk.f32.gmra.mxu3 %vm1490_vm3, %v5311_v53  ;;  %v7588_v31 = vpop.f32.mrf.mxu1 }
 0x7f6   : > { %8597 = vst [vmem:[#allocation27_spill] sm:$0xff] %v7588_v31  ;;  %v2653_v31 = vadd.f32 %v7518_v3, %v7380_v5 }
 0x7fa   : > { %v7578_v18 = vpop.f32.mrf.mxu0 }
 0x7fb   : > { %8592 = vst [vmem:[#allocation22_spill] sm:$0xff] %v7578_v18  ;;  %v2662_v18 = vadd.f32 %v2661_v6, %v7392_v16  ;;  %v2650_v16 = vadd.f32 %v7504_v21, %v7372_v58  ;;  %v2638_v21 = vadd.f32 %v7453_v40, %v7324_v4 }
 0x7fd   : > { %5332 = vmatmul.msk.f32.gmra.mxu3 %vm1490_vm3, %v5313_v46  ;;  %v2751_v63 = vadd.f32 %v7542_v7, %v2650_v16 }
 0x802   : > { %v7584_v11 = vpop.f32.mrf.mxu0 }
 0x803   : > { %8595 = vst [vmem:[#allocation25_spill] sm:$0xff] %v7584_v11 }
 0x805   : > { %5333 = vmatmul.msk.f32.gmra.mxu3 %vm1490_vm3, %v5315_v23  ;;  %v7594_v23 = vpop.f32.mrf.mxu1 }
 0x806   : > { %8600 = vst [vmem:[#allocation30_spill] sm:$0xff] %v7594_v23 }
 0x80a   : > { %v7590_v46 = vpop.f32.mrf.mxu0 }
 0x80b   : > { %8598 = vst [vmem:[#allocation28_spill] sm:$0xff] %v7590_v46  ;;  %v2766_v46 = vadd.f32 %v2765_v52, %v2665_v49 }
 0x80d   : > { %5334 = vmatmul.msk.f32.gmra.mxu3 %vm1490_vm3, %v5317_v56  ;;  %v8603_v36 = vld [vmem:[#allocation30_spill] sm:$0xff] }
 0x812   : > { %v7598_v56 = vpop.f32.mrf.mxu0 }
 0x815   : > { %5335 = vmatmul.msk.f32.gmra.mxu3 %vm1490_vm3, %v5319_v37 }
 0x81d   : > { %5336 = vmatmul.msk.f32.gmra.mxu3 %vm1490_vm3, %v5321_v26  ;;  %v2806_v26 = vpop.f32.mrf.mxu1 }
 0x825   : > { %5337 = vmatmul.msk.f32.gmra.mxu3 %vm1490_vm3, %v5323_v8  ;;  %v3045_v8 = vpop.f32.mrf.mxu0 }
 0x82d   : > { %v3048_v25 = vpop.f32.mrf.mxu0 }
 0x840   : > { %v7574_v19 = vpop.f32.mrf.mxu3 }
 0x841   : > { %8590 = vst [vmem:[#allocation20_spill] sm:$0xff] %v7574_v19  ;;  %v2809_v19 = vpop.f32.mrf.mxu1 }
 0x848   : > { %v7580_v43 = vpop.f32.mrf.mxu3 }
 0x849   : > { %8593 = vst [vmem:[#allocation23_spill] sm:$0xff] %v7580_v43  ;;  %v2812_v61 = vpop.f32.mrf.mxu1  ;;  %v3051_v43 = vpop.f32.mrf.mxu0 }
 0x850   : > { %v7586_v53 = vpop.f32.mrf.mxu3 }
 0x851   : > { %8596 = vst [vmem:[#allocation26_spill] sm:$0xff] %v7586_v53  ;;  %v2815_v59 = vpop.f32.mrf.mxu1  ;;  %v3054_v53 = vpop.f32.mrf.mxu0 }
 0x852   : > { %v2816_v5 = vadd.f32 %v2815_v59, %v2757_v34  ;;  %v8608_v59 = vld [vmem:[#allocation13_spill] sm:$0xff]  ;;  %v8618_v34 = vld [vmem:[#allocation3_spill] sm:$0xff] }
 0x853   : > { %v2739_v52 = vadd.f32 %v8608_v59, %v2638_v21  ;;  %v8628_v21 = vld [vmem:[#allocation9_spill] sm:$0xff] }
 0x858   : > { %v7592_v15 = vpop.f32.mrf.mxu3 }
 0x859   : > { %8599 = vst [vmem:[#allocation29_spill] sm:$0xff] %v7592_v15  ;;  %v2818_v38 = vpop.f32.mrf.mxu1  ;;  %v3057_v62 = vpop.f32.mrf.mxu0 }
 0x860   : > { %v7596_v54 = vpop.f32.mrf.mxu3 }
 0x861   : > { %8601 = vst [vmem:[#allocation31_spill] sm:$0xff] %v7596_v54  ;;  %v2821_v2 = vpop.f32.mrf.mxu1  ;;  %v3060_v15 = vpop.f32.mrf.mxu0  ;;  %v2763_v54 = vadd.f32 %v2762_v48, %v2662_v18  ;;  %v2647_v48 = vadd.f32 %v7493_v29, %v7360_v60 }
 0x863   : > { %v2822_v10 = vadd.f32 %v2821_v2, %v2763_v54  ;;  %v2754_v2 = vadd.f32 %v7548_v51, %v2653_v31  ;;  %v2748_v60 = vadd.f32 %v7527_v55, %v2647_v48  ;;  %v8614_v31 = vld [vmem:[#allocation12_spill] sm:$0xff]  ;;  %v8621_v48 = vld [vmem:[#allocation21_spill] sm:$0xff] }
 0x864   : > { %v8615_v54 = vld [vmem:[#allocation24_spill] sm:$0xff] }
 0x865   : > { %v2813_v58 = vadd.f32 %v2812_v61, %v2754_v2 }
 0x868   : > { %v7600_v37 = vpop.f32.mrf.mxu3 }
 0x869   : > { %8602 = vst [vmem:[#allocation32_spill] sm:$0xff] %v7600_v37  ;;  %v2824_v9 = vpop.f32.mrf.mxu1  ;;  %v3063_v44 = vpop.f32.mrf.mxu0  ;;  %v2760_v37 = vadd.f32 %v2759_v13, %v2659_v14 }
 0x86a   : > { %v2825_v33 = vadd.f32 %v2824_v9, %v2766_v46 }
 0x86b   : > { %v2819_v6 = vadd.f32 %v2818_v38, %v2760_v37  ;;  %v8611_v38 = vld [vmem:[#allocation31_spill] sm:$0xff]  ;;  %v8616_v37 = vld [vmem:[#allocation22_spill] sm:$0xff] }
 0x870   : > { %v3101_v47 = vpop.f32.mrf.mxu3  ;;  %v8605_v4 = vld [vmem:[#allocation32_spill] sm:$0xff] }
 0x871   : > { %v3102_v61 = vadd.f32 %v3101_v47, %v7598_v56  ;;  %v8607_v47 = vld [vmem:[#allocation8_spill] sm:$0xff]  ;;  %v2798_v56 = vadd.f32 %v8615_v54, %v2739_v52  ;;  %v3153_v54 = vld [vmem:[%s8533_s9] sm:$0xff] }
 0x878   : > { %v3104_v0 = vpop.f32.mrf.mxu3 }
 0x879   : > { %v3105_v29 = vadd.f32 %v3104_v0, %v3045_v8  ;;  %v8606_v0 = vld [vmem:[#allocation5_spill] sm:$0xff] }
 0x880   : > { %v3107_v50 = vpop.f32.mrf.mxu3 }
 0x888   : > { %v3110_v35 = vpop.f32.mrf.mxu3 }
 0x889   : > { %v3111_v3 = vadd.f32 %v3110_v35, %v3051_v43 }
 0x88b   : > { %v3134_v35 = vadd.f32 %v3111_v3, %v2813_v58  ;;  %v8623_v3 = vld [vmem:[#allocation26_spill] sm:$0xff] }
 0x890   : > { %v3113_v39 = vpop.f32.mrf.mxu3 }
 0x891   : > { %v3114_v30 = vadd.f32 %v3113_v39, %v3054_v53 }
 0x893   : > { %v3135_v9 = vadd.f32 %v3114_v30, %v2816_v5  ;;  %v8622_v5 = vld [vmem:[#allocation19_spill] sm:$0xff] }
 0x898   : > { %v3116_v27 = vpop.f32.mrf.mxu3 }
 0x899   : > { %v3117_v23 = vadd.f32 %v3116_v27, %v3057_v62  ;;  %v2644_v27 = vadd.f32 %v7482_v1, %v7348_v41  ;;  %v3108_v62 = vadd.f32 %v3107_v50, %v3048_v25  ;;  %v2807_v1 = vadd.f32 %v2806_v26, %v2748_v60  ;;  %v8604_v25 = vld [vmem:[#allocation28_spill] sm:$0xff]  ;;  %v8617_v26 = vld [vmem:[#allocation29_spill] sm:$0xff] }
 0x89a   : > { %v3099_v40 = vadd.f32 %v8605_v4, %v8604_v25  ;;  %v2632_v50 = vadd.f32 %v8607_v47, %v8606_v0  ;;  %v3093_v8 = vadd.f32 %v8617_v26, %v8616_v37  ;;  %v8626_v60 = vld [vmem:[#allocation17_spill] sm:$0xff]  ;;  %v3154_v37 = vld [vmem:[%s8533_s9 + $0x8] sm:$0xff] }
 0x89b   : > { %v3136_v14 = vadd.f32 %v3117_v23, %v2819_v6  ;;  %v2745_v41 = vadd.f32 %v7513_v17, %v2644_v27  ;;  %v3132_v17 = vadd.f32 %v3105_v29, %v2807_v1  ;;  %v8620_v6 = vld [vmem:[#allocation11_spill] sm:$0xff]  ;;  %v8624_v27 = vld [vmem:[#allocation10_spill] sm:$0xff]  ;;  %v7764_v26 = vld [vmem:[%s8539_s15 + $0x8] sm:$0xff] }
 0x89d   : > { %v2804_v13 = vadd.f32 %v8603_v36, %v2745_v41  ;;  %v8631_v36 = vld [vmem:[#allocation20_spill] sm:$0xff] }
 0x89f   : > { %v3131_v43 = vadd.f32 %v3102_v61, %v2804_v13 }
 0x8a0   : > { %v3119_v12 = vpop.f32.mrf.mxu3 }
 0x8a1   : > { %v3120_v11 = vadd.f32 %v3119_v12, %v3060_v15  ;;  %v8612_v12 = vld [vmem:[#allocation4_spill] sm:$0xff] }
 0x8a3   : > { %v3137_v32 = vadd.f32 %v3120_v11, %v2822_v10  ;;  %v2810_v10 = vadd.f32 %v2809_v19, %v2751_v63  ;;  %v8610_v19 = vld [vmem:[#allocation25_spill] sm:$0xff]  ;;  %v8613_v11 = vld [vmem:[#allocation7_spill] sm:$0xff] }
 0x8a4   : > { %v3096_v18 = vadd.f32 %v8611_v38, %v8610_v19  ;;  %v2629_v53 = vadd.f32 %v8613_v11, %v8612_v12 }
 0x8a5   : > { %5661 = vtanh.f32 %v3137_v32  ;;  %v3133_v7 = vadd.f32 %v3108_v62, %v2810_v10  ;;  %v8619_v32 = vld [vmem:[#allocation6_spill] sm:$0xff]  ;;  %v8627_v10 = vld [vmem:[#allocation23_spill] sm:$0xff] }
 0x8a6   : > { %v2730_v63 = vadd.f32 %v8624_v27, %v2629_v53  ;;  %v3087_v29 = vadd.f32 %v8627_v10, %v8626_v60 }
 0x8a8   : > { %v3122_v22 = vpop.f32.mrf.mxu3 }
 0x8a9   : > { %v3123_v45 = vadd.f32 %v3122_v22, %v3063_v44  ;;  %v2641_v44 = vadd.f32 %v7467_v20, %v7336_v57  ;;  %v2635_v57 = vadd.f32 %v7442_v42, %v7309_v24  ;;  %v2626_v22 = vadd.f32 %v8619_v32, %v8618_v34 }
 0x8ab   : > { %v3138_v49 = vadd.f32 %v3123_v45, %v2825_v33  ;;  %v7624_v51 = vpop.eup %5661  ;;  %v2742_v20 = vadd.f32 %v7502_v28, %v2641_v44  ;;  %v8609_v28 = vld [vmem:[#allocation27_spill] sm:$0xff]  ;;  %v2736_v46 = vadd.f32 %v8614_v31, %v2635_v57  ;;  %v2733_v33 = vadd.f32 %v8620_v6, %v2632_v50 }
 0x8ac   : > { %v7654_v15 = vmul.f32 %v7624_v51, %v7624_v51  ;;  %v2727_v41 = vadd.f32 %v8628_v21, %v2626_v22 }
 0x8ad   : > { %5663 = vtanh.f32 %v3138_v49  ;;  %v2801_v39 = vadd.f32 %v8609_v28, %v2742_v20  ;;  %v2795_v2 = vadd.f32 %v8621_v48, %v2736_v46  ;;  %v3129_v49 = vadd.f32 %v3096_v18, %v2798_v56  ;;  %v8630_v20 = vld [vmem:[#allocation15_spill] sm:$0xff] }
 0x8ae   : > { %5665 = vtanh.f32 %v3136_v14  ;;  %v3090_v14 = vadd.f32 %v8623_v3, %v8622_v5  ;;  %v3084_v13 = vadd.f32 %v8631_v36, %v8630_v20 }
 0x8af   : > { %5667 = vtanh.f32 %v3135_v9  ;;  %v3130_v16 = vadd.f32 %v3099_v40, %v2801_v39  ;;  %v8625_v9 = vld [vmem:[#allocation18_spill] sm:$0xff] }
 0x8b0   : > { %5669 = vtanh.f32 %v3134_v35  ;;  %v2792_v44 = vadd.f32 %v8625_v9, %v2733_v33  ;;  %v3128_v35 = vadd.f32 %v3093_v8, %v2795_v2  ;;  %v7771_v8 = vld [vmem:[%s8539_s15] sm:$0xff] }
 0x8b1   : > { %5671 = vtanh.f32 %v3133_v7  ;;  %v8629_v7 = vld [vmem:[#allocation16_spill] sm:$0xff]  ;;  %v7786_v33 = vld [vmem:[%s8540_s16] sm:$0xf] }
 0x8b2   : > { %5673 = vtanh.f32 %v3132_v17  ;;  %v2789_v57 = vadd.f32 %v8629_v7, %v2730_v63  ;;  %v3127_v25 = vadd.f32 %v3090_v14, %v2792_v44  ;;  %v8632_v17 = vld [vmem:[#allocation14_spill] sm:$0xff]  ;;  %5365 = vmatpush.msk.msrb.mxu3 %vm876_vm1, %v7786_v33 }
 0x8b3   : > { %v7629_v55 = vpop.eup %5663  ;;  %5675 = vtanh.f32 %v3131_v43  ;;  %v2786_v0 = vadd.f32 %v8632_v17, %v2727_v41 }
 0x8b4   : > { %3163 = vmatpush.msrb.mxu1 %v7629_v55  ;;  %v7640_v24 = vmul.f32 %v7629_v55, %v7629_v55  ;;  %v7642_v42 = vpop.eup %5665  ;;  %5677 = vtanh.f32 %v3130_v16  ;;  %v3126_v47 = vadd.f32 %v3087_v29, %v2789_v57 }
 0x8b5   : > { %v7656_v23 = vpop.eup %5667  ;;  %v7668_v30 = vmul.f32 %v7642_v42, %v7642_v42  ;;  %5679 = vtanh.f32 %v3129_v49  ;;  %v3125_v52 = vadd.f32 %v3084_v13, %v2786_v0 }
 0x8b6   : > { %3164 = vmatpush.msrb.mxu1 %v7624_v51  ;;  %3200 = vmatpush.msra.mxu0 %v7640_v24  ;;  %v7670_v45 = vpop.eup %5669  ;;  %v3194_v58 = vmul.f32 %v7656_v23, %v7656_v23  ;;  %5681 = vtanh.f32 %v3128_v35 }
 0x8b7   : > { %v7680_v62 = vpop.eup %5671  ;;  %v3193_v1 = vmul.f32 %v7670_v45, %v7670_v45  ;;  %5683 = vtanh.f32 %v3127_v25 }
 0x8b8   : > { %3165 = vmatpush.msrb.mxu1 %v7642_v42  ;;  %3201 = vmatpush.msra.mxu0 %v7654_v15  ;;  %v7689_v61 = vpop.eup %5673  ;;  %v3192_v4 = vmul.f32 %v7680_v62, %v7680_v62  ;;  %5685 = vtanh.f32 %v3126_v47 }
 0x8b9   : > { %v7697_v40 = vpop.eup %5675  ;;  %v3191_v50 = vmul.f32 %v7689_v61, %v7689_v61  ;;  %5687 = vtanh.f32 %v3125_v52 }
 0x8ba   : > { %3166 = vmatpush.msrb.mxu1 %v7656_v23  ;;  %3202 = vmatpush.msra.mxu0 %v7668_v30  ;;  %v7703_v59 = vpop.eup %5677  ;;  %v3190_v28 = vmul.f32 %v7697_v40, %v7697_v40 }
 0x8bb   : > { %v7708_v39 = vpop.eup %5679  ;;  %v3189_v19 = vmul.f32 %v7703_v59, %v7703_v59 }
 0x8bc   : > { %3167 = vmatpush.msrb.mxu1 %v7670_v45  ;;  %3203 = vmatpush.msra.mxu0 %v3194_v58  ;;  %v7713_v38 = vpop.eup %5681  ;;  %v3188_v18 = vmul.f32 %v7708_v39, %v7708_v39 }
 0x8bd   : > { %v7718_v43 = vpop.eup %5683  ;;  %v3187_v12 = vmul.f32 %v7713_v38, %v7713_v38 }
 0x8be   : > { %3168 = vmatpush.msrb.mxu1 %v7680_v62  ;;  %3204 = vmatpush.msra.mxu0 %v3193_v1  ;;  %v7723_v11 = vpop.eup %5685  ;;  %v3186_v53 = vmul.f32 %v7718_v43, %v7718_v43 }
 0x8bf   : > { %v7728_v31 = vpop.eup %5687  ;;  %v3185_v46 = vmul.f32 %v7723_v11, %v7723_v11 }
 0x8c0   : > { %3169 = vmatpush.msrb.mxu1 %v7689_v61  ;;  %3205 = vmatpush.msra.mxu0 %v3192_v4  ;;  %v3184_v56 = vmul.f32 %v7728_v31, %v7728_v31 }
 0x8c2   : > { %3170 = vmatpush.msrb.mxu1 %v7697_v40  ;;  %3206 = vmatpush.msra.mxu0 %v3191_v50 }
 0x8c4   : > { %3171 = vmatpush.msrb.mxu1 %v7703_v59  ;;  %3207 = vmatpush.msra.mxu0 %v3190_v28 }
 0x8c6   : > { %3172 = vmatpush.msrb.mxu1 %v7708_v39  ;;  %3208 = vmatpush.msra.mxu0 %v3189_v19 }
 0x8c8   : > { %3173 = vmatpush.msrb.mxu1 %v7713_v38  ;;  %3209 = vmatpush.msra.mxu0 %v3188_v18 }
 0x8ca   : > { %3174 = vmatpush.msrb.mxu1 %v7718_v43  ;;  %3210 = vmatpush.msra.mxu0 %v3187_v12 }
 0x8cc   : > { %3175 = vmatpush.msrb.mxu1 %v7723_v11  ;;  %3211 = vmatpush.msra.mxu0 %v3186_v53 }
 0x8ce   : > { %3176 = vmatpush.msrb.mxu1 %v7728_v31  ;;  %3212 = vmatpush.msra.mxu0 %v3185_v46 }
 0x8cf   : > { %5338 = vmatmul.msk.f32.vlgmr.msrb.gmra.mxu1 %vm648_vm0, %v3153_v54 }
 0x8d0   : > { %5579 = vmatpush.msra.mxu1 %v7640_v24  ;;  %3213 = vmatpush.msra.mxu0 %v3184_v56  ;;  %v7751_v24 = vld [vmem:[%s8539_s15 + $0x18] sm:$0xf] }
 0x8d1   : > { %5340 = vmatmul.msk.f32.vlgmr.msra.gmra.mxu0 %vm648_vm0, %v3153_v54  ;;  %v3322_v54 = vld [vmem:[%s8534_s10 + $0x20] sm:$0xff] }
 0x8d2   : > { %5580 = vmatpush.msra.mxu1 %v7654_v15  ;;  %v7757_v15 = vld [vmem:[%s8539_s15 + $0x10] sm:$0xff]  ;;  %5348 = vmatpush.msk.msrb.mxu0 %vm876_vm1, %v7786_v33 }
 0x8d4   : > { %5581 = vmatpush.msra.mxu1 %v7668_v30 }
 0x8d6   : > { %5582 = vmatpush.msra.mxu1 %v3194_v58 }
 0x8d7   : > { %5339 = vmatmul.msk.f32.gmra.mxu1 %vm648_vm0, %v3154_v37 }
 0x8d8   : > { %5583 = vmatpush.msra.mxu1 %v3193_v1 }
 0x8da   : > { %5584 = vmatpush.msra.mxu1 %v3192_v4 }
 0x8dc   : > { %5585 = vmatpush.msra.mxu1 %v3191_v50 }
 0x8de   : > { %5586 = vmatpush.msra.mxu1 %v3190_v28 }
 0x8e0   : > { %5587 = vmatpush.msra.mxu1 %v3189_v19  ;;  %v3318_v19 = vld [vmem:[%s8534_s10] sm:$0xff] }
 0x8e2   : > { %5588 = vmatpush.msra.mxu1 %v3188_v18 }
 0x8e4   : > { %5589 = vmatpush.msra.mxu1 %v3187_v12  ;;  %v3319_v12 = vld [vmem:[%s8534_s10 + $0x8] sm:$0xff] }
 0x8e6   : > { %5590 = vmatpush.msra.mxu1 %v3186_v53  ;;  %v3320_v53 = vld [vmem:[%s8534_s10 + $0x10] sm:$0xff] }
 0x8e8   : > { %5591 = vmatpush.msra.mxu1 %v3185_v46  ;;  %v3321_v46 = vld [vmem:[%s8534_s10 + $0x18] sm:$0xff] }
 0x8ea   : > { %5592 = vmatpush.msra.mxu1 %v3184_v56  ;;  %v3323_v56 = vld [vmem:[%s8534_s10 + $0x28] sm:$0xff] }
 0x8eb   : > { %5341 = vmatmul.msk.f32.vlgmr.msra.gmra.mxu1 %vm648_vm0, %v3154_v37  ;;  %v3324_v37 = vld [vmem:[%s8534_s10 + $0x30] sm:$0xff] }
 0x8ec   : > { %5342 = vmatpush.msk.msrb.mxu1 %vm876_vm1, %v7751_v24 }
 0x8ee   : > { %3247 = vmatpush.msrb.mxu1 %v7757_v15 }
 0x8f0   : > { %3248 = vmatpush.msrb.mxu1 %v7764_v26 }
 0x8f2   : > { %3249 = vmatpush.msrb.mxu1 %v7771_v8 }
 0x8f4   : > { %5345 = vmatpush.msk.msra.mxu1 %vm876_vm1, %v7751_v24 }
 0x8f6   : > { %3278 = vmatpush.msra.mxu1 %v7757_v15 }
 0x8f8   : > { %3279 = vmatpush.msra.mxu1 %v7764_v26 }
 0x8fa   : > { %3280 = vmatpush.msra.mxu1 %v7771_v8 }
 0x94c   : > { %v3178_v16 = vpop.f32.mrf.mxu1 }
 0x94d   : > { %5343 = vmatmul.msk.f32.vlgmr.msrb.gmra.mxu1 %vm791_vm2, %v3178_v16  ;;  %v3325_v16 = vld [vmem:[%s8534_s10 + $0x38] sm:$0xff] }
 0x94e   : > { %v3215_v32 = vpop.f32.mrf.mxu0 }
 0x954   : > { %v3181_v34 = vpop.f32.mrf.mxu1 }
 0x955   : > { %5344 = vmatmul.msk.f32.gmra.mxu1 %vm791_vm2, %v3181_v34  ;;  %v3326_v34 = vld [vmem:[%s8534_s10 + $0x40] sm:$0xff] }
 0x95d   : > { %5346 = vmatmul.msk.f32.vlgmr.msra.gmra.mxu1 %vm791_vm2, %v3215_v32  ;;  %v3327_v32 = vld [vmem:[%s8534_s10 + $0x48] sm:$0xff] }
 0x968   : > { %v3218_v22 = vpop.f32.mrf.mxu1 }
 0x969   : > { %5347 = vmatmul.msk.f32.gmra.mxu1 %vm791_vm2, %v3218_v22  ;;  %v3328_v22 = vld [vmem:[%s8534_s10 + $0x50] sm:$0xff] }
 0x9ca   : > { %v3251_v6 = vpop.f32.mrf.mxu1 }
 0x9cb   : > { %v3257_v48 = vmul.f32 0.020408163, %v3251_v6  ;;  %v3329_v6 = vld [vmem:[%s8534_s10 + $0x58] sm:$0xff] }
 0x9cd   : > { %v3290_v5 = vmul.f32 %v3257_v48, %v3257_v48 }
 0x9d2   : > { %v3254_v30 = vpop.f32.mrf.mxu1 }
 0x9d3   : > { %v3258_v27 = vmul.f32 0.020408163, %v3254_v30  ;;  %v3330_v30 = vld [vmem:[%s8534_s10 + $0x60] sm:$0xff] }
 0x9d5   : > { %v3291_v58 = vmul.f32 %v3258_v27, %v3258_v27 }
 0x9da   : > { %v3282_v2 = vpop.f32.mrf.mxu1 }
 0x9db   : > { %v3288_v3 = vmul.f32 0.020408163, %v3282_v2  ;;  %v5400_v2 = vld [vmem:[%s8530_s6 + $0x38] sm:$0xf] }
 0x9dc   : > { %5401 = vmatpush.msk.msra.mxu2 %vm876_vm1, %v5400_v2 }
 0x9dd   : > { %v3292_v14 = vsub.f32 %v3288_v3, %v3290_v5  ;;  %v3584_v5 = vld [vmem:[%s8530_s6 + $0x10] sm:$0xff] }
 0x9de   : > { %v5399_v3 = vld [vmem:[%s8530_s6 + $0x30] sm:$0xff] }
 0x9df   : > { %v3294_v49 = vadd.f32 1e-05, %v3292_v14  ;;  %3725 = vmatpush.msra.mxu2 %v5399_v3  ;;  %v3331_v14 = vld [vmem:[%s8534_s10 + $0x68] sm:$0xff] }
 0x9e1   : > { %5689 = vrsqrt.f32 %v3294_v49  ;;  %vm3302_vm14 = vweird.f32 %v3294_v49 }
 0x9e6   : > { %v3285_v63 = vpop.f32.mrf.mxu1 }
 0x9e7   : > { %v3289_v9 = vmul.f32 0.020408163, %v3285_v63  ;;  %v5690_v44 = vpop.eup %5689  ;;  %v3582_v63 = vld [vmem:[%s8530_s6] sm:$0xff] }
 0x9e8   : > { %v3297_v10 = vmul.f32 %v5690_v44, %v3294_v49  ;;  %vm3303_vm13 = vweird.f32 %v5690_v44  ;;  %v3583_v49 = vld [vmem:[%s8530_s6 + $0x8] sm:$0xff] }
 0x9e9   : > { %v3293_v60 = vsub.f32 %v3289_v9, %v3291_v58  ;;  %vm3304_vm15 = vmor %vm3302_vm14, %vm3303_vm13  ;;  %v5397_v58 = vld [vmem:[%s8530_s6 + $0x20] sm:$0xff] }
 0x9ea   : > { %v3298_v35 = vmul.f32 %v5690_v44, %v3297_v10 }
 0x9eb   : > { %v3295_v29 = vadd.f32 1e-05, %v3293_v60 }
 0x9ec   : > { %v3299_v21 = vmul.f32 0.5, %v3298_v35 }
 0x9ed   : > { %5691 = vrsqrt.f32 %v3295_v29  ;;  %vm3312_vm4 = vweird.f32 %v3295_v29 }
 0x9ee   : > { %v3300_v41 = vsub.f32 1.5, %v3299_v21 }
 0x9f0   : > { %v3301_v1 = vmul.f32 %v5690_v44, %v3300_v41 }
 0x9f2   : > { %v3305_v20 = vsel %vm3304_vm15, %v5690_v44, %v3301_v1 }
 0x9f3   : > { %v5692_v7 = vpop.eup %5691  ;;  %v3316_v36 = vmul.f32 %v3305_v20, %v3257_v48  ;;  %5349 = vmatmul.msk.f32.vlgmr.msrb.gmra.mxu0 %vm1744_vm7, %v3305_v20  ;;  %v3585_v48 = vld [vmem:[%s8530_s6 + $0x18] sm:$0xf] }
 0x9f4   : > { %v3307_v57 = vmul.f32 %v5692_v7, %v3295_v29  ;;  %vm3313_vm3 = vweird.f32 %v5692_v7  ;;  %5382 = vmatpush.msk.msra.mxu3 %vm876_vm1, %v3585_v48 }
 0x9f5   : > { %5366 = vmatmul.msk.f32.vlgmr.msrb.gmra.mxu3 %vm1744_vm7, %v3316_v36  ;;  %vm3314_vm5 = vmor %vm3312_vm4, %vm3313_vm3 }
 0x9f6   : > { %v3308_v13 = vmul.f32 %v5692_v7, %v3307_v57  ;;  %3644 = vmatpush.msra.mxu3 %v3584_v5 }
 0x9f8   : > { %v3309_v25 = vmul.f32 0.5, %v3308_v13  ;;  %3645 = vmatpush.msra.mxu3 %v3583_v49 }
 0x9fa   : > { %v3310_v4 = vsub.f32 1.5, %v3309_v25  ;;  %3646 = vmatpush.msra.mxu3 %v3582_v63 }
 0x9fc   : > { %v3311_v17 = vmul.f32 %v5692_v7, %v3310_v4 }
 0x9fe   : > { %v3315_v0 = vsel %vm3314_vm5, %v5692_v7, %v3311_v17 }
 0x9ff   : > { %v3317_v47 = vmul.f32 %v3315_v0, %v3258_v27  ;;  %5350 = vmatmul.msk.f32.gmra.mxu0 %vm1744_vm7, %v3315_v0  ;;  %v5398_v27 = vld [vmem:[%s8530_s6 + $0x28] sm:$0xff] }
 0xa00   : > { %3726 = vmatpush.msra.mxu2 %v5398_v27 }
 0xa01   : > { %5367 = vmatmul.msk.f32.gmra.mxu3 %vm1744_vm7, %v3317_v47 }
 0xa02   : > { %3727 = vmatpush.msra.mxu2 %v5397_v58 }
 0xa70   : > { %v3359_v50 = vpop.f32.mrf.mxu0 }
 0xa78   : > { %v3489_v28 = vpop.f32.mrf.mxu3 }
 0xa7c   : > { %v3362_v52 = vpop.f32.mrf.mxu0 }
 0xa7d   : > { %3421 = vmatpush.msrb.mxu1 %v3362_v52 }
 0xa7f   : > { %3422 = vmatpush.msrb.mxu1 %v3359_v50 }
 0xa80   : > { %5351 = vmatmul.msk.f32.vlgmr.msrb.gmra.mxu1 %vm1777_vm12, %v3318_v19 }
 0xa84   : > { %v3492_v18 = vpop.f32.mrf.mxu3 }
 0xa85   : > { %3509 = vmatpush.msra.mxu0 %v3492_v18 }
 0xa87   : > { %3510 = vmatpush.msra.mxu0 %v3489_v28 }
 0xa88   : > { %5352 = vmatmul.msk.f32.gmra.mxu1 %vm1777_vm12, %v3319_v12  ;;  %5368 = vmatmul.msk.f32.vlgmr.msra.gmra.mxu0 %vm1777_vm12, %v3318_v19 }
 0xa90   : > { %5353 = vmatmul.msk.f32.gmra.mxu1 %vm1777_vm12, %v3320_v53  ;;  %5369 = vmatmul.msk.f32.gmra.mxu0 %vm1777_vm12, %v3319_v12 }
 0xa98   : > { %5354 = vmatmul.msk.f32.gmra.mxu1 %vm1777_vm12, %v3321_v46  ;;  %5370 = vmatmul.msk.f32.gmra.mxu0 %vm1777_vm12, %v3320_v53 }
 0xaa0   : > { %5355 = vmatmul.msk.f32.gmra.mxu1 %vm1777_vm12, %v3322_v54  ;;  %5371 = vmatmul.msk.f32.gmra.mxu0 %vm1777_vm12, %v3321_v46 }
 0xaa8   : > { %5356 = vmatmul.msk.f32.gmra.mxu1 %vm1777_vm12, %v3323_v56  ;;  %5372 = vmatmul.msk.f32.gmra.mxu0 %vm1777_vm12, %v3322_v54 }
 0xab0   : > { %5357 = vmatmul.msk.f32.gmra.mxu1 %vm1777_vm12, %v3324_v37  ;;  %5373 = vmatmul.msk.f32.gmra.mxu0 %vm1777_vm12, %v3323_v56 }
 0xab8   : > { %5358 = vmatmul.msk.f32.gmra.mxu1 %vm1777_vm12, %v3325_v16  ;;  %5374 = vmatmul.msk.f32.gmra.mxu0 %vm1777_vm12, %v3324_v37 }
 0xac0   : > { %5359 = vmatmul.msk.f32.gmra.mxu1 %vm1777_vm12, %v3326_v34  ;;  %5375 = vmatmul.msk.f32.gmra.mxu0 %vm1777_vm12, %v3325_v16 }
 0xac8   : > { %5360 = vmatmul.msk.f32.gmra.mxu1 %vm1777_vm12, %v3327_v32  ;;  %5376 = vmatmul.msk.f32.gmra.mxu0 %vm1777_vm12, %v3326_v34 }
 0xad0   : > { %5361 = vmatmul.msk.f32.gmra.mxu1 %vm1777_vm12, %v3328_v22  ;;  %5377 = vmatmul.msk.f32.gmra.mxu0 %vm1777_vm12, %v3327_v32 }
 0xad8   : > { %5362 = vmatmul.msk.f32.gmra.mxu1 %vm1777_vm12, %v3329_v6  ;;  %5378 = vmatmul.msk.f32.gmra.mxu0 %vm1777_vm12, %v3328_v22  ;;  %v5460_v22 = vld [vmem:[%s8530_s6 + $0x50] sm:$0xff] }
 0xae0   : > { %5363 = vmatmul.msk.f32.gmra.mxu1 %vm1777_vm12, %v3330_v30  ;;  %5379 = vmatmul.msk.f32.gmra.mxu0 %vm1777_vm12, %v3329_v6 }
 0xae8   : > { %5364 = vmatmul.msk.f32.gmra.mxu1 %vm1777_vm12, %v3331_v14  ;;  %5380 = vmatmul.msk.f32.gmra.mxu0 %vm1777_vm12, %v3330_v30  ;;  %v5458_v30 = vld [vmem:[%s8530_s6 + $0x40] sm:$0xff] }
 0xaf0   : > { %5381 = vmatmul.msk.f32.gmra.mxu0 %vm1777_vm12, %v3331_v14 }
 0xafd   : > { %v3424_v9 = vpop.f32.mrf.mxu1 }
 0xafe   : > { %v3554_v44 = vmul.f32 %v7728_v31, %v3424_v9 }
 0xb05   : > { %v3427_v60 = vpop.f32.mrf.mxu1  ;;  %v3512_v10 = vpop.f32.mrf.mxu0 }
 0xb06   : > { %v7893_v29 = vsub.f32 %v3554_v44, %v3512_v10  ;;  %v3555_v35 = vmul.f32 %v7723_v11, %v3427_v60 }
 0xb08   : > { %5383 = vmatmul.msk.f32.vlgmr.msra.gmra.mxu3 %vm791_vm2, %v7893_v29  ;;  %5402 = vmatmul.msk.f32.vlgmr.msra.gmra.mxu2 %vm791_vm2, %v7893_v29 }
 0xb0d   : > { %v3430_v21 = vpop.f32.mrf.mxu1  ;;  %v3515_v41 = vpop.f32.mrf.mxu0 }
 0xb0e   : > { %v7900_v1 = vsub.f32 %v3555_v35, %v3515_v41  ;;  %v3556_v31 = vmul.f32 %v7718_v43, %v3430_v21 }
 0xb10   : > { %5384 = vmatmul.msk.f32.gmra.mxu3 %vm791_vm2, %v7900_v1  ;;  %5403 = vmatmul.msk.f32.gmra.mxu2 %vm791_vm2, %v7900_v1 }
 0xb15   : > { %v3433_v7 = vpop.f32.mrf.mxu1  ;;  %v3518_v57 = vpop.f32.mrf.mxu0 }
 0xb16   : > { %v7907_v20 = vsub.f32 %v3556_v31, %v3518_v57  ;;  %v3557_v11 = vmul.f32 %v7713_v38, %v3433_v7 }
 0xb18   : > { %5385 = vmatmul.msk.f32.gmra.mxu3 %vm791_vm2, %v7907_v20  ;;  %5404 = vmatmul.msk.f32.gmra.mxu2 %vm791_vm2, %v7907_v20 }
 0xb1d   : > { %v3436_v36 = vpop.f32.mrf.mxu1  ;;  %v3521_v13 = vpop.f32.mrf.mxu0 }
 0xb1e   : > { %v7914_v25 = vsub.f32 %v3557_v11, %v3521_v13  ;;  %v3558_v43 = vmul.f32 %v7708_v39, %v3436_v36 }
 0xb20   : > { %5386 = vmatmul.msk.f32.gmra.mxu3 %vm791_vm2, %v7914_v25  ;;  %5405 = vmatmul.msk.f32.gmra.mxu2 %vm791_vm2, %v7914_v25 }
 0xb25   : > { %v3439_v4 = vpop.f32.mrf.mxu1  ;;  %v3524_v17 = vpop.f32.mrf.mxu0 }
 0xb26   : > { %v7921_v0 = vsub.f32 %v3558_v43, %v3524_v17  ;;  %v3559_v38 = vmul.f32 %v7703_v59, %v3439_v4 }
 0xb28   : > { %5387 = vmatmul.msk.f32.gmra.mxu3 %vm791_vm2, %v7921_v0  ;;  %5406 = vmatmul.msk.f32.gmra.mxu2 %vm791_vm2, %v7921_v0 }
 0xb2d   : > { %v3442_v47 = vpop.f32.mrf.mxu1  ;;  %v3527_v50 = vpop.f32.mrf.mxu0 }
 0xb2e   : > { %v7928_v52 = vsub.f32 %v3559_v38, %v3527_v50  ;;  %v3560_v39 = vmul.f32 %v7697_v40, %v3442_v47 }
 0xb30   : > { %5388 = vmatmul.msk.f32.gmra.mxu3 %vm791_vm2, %v7928_v52  ;;  %5407 = vmatmul.msk.f32.gmra.mxu2 %vm791_vm2, %v7928_v52 }
 0xb35   : > { %v3445_v28 = vpop.f32.mrf.mxu1  ;;  %v3530_v19 = vpop.f32.mrf.mxu0 }
 0xb36   : > { %v7935_v18 = vsub.f32 %v3560_v39, %v3530_v19  ;;  %v3561_v59 = vmul.f32 %v7689_v61, %v3445_v28 }
 0xb38   : > { %5389 = vmatmul.msk.f32.gmra.mxu3 %vm791_vm2, %v7935_v18  ;;  %5408 = vmatmul.msk.f32.gmra.mxu2 %vm791_vm2, %v7935_v18 }
 0xb3d   : > { %v3448_v12 = vpop.f32.mrf.mxu1  ;;  %v3533_v53 = vpop.f32.mrf.mxu0 }
 0xb3e   : > { %v7942_v46 = vsub.f32 %v3561_v59, %v3533_v53  ;;  %v3562_v40 = vmul.f32 %v7680_v62, %v3448_v12  ;;  %v5461_v62 = vld [vmem:[%s8530_s6 + $0x58] sm:$0xf] }
 0xb3f   : > { %5462 = vmatpush.msk.msrb.mxu3 %vm876_vm1, %v5461_v62  ;;  %v5416_v62 = vld [vmem:[%s8529_s5 + $0x70] sm:$0xff] }
 0xb40   : > { %5390 = vmatmul.msk.f32.gmra.mxu3 %vm791_vm2, %v7942_v46  ;;  %5409 = vmatmul.msk.f32.gmra.mxu2 %vm791_vm2, %v7942_v46 }
 0xb41   : > { %4009 = vmatpush.msrb.mxu3 %v5460_v22  ;;  %v3690_v22 = vld [vmem:[%s8529_s5] sm:$0xff] }
 0xb45   : > { %v3451_v54 = vpop.f32.mrf.mxu1  ;;  %v3536_v56 = vpop.f32.mrf.mxu0 }
 0xb46   : > { %v7949_v37 = vsub.f32 %v3562_v40, %v3536_v56  ;;  %v3563_v61 = vmul.f32 %v7670_v45, %v3451_v54  ;;  %v5459_v45 = vld [vmem:[%s8530_s6 + $0x48] sm:$0xff] }
 0xb47   : > { %4010 = vmatpush.msrb.mxu3 %v5459_v45 }
 0xb48   : > { %5391 = vmatmul.msk.f32.gmra.mxu3 %vm791_vm2, %v7949_v37  ;;  %5410 = vmatmul.msk.f32.gmra.mxu2 %vm791_vm2, %v7949_v37 }
 0xb49   : > { %4011 = vmatpush.msrb.mxu3 %v5458_v30  ;;  %v3691_v30 = vld [vmem:[%s8529_s5 + $0x8] sm:$0xff] }
 0xb4b   : > { %5512 = vmatpush.msk.msra.mxu3 %vm876_vm1, %v7751_v24 }
 0xb4d   : > { %v3454_v16 = vpop.f32.mrf.mxu1  ;;  %v3539_v34 = vpop.f32.mrf.mxu0  ;;  %4317 = vmatpush.msra.mxu3 %v7757_v15 }
 0xb4e   : > { %v3577_v32 = vsub.f32 %v3563_v61, %v3539_v34  ;;  %v3564_v6 = vmul.f32 %v7656_v23, %v3454_v16 }
 0xb4f   : > { %4318 = vmatpush.msra.mxu3 %v7764_v26 }
 0xb50   : > { %5392 = vmatmul.msk.f32.gmra.mxu3 %vm791_vm2, %v3577_v32  ;;  %5411 = vmatmul.msk.f32.gmra.mxu2 %vm791_vm2, %v3577_v32 }
 0xb51   : > { %4319 = vmatpush.msra.mxu3 %v7771_v8 }
 0xb55   : > { %v3457_v48 = vpop.f32.mrf.mxu1  ;;  %v3542_v2 = vpop.f32.mrf.mxu0 }
 0xb56   : > { %v3578_v5 = vsub.f32 %v3564_v6, %v3542_v2  ;;  %v3565_v23 = vmul.f32 %v7642_v42, %v3457_v48  ;;  %v5417_v6 = vld [vmem:[%s8529_s5 + $0x78] sm:$0xff]  ;;  %v5418_v48 = vld [vmem:[%s8529_s5 + $0x80] sm:$0xff]  ;;  %v3692_v2 = vld [vmem:[%s8529_s5 + $0x10] sm:$0xff] }
 0xb58   : > { %5393 = vmatmul.msk.f32.gmra.mxu3 %vm791_vm2, %v3578_v5  ;;  %5412 = vmatmul.msk.f32.gmra.mxu2 %vm791_vm2, %v3578_v5 }
 0xb5d   : > { %v3545_v3 = vpop.f32.mrf.mxu0  ;;  %v3460_v49 = vpop.f32.mrf.mxu1 }
 0xb5e   : > { %v3579_v14 = vsub.f32 %v3565_v23, %v3545_v3  ;;  %v3566_v27 = vmul.f32 %v7624_v51, %v3460_v49  ;;  %v3693_v23 = vld [vmem:[%s8529_s5 + $0x18] sm:$0xff]  ;;  %v5477_v3 = vld [vmem:[%s8529_s5 + $0xe0] sm:$0xff] }
 0xb5f   : > { %v3694_v49 = vld [vmem:[%s8529_s5 + $0x20] sm:$0xff] }
 0xb60   : > { %5394 = vmatmul.msk.f32.gmra.mxu3 %vm791_vm2, %v3579_v14  ;;  %5413 = vmatmul.msk.f32.gmra.mxu2 %vm791_vm2, %v3579_v14 }
 0xb65   : > { %v3548_v63 = vpop.f32.mrf.mxu0  ;;  %v3463_v42 = vpop.f32.mrf.mxu1 }
 0xb66   : > { %v3580_v58 = vsub.f32 %v3566_v27, %v3548_v63  ;;  %v3567_v9 = vmul.f32 %v7629_v55, %v3463_v42  ;;  %v5478_v27 = vld [vmem:[%s8529_s5 + $0xe8] sm:$0xff]  ;;  %v5421_v63 = vld [vmem:[%s8529_s5 + $0x98] sm:$0xff] }
 0xb67   : > { %v5423_v42 = vld [vmem:[%s8529_s5 + $0xa8] sm:$0xff] }
 0xb68   : > { %5395 = vmatmul.msk.f32.gmra.mxu3 %vm791_vm2, %v3580_v58  ;;  %5414 = vmatmul.msk.f32.gmra.mxu2 %vm791_vm2, %v3580_v58 }
 0xb6d   : > { %v3551_v44 = vpop.f32.mrf.mxu0 }
 0xb6e   : > { %v3581_v60 = vsub.f32 %v3567_v9, %v3551_v44  ;;  %v3697_v9 = vld [vmem:[%s8529_s5 + $0x38] sm:$0xff]  ;;  %v5481_v44 = vld [vmem:[%s8529_s5 + $0x100] sm:$0xff] }
 0xb70   : > { %5396 = vmatmul.msk.f32.gmra.mxu3 %vm791_vm2, %v3581_v60  ;;  %5415 = vmatmul.msk.f32.gmra.mxu2 %vm791_vm2, %v3581_v60 }
 0xb78   : > { %5463 = vmatmul.msk.f32.vlgmr.msrb.gmra.mxu3 %vm791_vm2, %v7893_v29 }
 0xb79   : > { %5532 = vmatpush.msk.msrb.mxu3 %vm876_vm1, %v7786_v33 }
 0xb80   : > { %5464 = vmatmul.msk.f32.gmra.mxu3 %vm791_vm2, %v7900_v1 }
 0xb88   : > { %5465 = vmatmul.msk.f32.gmra.mxu3 %vm791_vm2, %v7907_v20 }
 0xb8b   : > { %v7996_v51 = vpop.f32.mrf.mxu3  ;;  %v7998_v55 = vpop.f32.mrf.mxu2 }
 0xb90   : > { %5466 = vmatmul.msk.f32.gmra.mxu3 %vm791_vm2, %v7914_v25 }
 0xb93   : > { %v8002_v10 = vpop.f32.mrf.mxu3  ;;  %v3732_v35 = vpop.f32.mrf.mxu2 }
 0xb98   : > { %5467 = vmatmul.msk.f32.gmra.mxu3 %vm791_vm2, %v7921_v0 }
 0xb9b   : > { %v3654_v33 = vpop.f32.mrf.mxu3  ;;  %v3735_v29 = vpop.f32.mrf.mxu2 }
 0xba0   : > { %5468 = vmatmul.msk.f32.gmra.mxu3 %vm791_vm2, %v7928_v52 }
 0xba3   : > { %v3657_v21 = vpop.f32.mrf.mxu3  ;;  %v3738_v41 = vpop.f32.mrf.mxu2 }
 0xba8   : > { %5469 = vmatmul.msk.f32.gmra.mxu3 %vm791_vm2, %v7935_v18 }
 0xbab   : > { %v3660_v1 = vpop.f32.mrf.mxu3  ;;  %v3741_v31 = vpop.f32.mrf.mxu2 }
 0xbb0   : > { %5470 = vmatmul.msk.f32.gmra.mxu3 %vm791_vm2, %v7942_v46 }
 0xbb3   : > { %v3663_v7 = vpop.f32.mrf.mxu3  ;;  %v3744_v57 = vpop.f32.mrf.mxu2 }
 0xbb8   : > { %5471 = vmatmul.msk.f32.gmra.mxu3 %vm791_vm2, %v7949_v37 }
 0xbbb   : > { %v3666_v20 = vpop.f32.mrf.mxu3  ;;  %v3747_v11 = vpop.f32.mrf.mxu2 }
 0xbc0   : > { %5472 = vmatmul.msk.f32.gmra.mxu3 %vm791_vm2, %v3577_v32 }
 0xbc3   : > { %v3669_v36 = vpop.f32.mrf.mxu3  ;;  %v3750_v13 = vpop.f32.mrf.mxu2 }
 0xbc8   : > { %5473 = vmatmul.msk.f32.gmra.mxu3 %vm791_vm2, %v3578_v5  ;;  %v5419_v5 = vld [vmem:[%s8529_s5 + $0x88] sm:$0xff] }
 0xbcb   : > { %v3672_v25 = vpop.f32.mrf.mxu3  ;;  %v3753_v43 = vpop.f32.mrf.mxu2 }
 0xbd0   : > { %5474 = vmatmul.msk.f32.gmra.mxu3 %vm791_vm2, %v3579_v14  ;;  %v5420_v14 = vld [vmem:[%s8529_s5 + $0x90] sm:$0xff] }
 0xbd3   : > { %v3675_v4 = vpop.f32.mrf.mxu3  ;;  %v3756_v17 = vpop.f32.mrf.mxu2 }
 0xbd8   : > { %5475 = vmatmul.msk.f32.gmra.mxu3 %vm791_vm2, %v3580_v58  ;;  %v5480_v58 = vld [vmem:[%s8529_s5 + $0xf8] sm:$0xff] }
 0xbdb   : > { %v3678_v0 = vpop.f32.mrf.mxu3  ;;  %v3759_v38 = vpop.f32.mrf.mxu2 }
 0xbe0   : > { %5476 = vmatmul.msk.f32.gmra.mxu3 %vm791_vm2, %v3581_v60  ;;  %v5424_v60 = vld [vmem:[%s8529_s5 + $0xb0] sm:$0xff] }
 0xbe3   : > { %v3681_v47 = vpop.f32.mrf.mxu3  ;;  %v3762_v50 = vpop.f32.mrf.mxu2 }
 0xbeb   : > { %v3684_v52 = vpop.f32.mrf.mxu3  ;;  %v3765_v39 = vpop.f32.mrf.mxu2 }
 0xbf3   : > { %v3687_v28 = vpop.f32.mrf.mxu3  ;;  %v3768_v19 = vpop.f32.mrf.mxu2 }
 0xbf4   : > { %3830 = vmatpush.msra.mxu1 %v3768_v19  ;;  %3931 = vmatpush.msrb.mxu0 %v3687_v28 }
 0xbf6   : > { %3831 = vmatpush.msra.mxu1 %v3765_v39  ;;  %3932 = vmatpush.msrb.mxu0 %v3684_v52 }
 0xbf8   : > { %3832 = vmatpush.msra.mxu1 %v3762_v50  ;;  %3933 = vmatpush.msrb.mxu0 %v3681_v47 }
 0xbfa   : > { %3833 = vmatpush.msra.mxu1 %v3759_v38  ;;  %3934 = vmatpush.msrb.mxu0 %v3678_v0  ;;  %v5490_v38 = vld [vmem:[%s8529_s5 + $0x148] sm:$0xff] }
 0xbfb   : > { %v8019_v18 = vpop.f32.mrf.mxu3 }
 0xbfc   : > { %3834 = vmatpush.msra.mxu1 %v3756_v17  ;;  %3935 = vmatpush.msrb.mxu0 %v3675_v4  ;;  %v5489_v4 = vld [vmem:[%s8529_s5 + $0x140] sm:$0xff] }
 0xbfe   : > { %3835 = vmatpush.msra.mxu1 %v3753_v43  ;;  %3936 = vmatpush.msrb.mxu0 %v3672_v25  ;;  %v5487_v25 = vld [vmem:[%s8529_s5 + $0x130] sm:$0xff]  ;;  %v5488_v43 = vld [vmem:[%s8529_s5 + $0x138] sm:$0xff] }
 0xc00   : > { %3836 = vmatpush.msra.mxu1 %v3750_v13  ;;  %3937 = vmatpush.msrb.mxu0 %v3669_v36  ;;  %v5429_v36 = vld [vmem:[%s8529_s5 + $0xd8] sm:$0xff]  ;;  %v3703_v13 = vld [vmem:[%s8529_s5 + $0x68] sm:$0xff] }
 0xc02   : > { %3837 = vmatpush.msra.mxu1 %v3747_v11  ;;  %3938 = vmatpush.msrb.mxu0 %v3666_v20  ;;  %v3702_v20 = vld [vmem:[%s8529_s5 + $0x60] sm:$0xff]  ;;  %v5486_v11 = vld [vmem:[%s8529_s5 + $0x128] sm:$0xff] }
 0xc03   : > { %v4016_v59 = vpop.f32.mrf.mxu3 }
 0xc04   : > { %3838 = vmatpush.msra.mxu1 %v3744_v57  ;;  %3939 = vmatpush.msrb.mxu0 %v3663_v7  ;;  %v5485_v7 = vld [vmem:[%s8529_s5 + $0x120] sm:$0xff]  ;;  %v5428_v57 = vld [vmem:[%s8529_s5 + $0xd0] sm:$0xff] }
 0xc06   : > { %3839 = vmatpush.msra.mxu1 %v3741_v31  ;;  %3940 = vmatpush.msrb.mxu0 %v3660_v1  ;;  %v5427_v1 = vld [vmem:[%s8529_s5 + $0xc8] sm:$0xff]  ;;  %v3701_v31 = vld [vmem:[%s8529_s5 + $0x58] sm:$0xff] }
 0xc08   : > { %3840 = vmatpush.msra.mxu1 %v3738_v41  ;;  %3941 = vmatpush.msrb.mxu0 %v3657_v21  ;;  %v3700_v21 = vld [vmem:[%s8529_s5 + $0x50] sm:$0xff]  ;;  %v5484_v41 = vld [vmem:[%s8529_s5 + $0x118] sm:$0xff] }
 0xc0a   : > { %3841 = vmatpush.msra.mxu1 %v3735_v29  ;;  %3942 = vmatpush.msrb.mxu0 %v3654_v33  ;;  %v5483_v33 = vld [vmem:[%s8529_s5 + $0x110] sm:$0xff]  ;;  %v5426_v29 = vld [vmem:[%s8529_s5 + $0xc0] sm:$0xff] }
 0xc0b   : > { %v4019_v12 = vpop.f32.mrf.mxu3 }
 0xc0c   : > { %3842 = vmatpush.msra.mxu1 %v3732_v35  ;;  %3943 = vmatpush.msrb.mxu0 %v8002_v10  ;;  %v5425_v10 = vld [vmem:[%s8529_s5 + $0xb8] sm:$0xff]  ;;  %v3699_v35 = vld [vmem:[%s8529_s5 + $0x48] sm:$0xff] }
 0xc0e   : > { %3843 = vmatpush.msra.mxu1 %v7998_v55  ;;  %3944 = vmatpush.msrb.mxu0 %v7996_v51  ;;  %v3698_v51 = vld [vmem:[%s8529_s5 + $0x40] sm:$0xff]  ;;  %v5482_v55 = vld [vmem:[%s8529_s5 + $0x108] sm:$0xff] }
 0xc0f   : > { %5430 = vmatmul.msk.f32.vlgmr.msra.gmra.mxu1 %vm648_vm0, %v5416_v62  ;;  %5444 = vmatmul.msk.f32.vlgmr.msrb.gmra.mxu0 %vm648_vm0, %v3690_v22 }
 0xc13   : > { %v4022_v53 = vpop.f32.mrf.mxu3 }
 0xc17   : > { %5431 = vmatmul.msk.f32.gmra.mxu1 %vm648_vm0, %v5417_v6  ;;  %5445 = vmatmul.msk.f32.gmra.mxu0 %vm648_vm0, %v3691_v30 }
 0xc1b   : > { %v4025_v46 = vpop.f32.mrf.mxu3 }
 0xc1f   : > { %5432 = vmatmul.msk.f32.gmra.mxu1 %vm648_vm0, %v5418_v48  ;;  %5446 = vmatmul.msk.f32.gmra.mxu0 %vm648_vm0, %v3692_v2 }
 0xc23   : > { %v4028_v40 = vpop.f32.mrf.mxu3 }
 0xc27   : > { %5433 = vmatmul.msk.f32.gmra.mxu1 %vm648_vm0, %v5419_v5  ;;  %5447 = vmatmul.msk.f32.gmra.mxu0 %vm648_vm0, %v3693_v23 }
 0xc2b   : > { %v4031_v54 = vpop.f32.mrf.mxu3 }
 0xc2f   : > { %5434 = vmatmul.msk.f32.gmra.mxu1 %vm648_vm0, %v5420_v14  ;;  %5448 = vmatmul.msk.f32.gmra.mxu0 %vm648_vm0, %v3694_v49 }
 0xc33   : > { %v4034_v56 = vpop.f32.mrf.mxu3 }
 0xc37   : > { %5435 = vmatmul.msk.f32.gmra.mxu1 %vm648_vm0, %v5421_v63 }
 0xc3b   : > { %v4037_v37 = vpop.f32.mrf.mxu3 }
 0xc43   : > { %v4040_v61 = vpop.f32.mrf.mxu3 }
 0xc4b   : > { %v4043_v16 = vpop.f32.mrf.mxu3 }
 0xc53   : > { %v4046_v34 = vpop.f32.mrf.mxu3 }
 0xc5b   : > { %v4049_v32 = vpop.f32.mrf.mxu3 }
 0xc63   : > { %v4052_v45 = vpop.f32.mrf.mxu3 }
 0xc64   : > { %4114 = vmatpush.msrb.mxu2 %v4052_v45 }
 0xc66   : > { %4115 = vmatpush.msrb.mxu2 %v4049_v32 }
 0xc68   : > { %4116 = vmatpush.msrb.mxu2 %v4046_v34 }
 0xc6a   : > { %4117 = vmatpush.msrb.mxu2 %v4043_v16 }
 0xc6c   : > { %4118 = vmatpush.msrb.mxu2 %v4040_v61 }
 0xc6e   : > { %4119 = vmatpush.msrb.mxu2 %v4037_v37 }
 0xc70   : > { %4120 = vmatpush.msrb.mxu2 %v4034_v56 }
 0xc72   : > { %4121 = vmatpush.msrb.mxu2 %v4031_v54 }
 0xc74   : > { %4122 = vmatpush.msrb.mxu2 %v4028_v40 }
 0xc76   : > { %4123 = vmatpush.msrb.mxu2 %v4025_v46 }
 0xc78   : > { %4124 = vmatpush.msrb.mxu2 %v4022_v53 }
 0xc7a   : > { %4125 = vmatpush.msrb.mxu2 %v4019_v12 }
 0xc7c   : > { %4126 = vmatpush.msrb.mxu2 %v4016_v59 }
 0xc7e   : > { %4127 = vmatpush.msrb.mxu2 %v8019_v18 }
 0xc7f   : > { %5491 = vmatmul.msk.f32.vlgmr.msrb.gmra.mxu2 %vm648_vm0, %v5477_v3 }
 0xc80   : > { %5558 = vmatpush.msk.msra.mxu2 %vm876_vm1, %v7751_v24  ;;  %v3695_v24 = vld [vmem:[%s8529_s5 + $0x28] sm:$0xff] }
 0xc81   : > { %5449 = vmatmul.msk.f32.gmra.mxu0 %vm648_vm0, %v3695_v24 }
 0xc82   : > { %4755 = vmatpush.msra.mxu2 %v7757_v15  ;;  %v5479_v15 = vld [vmem:[%s8529_s5 + $0xf0] sm:$0xff] }
 0xc84   : > { %4756 = vmatpush.msra.mxu2 %v7764_v26  ;;  %v5422_v26 = vld [vmem:[%s8529_s5 + $0xa0] sm:$0xff] }
 0xc85   : > { %5436 = vmatmul.msk.f32.gmra.mxu1 %vm648_vm0, %v5422_v26 }
 0xc86   : > { %4757 = vmatpush.msra.mxu2 %v7771_v8  ;;  %v3696_v8 = vld [vmem:[%s8529_s5 + $0x30] sm:$0xff] }
 0xc87   : > { %5492 = vmatmul.msk.f32.gmra.mxu2 %vm648_vm0, %v5478_v27 }
 0xc89   : > { %5450 = vmatmul.msk.f32.gmra.mxu0 %vm648_vm0, %v3696_v8 }
 0xc8c   : > { %v8194_v17 = vpop.f32.mrf.mxu1  ;;  %v8196_v0 = vpop.f32.mrf.mxu0 }
 0xc8d   : > { %5437 = vmatmul.msk.f32.gmra.mxu1 %vm648_vm0, %v5423_v42 }
 0xc8f   : > { %5493 = vmatmul.msk.f32.gmra.mxu2 %vm648_vm0, %v5479_v15 }
 0xc91   : > { %5451 = vmatmul.msk.f32.gmra.mxu0 %vm648_vm0, %v3697_v9 }
 0xc94   : > { %v8202_v47 = vpop.f32.mrf.mxu1  ;;  %v8204_v50 = vpop.f32.mrf.mxu0 }
 0xc95   : > { %5438 = vmatmul.msk.f32.gmra.mxu1 %vm648_vm0, %v5424_v60 }
 0xc97   : > { %5494 = vmatmul.msk.f32.gmra.mxu2 %vm648_vm0, %v5480_v58 }
 0xc99   : > { %5452 = vmatmul.msk.f32.gmra.mxu0 %vm648_vm0, %v3698_v51 }
 0xc9c   : > { %v8206_v52 = vpop.f32.mrf.mxu1  ;;  %v8208_v39 = vpop.f32.mrf.mxu0 }
 0xc9d   : > { %5439 = vmatmul.msk.f32.gmra.mxu1 %vm648_vm0, %v5425_v10 }
 0xc9f   : > { %5495 = vmatmul.msk.f32.gmra.mxu2 %vm648_vm0, %v5481_v44 }
 0xca1   : > { %5453 = vmatmul.msk.f32.gmra.mxu0 %vm648_vm0, %v3699_v35 }
 0xca4   : > { %v8210_v28 = vpop.f32.mrf.mxu1  ;;  %v8212_v19 = vpop.f32.mrf.mxu0 }
 0xca5   : > { %5440 = vmatmul.msk.f32.gmra.mxu1 %vm648_vm0, %v5426_v29 }
 0xca7   : > { %5496 = vmatmul.msk.f32.gmra.mxu2 %vm648_vm0, %v5482_v55 }
 0xca9   : > { %5454 = vmatmul.msk.f32.gmra.mxu0 %vm648_vm0, %v3700_v21 }
 0xcac   : > { %v3857_v59 = vpop.f32.mrf.mxu1  ;;  %v3958_v53 = vpop.f32.mrf.mxu0 }
 0xcad   : > { %5441 = vmatmul.msk.f32.gmra.mxu1 %vm648_vm0, %v5427_v1 }
 0xcaf   : > { %5497 = vmatmul.msk.f32.gmra.mxu2 %vm648_vm0, %v5483_v33 }
 0xcb1   : > { %5455 = vmatmul.msk.f32.gmra.mxu0 %vm648_vm0, %v3701_v31 }
 0xcb4   : > { %v3860_v40 = vpop.f32.mrf.mxu1 }
 0xcb5   : > { %5442 = vmatmul.msk.f32.gmra.mxu1 %vm648_vm0, %v5428_v57 }
 0xcb7   : > { %5498 = vmatmul.msk.f32.gmra.mxu2 %vm648_vm0, %v5484_v41 }
 0xcb9   : > { %5456 = vmatmul.msk.f32.gmra.mxu0 %vm648_vm0, %v3702_v20 }
 0xcbd   : > { %5443 = vmatmul.msk.f32.gmra.mxu1 %vm648_vm0, %v5429_v36 }
 0xcbf   : > { %5499 = vmatmul.msk.f32.gmra.mxu2 %vm648_vm0, %v5485_v7 }
 0xcc1   : > { %5457 = vmatmul.msk.f32.gmra.mxu0 %vm648_vm0, %v3703_v13 }
 0xcc7   : > { %5500 = vmatmul.msk.f32.gmra.mxu2 %vm648_vm0, %v5486_v11 }
 0xccf   : > { %5501 = vmatmul.msk.f32.gmra.mxu2 %vm648_vm0, %v5487_v25 }
 0xcd7   : > { %5502 = vmatmul.msk.f32.gmra.mxu2 %vm648_vm0, %v5488_v43 }
 0xcdf   : > { %5503 = vmatmul.msk.f32.gmra.mxu2 %vm648_vm0, %v5489_v4  ;;  %v3959_v4 = vadd.f32 %v3958_v53, %v3857_v59 }
 0xce7   : > { %5504 = vmatmul.msk.f32.gmra.mxu2 %vm648_vm0, %v5490_v38 }
 0xcfe   : > { %v3961_v54 = vpop.f32.mrf.mxu0 }
 0xcff   : > { %v3962_v36 = vadd.f32 %v3961_v54, %v3860_v40  ;;  %v3956_v40 = vadd.f32 %v8212_v19, %v8210_v28 }
 0xd02   : > { %v8214_v18 = vpop.f32.mrf.mxu2  ;;  %v3863_v37 = vpop.f32.mrf.mxu1 }
 0xd06   : > { %v3964_v61 = vpop.f32.mrf.mxu0 }
 0xd07   : > { %v3965_v7 = vadd.f32 %v3964_v61, %v3863_v37 }
 0xd0a   : > { %v8216_v12 = vpop.f32.mrf.mxu2  ;;  %v3866_v34 = vpop.f32.mrf.mxu1 }
 0xd0e   : > { %v3967_v32 = vpop.f32.mrf.mxu0 }
 0xd0f   : > { %v3968_v1 = vadd.f32 %v3967_v32, %v3866_v34  ;;  %v3953_v34 = vadd.f32 %v8208_v39, %v8206_v52 }
 0xd12   : > { %v8218_v46 = vpop.f32.mrf.mxu2  ;;  %v3869_v22 = vpop.f32.mrf.mxu1 }
 0xd16   : > { %v3970_v6 = vpop.f32.mrf.mxu0 }
 0xd17   : > { %v3971_v21 = vadd.f32 %v3970_v6, %v3869_v22 }
 0xd1a   : > { %v8220_v56 = vpop.f32.mrf.mxu2  ;;  %v3872_v48 = vpop.f32.mrf.mxu1 }
 0xd1b   : > { %v4174_v22 = vadd.f32 %v8220_v56, %v3956_v40 }
 0xd1e   : > { %v3973_v2 = vpop.f32.mrf.mxu0 }
 0xd1f   : > { %v3974_v35 = vadd.f32 %v3973_v2, %v3872_v48 }
 0xd22   : > { %v8222_v16 = vpop.f32.mrf.mxu2  ;;  %v3875_v23 = vpop.f32.mrf.mxu1 }
 0xd23   : > { %v4175_v32 = vadd.f32 %v8222_v16, %v3959_v4  ;;  %v3947_v16 = vadd.f32 %v8196_v0, %v8194_v17 }
 0xd26   : > { %v3976_v3 = vpop.f32.mrf.mxu0 }
 0xd27   : > { %v3977_v55 = vadd.f32 %v3976_v3, %v3875_v23 }
 0xd2a   : > { %v4144_v62 = vpop.f32.mrf.mxu2  ;;  %v3878_v49 = vpop.f32.mrf.mxu1 }
 0xd2b   : > { %v4176_v54 = vadd.f32 %v4144_v62, %v3962_v36  ;;  %v3950_v62 = vadd.f32 %v8204_v50, %v8202_v47 }
 0xd2d   : > { %v4172_v56 = vadd.f32 %v8216_v12, %v3950_v62 }
 0xd2e   : > { %v3979_v27 = vpop.f32.mrf.mxu0 }
 0xd2f   : > { %v3980_v44 = vadd.f32 %v3979_v27, %v3878_v49 }
 0xd32   : > { %v4147_v45 = vpop.f32.mrf.mxu2  ;;  %v3881_v24 = vpop.f32.mrf.mxu1 }
 0xd33   : > { %v4177_v38 = vadd.f32 %v4147_v45, %v3965_v7  ;;  %v4173_v45 = vadd.f32 %v8218_v46, %v3953_v34  ;;  %v4171_v46 = vadd.f32 %v8214_v18, %v3947_v16 }
 0xd36   : > { %v3982_v26 = vpop.f32.mrf.mxu0 }
 0xd37   : > { %v3983_v58 = vadd.f32 %v3982_v26, %v3881_v24  ;;  %v5725_v24 = vld [vmem:[%s8539_s15 + $0x18] sm:$0xf]  ;;  %v5727_v26 = vld [vmem:[%s8540_s16] sm:$0xf] }
 0xd3a   : > { %v4150_v30 = vpop.f32.mrf.mxu2  ;;  %v3884_v42 = vpop.f32.mrf.mxu1 }
 0xd3b   : > { %v4178_v13 = vadd.f32 %v4150_v30, %v3968_v1 }
 0xd3e   : > { %v3985_v9 = vpop.f32.mrf.mxu0 }
 0xd3f   : > { %v3986_v60 = vadd.f32 %v3985_v9, %v3884_v42  ;;  %v5729_v42 = vld [vmem:[%s8539_s15] sm:$0xff] }
 0xd42   : > { %v4153_v5 = vpop.f32.mrf.mxu2 }
 0xd43   : > { %v4179_v57 = vadd.f32 %v4153_v5, %v3971_v21 }
 0xd4a   : > { %v4156_v14 = vpop.f32.mrf.mxu2 }
 0xd4b   : > { %v4180_v31 = vadd.f32 %v4156_v14, %v3974_v35 }
 0xd52   : > { %v4159_v63 = vpop.f32.mrf.mxu2 }
 0xd53   : > { %v4181_v41 = vadd.f32 %v4159_v63, %v3977_v55  ;;  %v4199_v63 = vld [vmem:[%s8535_s11] sm:$0xff] }
 0xd5a   : > { %v4162_v15 = vpop.f32.mrf.mxu2 }
 0xd5b   : > { %v4182_v33 = vadd.f32 %v4162_v15, %v3980_v44  ;;  %v5726_v15 = vld [vmem:[%s8539_s15 + $0x10] sm:$0xff] }
 0xd62   : > { %v4165_v8 = vpop.f32.mrf.mxu2 }
 0xd63   : > { %v4183_v51 = vadd.f32 %v4165_v8, %v3983_v58  ;;  %v5728_v8 = vld [vmem:[%s8539_s15 + $0x8] sm:$0xff] }
 0xd64   : > { %v4200_v58 = vld [vmem:[%s8535_s11 + $0x8] sm:$0xff] }
 0xd65   : > { %5693 = vtanh.f32 %v4183_v51 }
 0xd6a   : > { %v4168_v10 = vpop.f32.mrf.mxu2 }
 0xd6b   : > { %v4184_v29 = vadd.f32 %v4168_v10, %v3986_v60  ;;  %v8224_v20 = vpop.eup %5693 }
 0xd6c   : > { %v4242_v37 = vmul.f32 %v8224_v20, %v8224_v20 }
 0xd6d   : > { %5695 = vtanh.f32 %v4184_v29 }
 0xd6e   : > { %5697 = vtanh.f32 %v4182_v33 }
 0xd6f   : > { %5699 = vtanh.f32 %v4181_v41 }
 0xd70   : > { %5701 = vtanh.f32 %v4180_v31 }
 0xd71   : > { %5703 = vtanh.f32 %v4179_v57 }
 0xd72   : > { %5705 = vtanh.f32 %v4178_v13 }
 0xd73   : > { %v8226_v11 = vpop.eup %5695  ;;  %5707 = vtanh.f32 %v4177_v38 }
 0xd74   : > { %4209 = vmatpush.msrb.mxu1 %v8226_v11  ;;  %v4243_v25 = vmul.f32 %v8226_v11, %v8226_v11  ;;  %v8231_v43 = vpop.eup %5697  ;;  %5709 = vtanh.f32 %v4176_v54 }
 0xd75   : > { %v8236_v61 = vpop.eup %5699  ;;  %v4241_v59 = vmul.f32 %v8231_v43, %v8231_v43  ;;  %5711 = vtanh.f32 %v4175_v32 }
 0xd76   : > { %4210 = vmatpush.msrb.mxu1 %v8224_v20  ;;  %4246 = vmatpush.msra.mxu0 %v4243_v25  ;;  %v8243_v53 = vpop.eup %5701  ;;  %v4240_v28 = vmul.f32 %v8236_v61, %v8236_v61  ;;  %5713 = vtanh.f32 %v4174_v22 }
 0xd77   : > { %v8251_v19 = vpop.eup %5703  ;;  %v4239_v52 = vmul.f32 %v8243_v53, %v8243_v53  ;;  %5715 = vtanh.f32 %v4173_v45 }
 0xd78   : > { %4211 = vmatpush.msrb.mxu1 %v8231_v43  ;;  %4247 = vmatpush.msra.mxu0 %v4242_v37  ;;  %v8259_v39 = vpop.eup %5705  ;;  %v4238_v47 = vmul.f32 %v8251_v19, %v8251_v19  ;;  %5717 = vtanh.f32 %v4172_v56 }
 0xd79   : > { %v8267_v50 = vpop.eup %5707  ;;  %v4237_v17 = vmul.f32 %v8259_v39, %v8259_v39  ;;  %5719 = vtanh.f32 %v4171_v46 }
 0xd7a   : > { %4212 = vmatpush.msrb.mxu1 %v8236_v61  ;;  %4248 = vmatpush.msra.mxu0 %v4241_v59  ;;  %v8273_v0 = vpop.eup %5709  ;;  %v4236_v6 = vmul.f32 %v8267_v50, %v8267_v50 }
 0xd7b   : > { %v8279_v30 = vpop.eup %5711  ;;  %v4235_v12 = vmul.f32 %v8273_v0, %v8273_v0 }
 0xd7c   : > { %4213 = vmatpush.msrb.mxu1 %v8243_v53  ;;  %4249 = vmatpush.msra.mxu0 %v4240_v28  ;;  %v8284_v48 = vpop.eup %5713  ;;  %v4234_v18 = vmul.f32 %v8279_v30, %v8279_v30 }
 0xd7d   : > { %v8289_v2 = vpop.eup %5715  ;;  %v4233_v5 = vmul.f32 %v8284_v48, %v8284_v48 }
 0xd7e   : > { %4214 = vmatpush.msrb.mxu1 %v8251_v19  ;;  %4250 = vmatpush.msra.mxu0 %v4239_v52  ;;  %v8294_v23 = vpop.eup %5717  ;;  %v4232_v3 = vmul.f32 %v8289_v2, %v8289_v2 }
 0xd7f   : > { %v8299_v14 = vpop.eup %5719  ;;  %v4231_v49 = vmul.f32 %v8294_v23, %v8294_v23 }
 0xd80   : > { %4215 = vmatpush.msrb.mxu1 %v8259_v39  ;;  %4251 = vmatpush.msra.mxu0 %v4238_v47  ;;  %v4230_v27 = vmul.f32 %v8299_v14, %v8299_v14 }
 0xd82   : > { %4216 = vmatpush.msrb.mxu1 %v8267_v50  ;;  %4252 = vmatpush.msra.mxu0 %v4237_v17 }
 0xd84   : > { %4217 = vmatpush.msrb.mxu1 %v8273_v0  ;;  %4253 = vmatpush.msra.mxu0 %v4236_v6 }
 0xd86   : > { %4218 = vmatpush.msrb.mxu1 %v8279_v30  ;;  %4254 = vmatpush.msra.mxu0 %v4235_v12  ;;  %v4357_v12 = vld [vmem:[%s8536_s12] sm:$0xff] }
 0xd88   : > { %4219 = vmatpush.msrb.mxu1 %v8284_v48  ;;  %4255 = vmatpush.msra.mxu0 %v4234_v18 }
 0xd8a   : > { %4220 = vmatpush.msrb.mxu1 %v8289_v2  ;;  %4256 = vmatpush.msra.mxu0 %v4233_v5  ;;  %v4358_v5 = vld [vmem:[%s8536_s12 + $0x8] sm:$0xff] }
 0xd8c   : > { %4221 = vmatpush.msrb.mxu1 %v8294_v23  ;;  %4257 = vmatpush.msra.mxu0 %v4232_v3  ;;  %v4359_v3 = vld [vmem:[%s8536_s12 + $0x10] sm:$0xff] }
 0xd8e   : > { %4222 = vmatpush.msrb.mxu1 %v8299_v14  ;;  %4258 = vmatpush.msra.mxu0 %v4231_v49  ;;  %v4360_v49 = vld [vmem:[%s8536_s12 + $0x18] sm:$0xff] }
 0xd8f   : > { %5505 = vmatmul.msk.f32.vlgmr.msrb.gmra.mxu1 %vm648_vm0, %v4199_v63 }
 0xd90   : > { %4259 = vmatpush.msra.mxu0 %v4230_v27  ;;  %5509 = vmatpush.msk.msra.mxu1 %vm876_vm1, %v5725_v24  ;;  %v4361_v27 = vld [vmem:[%s8536_s12 + $0x20] sm:$0xff]  ;;  %v4363_v24 = vld [vmem:[%s8536_s12 + $0x30] sm:$0xff] }
 0xd91   : > { %5507 = vmatmul.msk.f32.vlgmr.msra.gmra.mxu0 %vm648_vm0, %v4199_v63  ;;  %v4362_v63 = vld [vmem:[%s8536_s12 + $0x28] sm:$0xff] }
 0xd92   : > { %4286 = vmatpush.msra.mxu1 %v5726_v15  ;;  %5515 = vmatpush.msk.msrb.mxu0 %vm876_vm1, %v5727_v26  ;;  %v4364_v15 = vld [vmem:[%s8536_s12 + $0x38] sm:$0xff]  ;;  %v4365_v26 = vld [vmem:[%s8536_s12 + $0x40] sm:$0xff] }
 0xd94   : > { %4287 = vmatpush.msra.mxu1 %v5728_v8  ;;  %v4366_v8 = vld [vmem:[%s8536_s12 + $0x48] sm:$0xff] }
 0xd96   : > { %4288 = vmatpush.msra.mxu1 %v5729_v42  ;;  %v4368_v42 = vld [vmem:[%s8536_s12 + $0x58] sm:$0xff] }
 0xd97   : > { %5506 = vmatmul.msk.f32.gmra.mxu1 %vm648_vm0, %v4200_v58 }
 0xd99   : > { %5508 = vmatmul.msk.f32.gmra.mxu0 %vm648_vm0, %v4200_v58  ;;  %v4367_v58 = vld [vmem:[%s8536_s12 + $0x50] sm:$0xff] }
 0xe0c   : > { %v4224_v9 = vpop.f32.mrf.mxu1 }
 0xe0d   : > { %5510 = vmatmul.msk.f32.vlgmr.msra.gmra.mxu1 %vm791_vm2, %v4224_v9  ;;  %v4369_v9 = vld [vmem:[%s8536_s12 + $0x60] sm:$0xff] }
 0xe0e   : > { %v4261_v44 = vpop.f32.mrf.mxu0 }
 0xe0f   : > { %5513 = vmatmul.msk.f32.vlgmr.msra.gmra.mxu3 %vm791_vm2, %v4261_v44  ;;  %v4370_v44 = vld [vmem:[%s8536_s12 + $0x68] sm:$0xff] }
 0xe14   : > { %v4227_v60 = vpop.f32.mrf.mxu1 }
 0xe15   : > { %5511 = vmatmul.msk.f32.gmra.mxu1 %vm791_vm2, %v4227_v60 }
 0xe16   : > { %v4264_v51 = vpop.f32.mrf.mxu0 }
 0xe17   : > { %5514 = vmatmul.msk.f32.gmra.mxu3 %vm791_vm2, %v4264_v51 }
 0xe8a   : > { %v4290_v55 = vpop.f32.mrf.mxu1 }
 0xe8b   : > { %v4296_v10 = vmul.f32 0.020408163, %v4290_v55 }
 0xe8d   : > { %v4329_v35 = vmul.f32 %v4296_v10, %v4296_v10 }
 0xe92   : > { %v4321_v33 = vpop.f32.mrf.mxu3  ;;  %v4293_v29 = vpop.f32.mrf.mxu1 }
 0xe93   : > { %v4327_v21 = vmul.f32 0.020408163, %v4321_v33  ;;  %v4297_v1 = vmul.f32 0.020408163, %v4293_v29 }
 0xe95   : > { %v4331_v41 = vsub.f32 %v4327_v21, %v4329_v35  ;;  %v4330_v7 = vmul.f32 %v4297_v1, %v4297_v1 }
 0xe97   : > { %v4333_v31 = vadd.f32 1e-05, %v4331_v41 }
 0xe99   : > { %5721 = vrsqrt.f32 %v4333_v31  ;;  %vm4341_vm6 = vweird.f32 %v4333_v31 }
 0xe9a   : > { %v4324_v57 = vpop.f32.mrf.mxu3 }
 0xe9b   : > { %v4328_v36 = vmul.f32 0.020408163, %v4324_v57 }
 0xe9d   : > { %v4332_v13 = vsub.f32 %v4328_v36, %v4330_v7 }
 0xe9f   : > { %v5722_v25 = vpop.eup %5721  ;;  %v4334_v4 = vadd.f32 1e-05, %v4332_v13 }
 0xea0   : > { %v4336_v38 = vmul.f32 %v5722_v25, %v4333_v31  ;;  %vm4342_vm1 = vweird.f32 %v5722_v25 }
 0xea1   : > { %5723 = vrsqrt.f32 %v4334_v4  ;;  %vm4343_vm8 = vmor %vm4341_vm6, %vm4342_vm1  ;;  %vm4351_vm10 = vweird.f32 %v4334_v4 }
 0xea2   : > { %v4337_v37 = vmul.f32 %v5722_v25, %v4336_v38 }
 0xea4   : > { %v4338_v40 = vmul.f32 0.5, %v4337_v37 }
 0xea6   : > { %v4339_v54 = vsub.f32 1.5, %v4338_v40 }
 0xea7   : > { %v5724_v59 = vpop.eup %5723 }
 0xea8   : > { %v4340_v34 = vmul.f32 %v5722_v25, %v4339_v54  ;;  %v4346_v32 = vmul.f32 %v5724_v59, %v4334_v4  ;;  %vm4352_vm9 = vweird.f32 %v5724_v59 }
 0xea9   : > { %vm4353_vm11 = vmor %vm4351_vm10, %vm4352_vm9 }
 0xeaa   : > { %v4347_v28 = vmul.f32 %v5724_v59, %v4346_v32  ;;  %v4344_v62 = vsel %vm4343_vm8, %v5722_v25, %v4340_v34 }
 0xeab   : > { %v4355_v22 = vmul.f32 %v4344_v62, %v4296_v10  ;;  %5516 = vmatmul.msk.f32.vlgmr.msrb.gmra.mxu0 %vm1744_vm7, %v4344_v62 }
 0xeac   : > { %v4348_v52 = vmul.f32 0.5, %v4347_v28 }
 0xead   : > { %5533 = vmatmul.msk.f32.vlgmr.msrb.gmra.mxu3 %vm1744_vm7, %v4355_v22 }
 0xeae   : > { %v4349_v16 = vsub.f32 1.5, %v4348_v52 }
 0xeb0   : > { %v4350_v45 = vmul.f32 %v5724_v59, %v4349_v16 }
 0xeb2   : > { %v4354_v47 = vsel %vm4353_vm11, %v5724_v59, %v4350_v45 }
 0xeb3   : > { %v4356_v56 = vmul.f32 %v4354_v47, %v4297_v1  ;;  %5517 = vmatmul.msk.f32.gmra.mxu0 %vm1744_vm7, %v4354_v47 }
 0xeb5   : > { %5534 = vmatmul.msk.f32.gmra.mxu3 %vm1744_vm7, %v4356_v56 }
 0xf28   : > { %v4394_v17 = vpop.f32.mrf.mxu0 }
 0xf30   : > { %v4397_v46 = vpop.f32.mrf.mxu0  ;;  %v4524_v6 = vpop.f32.mrf.mxu3 }
 0xf31   : > { %4456 = vmatpush.msrb.mxu1 %v4397_v46 }
 0xf33   : > { %4457 = vmatpush.msrb.mxu1 %v4394_v17 }
 0xf34   : > { %5518 = vmatmul.msk.f32.vlgmr.msrb.gmra.mxu1 %vm1777_vm12, %v4357_v12 }
 0xf38   : > { %v4527_v18 = vpop.f32.mrf.mxu3 }
 0xf39   : > { %4544 = vmatpush.msra.mxu0 %v4527_v18 }
 0xf3b   : > { %4545 = vmatpush.msra.mxu0 %v4524_v6 }
 0xf3c   : > { %5519 = vmatmul.msk.f32.gmra.mxu1 %vm1777_vm12, %v4358_v5  ;;  %5535 = vmatmul.msk.f32.vlgmr.msra.gmra.mxu0 %vm1777_vm12, %v4357_v12 }
 0xf44   : > { %5520 = vmatmul.msk.f32.gmra.mxu1 %vm1777_vm12, %v4359_v3  ;;  %5536 = vmatmul.msk.f32.gmra.mxu0 %vm1777_vm12, %v4358_v5 }
 0xf4c   : > { %5521 = vmatmul.msk.f32.gmra.mxu1 %vm1777_vm12, %v4360_v49  ;;  %5537 = vmatmul.msk.f32.gmra.mxu0 %vm1777_vm12, %v4359_v3 }
 0xf54   : > { %5522 = vmatmul.msk.f32.gmra.mxu1 %vm1777_vm12, %v4361_v27  ;;  %5538 = vmatmul.msk.f32.gmra.mxu0 %vm1777_vm12, %v4360_v49 }
 0xf5c   : > { %5523 = vmatmul.msk.f32.gmra.mxu1 %vm1777_vm12, %v4362_v63  ;;  %5539 = vmatmul.msk.f32.gmra.mxu0 %vm1777_vm12, %v4361_v27 }
 0xf64   : > { %5524 = vmatmul.msk.f32.gmra.mxu1 %vm1777_vm12, %v4363_v24  ;;  %5540 = vmatmul.msk.f32.gmra.mxu0 %vm1777_vm12, %v4362_v63 }
 0xf6c   : > { %5525 = vmatmul.msk.f32.gmra.mxu1 %vm1777_vm12, %v4364_v15  ;;  %5541 = vmatmul.msk.f32.gmra.mxu0 %vm1777_vm12, %v4363_v24 }
 0xf74   : > { %5526 = vmatmul.msk.f32.gmra.mxu1 %vm1777_vm12, %v4365_v26  ;;  %5542 = vmatmul.msk.f32.gmra.mxu0 %vm1777_vm12, %v4364_v15 }
 0xf7c   : > { %5527 = vmatmul.msk.f32.gmra.mxu1 %vm1777_vm12, %v4366_v8  ;;  %5543 = vmatmul.msk.f32.gmra.mxu0 %vm1777_vm12, %v4365_v26 }
 0xf84   : > { %5528 = vmatmul.msk.f32.gmra.mxu1 %vm1777_vm12, %v4367_v58  ;;  %5544 = vmatmul.msk.f32.gmra.mxu0 %vm1777_vm12, %v4366_v8 }
 0xf8c   : > { %5529 = vmatmul.msk.f32.gmra.mxu1 %vm1777_vm12, %v4368_v42  ;;  %5545 = vmatmul.msk.f32.gmra.mxu0 %vm1777_vm12, %v4367_v58 }
 0xf94   : > { %5530 = vmatmul.msk.f32.gmra.mxu1 %vm1777_vm12, %v4369_v9  ;;  %5546 = vmatmul.msk.f32.gmra.mxu0 %vm1777_vm12, %v4368_v42  ;;  %v4622_v42 = vld [vmem:[%s8541_s17 + $0x28] sm:$0xff] }
 0xf9c   : > { %5531 = vmatmul.msk.f32.gmra.mxu1 %vm1777_vm12, %v4370_v44  ;;  %5547 = vmatmul.msk.f32.gmra.mxu0 %vm1777_vm12, %v4369_v9  ;;  %v4623_v9 = vld [vmem:[%s8541_s17 + $0x30] sm:$0xff] }
 0xfa4   : > { %5548 = vmatmul.msk.f32.gmra.mxu0 %vm1777_vm12, %v4370_v44  ;;  %v4624_v44 = vld [vmem:[%s8541_s17 + $0x38] sm:$0xff]  ;;  %vm4823_vm12 = vcmask 25600  }
 0xfb1   : > { %v4459_v60 = vpop.f32.mrf.mxu1 }
 0xfb2   : > { %v8413_v51 = vmul.f32 %v8299_v14, %v4459_v60  ;;  %v4625_v60 = vld [vmem:[%s8541_s17 + $0x40] sm:$0x3f] }
 0xfb9   : > { %v4462_v55 = vpop.f32.mrf.mxu1  ;;  %v8415_v10 = vpop.f32.mrf.mxu0 }
 0xfba   : > { %v4603_v35 = vsub.f32 %v8413_v51, %v8415_v10  ;;  %v8420_v33 = vmul.f32 %v8294_v23, %v4462_v55  ;;  %v4697_v51 = vld [vmem:[%s8542_s18] sm:$0xff] }
 0xfc1   : > { %v4465_v29 = vpop.f32.mrf.mxu1  ;;  %v4550_v21 = vpop.f32.mrf.mxu0 }
 0xfc2   : > { %v4604_v41 = vsub.f32 %v8420_v33, %v4550_v21  ;;  %v4591_v1 = vmul.f32 %v8289_v2, %v4465_v29  ;;  %v4699_v21 = vld [vmem:[%s8542_s18 + $0x10] sm:$0xff] }
 0xfc9   : > { %v4468_v31 = vpop.f32.mrf.mxu1  ;;  %v4553_v7 = vpop.f32.mrf.mxu0 }
 0xfca   : > { %v4605_v57 = vsub.f32 %v4591_v1, %v4553_v7  ;;  %v4592_v14 = vmul.f32 %v8284_v48, %v4468_v31  ;;  %v4700_v31 = vld [vmem:[%s8542_s18 + $0x18] sm:$0xff] }
 0xfd1   : > { %v4471_v36 = vpop.f32.mrf.mxu1  ;;  %v4556_v13 = vpop.f32.mrf.mxu0 }
 0xfd2   : > { %v4606_v25 = vsub.f32 %v4592_v14, %v4556_v13  ;;  %v4593_v4 = vmul.f32 %v8279_v30, %v4471_v36  ;;  %v4701_v14 = vld [vmem:[%s8542_s18 + $0x20] sm:$0xff] }
 0xfd9   : > { %v4474_v38 = vpop.f32.mrf.mxu1  ;;  %v4559_v37 = vpop.f32.mrf.mxu0 }
 0xfda   : > { %v4607_v23 = vsub.f32 %v4593_v4, %v4559_v37  ;;  %v4594_v40 = vmul.f32 %v8273_v0, %v4474_v38  ;;  %v4703_v37 = vld [vmem:[%s8542_s18 + $0x30] sm:$0xff] }
 0xfe1   : > { %v4477_v54 = vpop.f32.mrf.mxu1  ;;  %v4562_v59 = vpop.f32.mrf.mxu0 }
 0xfe2   : > { %v4608_v34 = vsub.f32 %v4594_v40, %v4562_v59  ;;  %v4595_v2 = vmul.f32 %v8267_v50, %v4477_v54  ;;  %v4704_v54 = vld [vmem:[%s8542_s18 + $0x38] sm:$0xff] }
 0xfe9   : > { %v4480_v32 = vpop.f32.mrf.mxu1  ;;  %v4565_v28 = vpop.f32.mrf.mxu0 }
 0xfea   : > { %v4609_v62 = vsub.f32 %v4595_v2, %v4565_v28  ;;  %v4705_v2 = vld [vmem:[%s8542_s18 + $0x40] sm:$0x3f] }
 0xff1   : > { %v4483_v22 = vpop.f32.mrf.mxu1  ;;  %v4568_v48 = vpop.f32.mrf.mxu0 }
 0xff2   : > { %v4597_v26 = vmul.f32 %v8251_v19, %v4483_v22  ;;  %v4620_v19 = vld [vmem:[%s8541_s17 + $0x18] sm:$0xff] }
 0xff9   : > { %v4486_v52 = vpop.f32.mrf.mxu1  ;;  %v4571_v16 = vpop.f32.mrf.mxu0 }
 0xffa   : > { %v4598_v24 = vmul.f32 %v8243_v53, %v4486_v52  ;;  %v4619_v53 = vld [vmem:[%s8541_s17 + $0x10] sm:$0xff] }
0x1001   : > { %v4489_v45 = vpop.f32.mrf.mxu1  ;;  %v4574_v47 = vpop.f32.mrf.mxu0 }
0x1002   : > { %v4599_v27 = vmul.f32 %v8236_v61, %v4489_v45  ;;  %v4612_v8 = vsub.f32 %v4598_v24, %v4574_v47  ;;  %v4618_v61 = vld [vmem:[%s8541_s17 + $0x8] sm:$0xff] }
0x1009   : > { %v4492_v30 = vpop.f32.mrf.mxu1  ;;  %v4577_v56 = vpop.f32.mrf.mxu0 }
0x100a   : > { %v4600_v3 = vmul.f32 %v8231_v43, %v4492_v30  ;;  %v4613_v15 = vsub.f32 %v4599_v27, %v4577_v56  ;;  %v4617_v43 = vld [vmem:[%s8541_s17] sm:$0xff] }
0x1011   : > { %v4580_v17 = vpop.f32.mrf.mxu0  ;;  %v4495_v46 = vpop.f32.mrf.mxu1 }
0x1012   : > { %v4601_v50 = vmul.f32 %v8224_v20, %v4495_v46  ;;  %v4614_v63 = vsub.f32 %v4600_v3, %v4580_v17  ;;  %v4611_v20 = vsub.f32 %v4597_v26, %v4571_v16  ;;  %v4786_v17 = vld [vmem:[%s8543_s19] sm:$0xff]  ;;  %v4787_v46 = vld [vmem:[%s8543_s19 + $0x8] sm:$0x3] }
0x1019   : > { %v4583_v6 = vpop.f32.mrf.mxu0  ;;  %v4498_v0 = vpop.f32.mrf.mxu1 }
0x101a   : > { %v4602_v12 = vmul.f32 %v8226_v11, %v4498_v0  ;;  %v4615_v49 = vsub.f32 %v4601_v50, %v4583_v6  ;;  %v4596_v11 = vmul.f32 %v8259_v39, %v4480_v32  ;;  %v4621_v39 = vld [vmem:[%s8541_s17 + $0x20] sm:$0xff] }
0x101c   : > { %v4610_v58 = vsub.f32 %v4596_v11, %v4568_v48 }
0x1021   : > { %v4586_v18 = vpop.f32.mrf.mxu0 }
0x1022   : > { %v4616_v5 = vsub.f32 %v4602_v12, %v4586_v18 }
0x1024   : > { %4655 = vmatpush.msra.mxu3 %v4616_v5 }
0x1026   : > { %4656 = vmatpush.msra.mxu3 %v4615_v49 }
0x1028   : > { %4657 = vmatpush.msra.mxu3 %v4614_v63 }
0x102a   : > { %4658 = vmatpush.msra.mxu3 %v4613_v15 }
0x102c   : > { %4659 = vmatpush.msra.mxu3 %v4612_v8 }
0x102e   : > { %4660 = vmatpush.msra.mxu3 %v4611_v20 }
0x1030   : > { %4661 = vmatpush.msra.mxu3 %v4610_v58 }
0x1032   : > { %4662 = vmatpush.msra.mxu3 %v4609_v62 }
0x1034   : > { %4663 = vmatpush.msra.mxu3 %v4608_v34 }
0x1036   : > { %4664 = vmatpush.msra.mxu3 %v4607_v23 }
0x1038   : > { %4665 = vmatpush.msra.mxu3 %v4606_v25  ;;  %v4702_v25 = vld [vmem:[%s8542_s18 + $0x28] sm:$0xff] }
0x103a   : > { %4666 = vmatpush.msra.mxu3 %v4605_v57 }
0x103c   : > { %4667 = vmatpush.msra.mxu3 %v4604_v41 }
0x103e   : > { %4668 = vmatpush.msra.mxu3 %v4603_v35  ;;  %v4698_v35 = vld [vmem:[%s8542_s18 + $0x8] sm:$0xff] }
0x103f   : > { %5549 = vmatmul.msk.f32.vlgmr.msra.gmra.mxu3 %vm648_vm0, %v4617_v43 }
0x1047   : > { %5550 = vmatmul.msk.f32.gmra.mxu3 %vm648_vm0, %v4618_v61 }
0x104f   : > { %5551 = vmatmul.msk.f32.gmra.mxu3 %vm648_vm0, %v4619_v53 }
0x1057   : > { %5552 = vmatmul.msk.f32.gmra.mxu3 %vm648_vm0, %v4620_v19 }
0x105f   : > { %5553 = vmatmul.msk.f32.gmra.mxu3 %vm648_vm0, %v4621_v39 }
0x1067   : > { %5554 = vmatmul.msk.f32.gmra.mxu3 %vm648_vm0, %v4622_v42 }
0x106f   : > { %5555 = vmatmul.msk.f32.gmra.mxu3 %vm648_vm0, %v4623_v9 }
0x1077   : > { %5556 = vmatmul.msk.f32.gmra.mxu3 %vm648_vm0, %v4624_v44 }
0x107f   : > { %5557 = vmatmul.msk.f32.gmra.mxu3 %vm648_vm0, %v4625_v60  ;;  %vm4795_vm0 = vcmask 1045504  }
0x10c2   : > { %v4670_v55 = vpop.f32.mrf.mxu3 }
0x10c3   : > { %v4706_v10 = vmul.f32 %v4697_v51, %v4670_v55 }
0x10c5   : > { %5559 = vmatmul.msk.f32.vlgmr.msra.gmra.mxu2 %vm791_vm2, %v4706_v10 }
0x10ca   : > { %v4673_v33 = vpop.f32.mrf.mxu3 }
0x10cb   : > { %v4707_v29 = vmul.f32 %v4698_v35, %v4673_v33 }
0x10cd   : > { %5560 = vmatmul.msk.f32.gmra.mxu2 %vm791_vm2, %v4707_v29 }
0x10d2   : > { %v4676_v41 = vpop.f32.mrf.mxu3 }
0x10d3   : > { %v4708_v1 = vmul.f32 %v4699_v21, %v4676_v41 }
0x10d5   : > { %5561 = vmatmul.msk.f32.gmra.mxu2 %vm791_vm2, %v4708_v1 }
0x10da   : > { %v4679_v7 = vpop.f32.mrf.mxu3 }
0x10db   : > { %v4709_v57 = vmul.f32 %v4700_v31, %v4679_v7 }
0x10dd   : > { %5562 = vmatmul.msk.f32.gmra.mxu2 %vm791_vm2, %v4709_v57 }
0x10e2   : > { %v4682_v36 = vpop.f32.mrf.mxu3 }
0x10e3   : > { %v4710_v13 = vmul.f32 %v4701_v14, %v4682_v36 }
0x10e5   : > { %5563 = vmatmul.msk.f32.gmra.mxu2 %vm791_vm2, %v4710_v13 }
0x10ea   : > { %v4685_v4 = vpop.f32.mrf.mxu3 }
0x10eb   : > { %v4711_v38 = vmul.f32 %v4702_v25, %v4685_v4 }
0x10ed   : > { %5564 = vmatmul.msk.f32.gmra.mxu2 %vm791_vm2, %v4711_v38 }
0x10f2   : > { %v4688_v23 = vpop.f32.mrf.mxu3 }
0x10f3   : > { %v4712_v40 = vmul.f32 %v4703_v37, %v4688_v23 }
0x10f5   : > { %5565 = vmatmul.msk.f32.gmra.mxu2 %vm791_vm2, %v4712_v40 }
0x10fa   : > { %v4691_v59 = vpop.f32.mrf.mxu3 }
0x10fb   : > { %v4713_v34 = vmul.f32 %v4704_v54, %v4691_v59 }
0x10fd   : > { %5566 = vmatmul.msk.f32.gmra.mxu2 %vm791_vm2, %v4713_v34 }
0x1102   : > { %v4694_v32 = vpop.f32.mrf.mxu3 }
0x1103   : > { %v4714_v28 = vmul.f32 %v4705_v2, %v4694_v32 }
0x1105   : > { %5567 = vmatmul.msk.f32.gmra.mxu2 %vm791_vm2, %v4714_v28  ;;  %vm4788_vm2 = vcmask 572416  }
0x1148   : > { %v4759_v62 = vpop.f32.mrf.mxu2 }
0x1150   : > { %v4762_v22 = vpop.f32.mrf.mxu2 }
0x1158   : > { %v4765_v48 = vpop.f32.mrf.mxu2 }
0x1160   : > { %v4768_v52 = vpop.f32.mrf.mxu2 }
0x1168   : > { %v4771_v16 = vpop.f32.mrf.mxu2 }
0x1170   : > { %v4774_v45 = vpop.f32.mrf.mxu2 }
0x1178   : > { %v4777_v47 = vpop.f32.mrf.mxu2 }
0x1180   : > { %v4780_v30 = vpop.f32.mrf.mxu2 }
0x1188   : > { %v4783_v56 = vpop.f32.mrf.mxu2 }
0x1189   : > { %5568 = vmatpush.msk.msrb.mxu3 %vm4795_vm0, %v4783_v56 }
0x118b   : > { %4807 = vmatpush.msrb.mxu3 %v4780_v30 }
0x118d   : > { %4808 = vmatpush.msrb.mxu3 %v4777_v47 }
0x118f   : > { %4809 = vmatpush.msrb.mxu3 %v4774_v45 }
0x1191   : > { %4810 = vmatpush.msrb.mxu3 %v4771_v16 }
0x1193   : > { %4811 = vmatpush.msrb.mxu3 %v4768_v52 }
0x1195   : > { %4812 = vmatpush.msrb.mxu3 %v4765_v48 }
0x1197   : > { %4813 = vmatpush.msrb.mxu3 %v4762_v22 }
0x1199   : > { %4814 = vmatpush.msrb.mxu3 %v4759_v62 }
0x119a   : > { %5569 = vmatmul.msk.f32.vlgmr.msrb.gmra.mxu3 %vm4788_vm2, %v4786_v17 }
0x11a2   : > { %5570 = vmatmul.msk.f32.gmra.mxu3 %vm4788_vm2, %v4787_v46 }
0x121d   : > { %v4816_v6 = vpop.f32.mrf.mxu3 }
0x121e   : > { %4822 = vst.msk [vmem:[%s629_s30] sm:$0xff] %vm1744_vm7, %v4816_v6 }
0x1225   : > { %v4819_v0 = vpop.f32.mrf.mxu3 }
0x1226   : > { %4824 = vst.msk [vmem:[%s629_s30 + $0x8] sm:$0x3] %vm4823_vm12, %v4819_v0 }
0x1227 PF: > { %s8633_s0 = sld [smem:[#allocation2_spill]] }
0x122d   : > { %s30_s1 = sadd.s32 1, %s8633_s0  }
0x122e   : > { %p27_p4 = scmp.ge.s32.totalorder %s30_s1, 4  }
0x1230   :  { %29 = sbr.rel (!%p27_p4) target bundleno = 6 (0x6), region = 142 }

</bundles_post_ra>
